<compile_context>
chip_gen: v5e
topology: v5e:2x2
jax: 0.10.0
libtpu: 0.0.40
codegen_flags: <defaults>
</compile_context>

<pallas_src>
import functools

import jax
import jax.numpy as jnp
import numpy as np
from jax import lax
from jax.experimental import pallas as pl
from jax.experimental.pallas import tpu as pltpu


def _conv_kernel(x_ref, w_ref, b_ref, o_ref, xpad_ref, *,
                 ksize, stride, dilation, pad, out_h, out_w, row_tile,
                 has_bias):
    """One batch element: strided / dilated 2D conv + optional bias.

    x_ref   : (1, H, W, Cin)              input tile (auto-pipelined DMA)
    w_ref   : (k*k*Cin, Cout)  bf16       flattened HWIO weights
    b_ref   : (1, Cout)        f32        bias (zeros when bias=False)
    o_ref   : (1, out_h, out_w, Cout)     strided output tile
    xpad_ref: (H+2p, W+2p, Cin)           VMEM scratch: zero-padded input
    """
    _, H, W, Cin = x_ref.shape
    Cout = o_ref.shape[3]
    Hp, Wp = H + 2 * pad, W + 2 * pad

    # --- stage the input into a zero-padded VMEM scratch (no HBM pad copy) ---
    if pad > 0:
        zr = jnp.zeros((pad, Wp, Cin), xpad_ref.dtype)
        xpad_ref[0:pad, :, :] = zr
        xpad_ref[pad + H:, :, :] = zr
        zc = jnp.zeros((Hp, pad, Cin), xpad_ref.dtype)
        xpad_ref[:, 0:pad, :] = zc
        xpad_ref[:, pad + W:, :] = zc
    xpad_ref[pad:pad + H, pad:pad + W, :] = x_ref[0]

    w = w_ref[...]                           # (k*k*Cin, Cout) bf16
    b = b_ref[...] if has_bias else None     # (1, Cout)       f32

    # --- row-chunked (strided) im2col + one MXU matmul per chunk -------------
    for r0 in range(0, out_h, row_tile):
        taps = []
        for kh in range(ksize):
            h0 = r0 * stride + kh * dilation
            if stride == 1:
                # Read one slab of rows per kh tap, reuse it for all kw.
                rows = xpad_ref[h0:h0 + row_tile, :, :]        # (TH, Wp, Cin)
                rows = rows.astype(jnp.bfloat16)
                for kw in range(ksize):
                    w0 = kw * dilation
                    taps.append(rows[:, w0:w0 + out_w, :]
                                .reshape(row_tile * out_w, Cin))
            else:
                # Strided gather of exactly the rows/cols this tap needs.
                for kw in range(ksize):
                    w0 = kw * dilation
                    tap = xpad_ref[pl.ds(h0, row_tile, stride),
                                   pl.ds(w0, out_w, stride), :]  # (TH, Wo, Cin)
                    taps.append(tap.astype(jnp.bfloat16)
                                .reshape(row_tile * out_w, Cin))
        patches = taps[0] if len(taps) == 1 else jnp.concatenate(taps, axis=-1)
        acc = jnp.dot(patches, w, preferred_element_type=jnp.float32)  # (TH*Wo, Cout)
        if has_bias:
            acc = acc + b
        o_ref[:, r0:r0 + row_tile, :, :] = (
            acc.reshape(1, row_tile, out_w, Cout).astype(o_ref.dtype))


def conv2d_forward(x_nchw, weight_oihw, bias=None, *, stride=1, dilation=1,
                   row_tile=None):
    """Forward of the PyTorch `_conv_` module.  NCHW in, NCHW out."""
    N, Cin, H, W = x_nchw.shape
    Cout, Cin_w, kh_, kw_ = weight_oihw.shape
    assert Cin_w == Cin and kh_ == kw_, "square kernels, no groups"
    k = kh_
    pad = dilation * (k - 1) // 2
    out_h = (H + 2 * pad - dilation * (k - 1) - 1) // stride + 1
    out_w = (W + 2 * pad - dilation * (k - 1) - 1) // stride + 1

    x_nhwc = jnp.transpose(x_nchw, (0, 2, 3, 1))                     # (N, H, W, Cin)
    w_flat = (jnp.transpose(weight_oihw, (2, 3, 1, 0))               # HWIO
              .reshape(k * k * Cin, Cout).astype(jnp.bfloat16))
    has_bias = bias is not None
    if has_bias:
        b = bias.reshape(1, Cout).astype(jnp.float32)
    else:
        b = jnp.zeros((1, Cout), jnp.float32)

    if row_tile is None:                       # largest divisor of out_h <= 128
        row_tile = min(out_h, 128)
        while out_h % row_tile:
            row_tile -= 1
    assert out_h % row_tile == 0

    kernel = functools.partial(
        _conv_kernel, ksize=k, stride=stride, dilation=dilation, pad=pad,
        out_h=out_h, out_w=out_w, row_tile=row_tile, has_bias=has_bias)

    out = pl.pallas_call(
        kernel,
        out_shape=jax.ShapeDtypeStruct((N, out_h, out_w, Cout), x_nchw.dtype),
        grid=(N,),
        in_specs=[
            pl.BlockSpec((1, H, W, Cin), lambda n: (n, 0, 0, 0)),    # input (single read)
            pl.BlockSpec((k * k * Cin, Cout), lambda n: (0, 0)),     # weights (bf16, resident)
            pl.BlockSpec((1, Cout), lambda n: (0, 0)),               # bias
        ],
        out_specs=pl.BlockSpec((1, out_h, out_w, Cout), lambda n: (n, 0, 0, 0)),
        scratch_shapes=[pltpu.VMEM((H + 2 * pad, W + 2 * pad, Cin), x_nchw.dtype)],
        compiler_params=pltpu.CompilerParams(
            dimension_semantics=("parallel",),
            vmem_limit_bytes=64 * 1024 * 1024),
    )(x_nhwc, w_flat, b)

    return jnp.transpose(out, (0, 3, 1, 2))                          # back to NCHW


def conv2d_reference(x_nchw, weight_oihw, bias=None, *, stride=1, dilation=1):
    """Pure-JAX reference mirroring nn.Conv2d (same bf16 operands / f32 acc)."""
    Cout, Cin, k, _ = weight_oihw.shape
    pad = dilation * (k - 1) // 2
    x_nhwc = jnp.transpose(x_nchw, (0, 2, 3, 1)).astype(jnp.bfloat16)
    w_hwio = jnp.transpose(weight_oihw, (2, 3, 1, 0)).astype(jnp.bfloat16)
    out = lax.conv_general_dilated(
        x_nhwc, w_hwio, window_strides=(stride, stride),
        padding=((pad, pad), (pad, pad)), rhs_dilation=(dilation, dilation),
        dimension_numbers=("NHWC", "HWIO", "NHWC"),
        preferred_element_type=jnp.float32)
    if bias is not None:
        out = out + bias.reshape(1, 1, 1, -1).astype(jnp.float32)
    out = out.astype(x_nchw.dtype)
    return jnp.transpose(out, (0, 3, 1, 2))


if __name__ == "__main__":
    key = jax.random.PRNGKey(0)

    def xavier_uniform(k, cout, cin, ks):
        fan_in, fan_out = cin * ks * ks, cout * ks * ks
        bound = float(np.sqrt(6.0 / (fan_in + fan_out)))
        return jax.random.uniform(k, (cout, cin, ks, ks), jnp.float32, -bound, bound)

    N, H, W = 2, 16, 16
    configs = [
        # (Cin, Cout, ksize, stride, dilation, use_bias, row_tile)
        (4, 8, 3, 1, 1, True, None),   # plain 3x3
        (4, 8, 3, 1, 2, True, 8),      # dilation 2 + in-kernel row chunking
        (4, 8, 3, 2, 1, True, None),   # stride 2, 3x3: strided in-kernel taps
        (4, 8, 1, 2, 1, False, None),  # 1x1 conv, stride 2, no bias
    ]

    for cin, cout, ks, s, d, use_bias, rt in configs:
        kx, kw_, kb, key = jax.random.split(key, 4)
        x = jax.random.normal(kx, (N, cin, H, W), jnp.float32)
        wgt = xavier_uniform(kw_, cout, cin, ks)
        bias = 0.1 * jax.random.normal(kb, (cout,), jnp.float32) if use_bias else None

        out = conv2d_forward(x, wgt, bias, stride=s, dilation=d, row_tile=rt)
        out = jax.block_until_ready(out)

        ref = conv2d_reference(x, wgt, bias, stride=s, dilation=d)
        np.testing.assert_allclose(np.asarray(out), np.asarray(ref),
                                   rtol=1e-3, atol=1e-3)

    print("KERNEL_OK")
</pallas_src>

<mosaic_0001>
module attributes {stable_mosaic.version = 11 : i64} {
  func.func @_conv_kernel(%arg0: i32, %arg1: memref<1x16x16x4xf32, #tpu.memory_space<vmem>>, %arg2: memref<36x8xbf16, #tpu.memory_space<vmem>>, %arg3: memref<1x8xf32, #tpu.memory_space<vmem>>, %arg4: memref<1x16x16x8xf32, #tpu.memory_space<vmem>>, %arg5: memref<18x18x4xf32, #tpu.memory_space<vmem>>) attributes {dimension_semantics = [#tpu.dimension_semantics<parallel>], iteration_bounds = array<i64: 2>, scalar_prefetch = 0 : i64, scratch_operands = 1 : i64, tpu.core_type = #tpu.core_type<tc>, window_params = [{transform_indices = @transform_0, window_bounds = array<i64: 1, 16, 16, 4>}, {pipeline_mode = #tpu.pipeline_mode<synchronous>, transform_indices = @transform_1, window_bounds = array<i64: 36, 8>}, {pipeline_mode = #tpu.pipeline_mode<synchronous>, transform_indices = @transform_2, window_bounds = array<i64: 1, 8>}, {transform_indices = @transform_3, window_bounds = array<i64: 1, 16, 16, 8>}]} {
    %cst = arith.constant 0.000000e+00 : f32
    %0 = vector.broadcast %cst : f32 to vector<1x18x4xf32>
    %c0 = arith.constant 0 : index
    %c0_0 = arith.constant 0 : index
    %c0_1 = arith.constant 0 : index
    %1 = vector.load %arg5[%c0, %c0_0, %c0_1] : memref<18x18x4xf32, #tpu.memory_space<vmem>>, vector<1x18x4xf32>
    tpu.vector_store %arg5[%c0, %c0_0, %c0_1], %0 {strides = array<i32>} : memref<18x18x4xf32, #tpu.memory_space<vmem>>, vector<1x18x4xf32>,
    %c17 = arith.constant 17 : index
    %c0_2 = arith.constant 0 : index
    %c0_3 = arith.constant 0 : index
    %2 = vector.load %arg5[%c17, %c0_2, %c0_3] : memref<18x18x4xf32, #tpu.memory_space<vmem>>, vector<1x18x4xf32>
    tpu.vector_store %arg5[%c17, %c0_2, %c0_3], %0 {strides = array<i32>} : memref<18x18x4xf32, #tpu.memory_space<vmem>>, vector<1x18x4xf32>,
    %cst_4 = arith.constant 0.000000e+00 : f32
    %3 = vector.broadcast %cst_4 : f32 to vector<18x1x4xf32>
    %c0_5 = arith.constant 0 : index
    %c0_6 = arith.constant 0 : index
    %c0_7 = arith.constant 0 : index
    %4 = vector.load %arg5[%c0_5, %c0_6, %c0_7] : memref<18x18x4xf32, #tpu.memory_space<vmem>>, vector<18x1x4xf32>
    tpu.vector_store %arg5[%c0_5, %c0_6, %c0_7], %3 {strides = array<i32>} : memref<18x18x4xf32, #tpu.memory_space<vmem>>, vector<18x1x4xf32>,
    %c0_8 = arith.constant 0 : index
    %c17_9 = arith.constant 17 : index
    %c0_10 = arith.constant 0 : index
    %5 = vector.load %arg5[%c0_8, %c17_9, %c0_10] : memref<18x18x4xf32, #tpu.memory_space<vmem>>, vector<18x1x4xf32>
    tpu.vector_store %arg5[%c0_8, %c17_9, %c0_10], %3 {strides = array<i32>} : memref<18x18x4xf32, #tpu.memory_space<vmem>>, vector<18x1x4xf32>,
    %c0_11 = arith.constant 0 : index
    %c0_12 = arith.constant 0 : index
    %c0_13 = arith.constant 0 : index
    %c0_14 = arith.constant 0 : index
    %6 = vector.load %arg1[%c0_11, %c0_12, %c0_13, %c0_14] : memref<1x16x16x4xf32, #tpu.memory_space<vmem>>, vector<1x16x16x4xf32>
    %7 = vector.shape_cast %6 : vector<1x16x16x4xf32> to vector<16x16x4xf32>
    %c1 = arith.constant 1 : index
    %c1_15 = arith.constant 1 : index
    %c0_16 = arith.constant 0 : index
    %8 = vector.load %arg5[%c1, %c1_15, %c0_16] : memref<18x18x4xf32, #tpu.memory_space<vmem>>, vector<16x16x4xf32>
    tpu.vector_store %arg5[%c1, %c1_15, %c0_16], %7 {strides = array<i32>} : memref<18x18x4xf32, #tpu.memory_space<vmem>>, vector<16x16x4xf32>,
    %c0_17 = arith.constant 0 : index
    %c0_18 = arith.constant 0 : index
    %9 = vector.load %arg2[%c0_17, %c0_18] : memref<36x8xbf16, #tpu.memory_space<vmem>>, vector<36x8xbf16>
    %c0_19 = arith.constant 0 : index
    %c0_20 = arith.constant 0 : index
    %10 = vector.load %arg3[%c0_19, %c0_20] : memref<1x8xf32, #tpu.memory_space<vmem>>, vector<1x8xf32>
    %c0_21 = arith.constant 0 : index
    %c0_22 = arith.constant 0 : index
    %c0_23 = arith.constant 0 : index
    %11 = vector.load %arg5[%c0_21, %c0_22, %c0_23] : memref<18x18x4xf32, #tpu.memory_space<vmem>>, vector<16x18x4xf32>
    %12 = arith.truncf %11 : vector<16x18x4xf32> to vector<16x18x4xbf16>
    %13 = vector.extract_strided_slice %12 {offsets = [0, 0, 0], sizes = [16, 16, 4], strides = [1, 1, 1]} : vector<16x18x4xbf16> to vector<16x16x4xbf16>
    %14 = vector.shape_cast %13 : vector<16x16x4xbf16> to vector<256x4xbf16>
    %15 = vector.extract_strided_slice %12 {offsets = [0, 1, 0], sizes = [16, 16, 4], strides = [1, 1, 1]} : vector<16x18x4xbf16> to vector<16x16x4xbf16>
    %16 = vector.shape_cast %15 : vector<16x16x4xbf16> to vector<256x4xbf16>
    %17 = vector.extract_strided_slice %12 {offsets = [0, 2, 0], sizes = [16, 16, 4], strides = [1, 1, 1]} : vector<16x18x4xbf16> to vector<16x16x4xbf16>
    %18 = vector.shape_cast %17 : vector<16x16x4xbf16> to vector<256x4xbf16>
    %c1_24 = arith.constant 1 : index
    %c0_25 = arith.constant 0 : index
    %c0_26 = arith.constant 0 : index
    %19 = vector.load %arg5[%c1_24, %c0_25, %c0_26] : memref<18x18x4xf32, #tpu.memory_space<vmem>>, vector<16x18x4xf32>
    %20 = arith.truncf %19 : vector<16x18x4xf32> to vector<16x18x4xbf16>
    %21 = vector.extract_strided_slice %20 {offsets = [0, 0, 0], sizes = [16, 16, 4], strides = [1, 1, 1]} : vector<16x18x4xbf16> to vector<16x16x4xbf16>
    %22 = vector.shape_cast %21 : vector<16x16x4xbf16> to vector<256x4xbf16>
    %23 = vector.extract_strided_slice %20 {offsets = [0, 1, 0], sizes = [16, 16, 4], strides = [1, 1, 1]} : vector<16x18x4xbf16> to vector<16x16x4xbf16>
    %24 = vector.shape_cast %23 : vector<16x16x4xbf16> to vector<256x4xbf16>
    %25 = vector.extract_strided_slice %20 {offsets = [0, 2, 0], sizes = [16, 16, 4], strides = [1, 1, 1]} : vector<16x18x4xbf16> to vector<16x16x4xbf16>
    %26 = vector.shape_cast %25 : vector<16x16x4xbf16> to vector<256x4xbf16>
    %c2 = arith.constant 2 : index
    %c0_27 = arith.constant 0 : index
    %c0_28 = arith.constant 0 : index
    %27 = vector.load %arg5[%c2, %c0_27, %c0_28] : memref<18x18x4xf32, #tpu.memory_space<vmem>>, vector<16x18x4xf32>
    %28 = arith.truncf %27 : vector<16x18x4xf32> to vector<16x18x4xbf16>
    %29 = vector.extract_strided_slice %28 {offsets = [0, 0, 0], sizes = [16, 16, 4], strides = [1, 1, 1]} : vector<16x18x4xbf16> to vector<16x16x4xbf16>
    %30 = vector.shape_cast %29 : vector<16x16x4xbf16> to vector<256x4xbf16>
    %31 = vector.extract_strided_slice %28 {offsets = [0, 1, 0], sizes = [16, 16, 4], strides = [1, 1, 1]} : vector<16x18x4xbf16> to vector<16x16x4xbf16>
    %32 = vector.shape_cast %31 : vector<16x16x4xbf16> to vector<256x4xbf16>
    %33 = vector.extract_strided_slice %28 {offsets = [0, 2, 0], sizes = [16, 16, 4], strides = [1, 1, 1]} : vector<16x18x4xbf16> to vector<16x16x4xbf16>
    %34 = vector.shape_cast %33 : vector<16x16x4xbf16> to vector<256x4xbf16>
    %35 = tpu.concatenate %14, %16, %18, %22, %24, %26, %30, %32, %34 in 1 : vector<256x4xbf16>, vector<256x4xbf16>, vector<256x4xbf16>, vector<256x4xbf16>, vector<256x4xbf16>, vector<256x4xbf16>, vector<256x4xbf16>, vector<256x4xbf16>, vector<256x4xbf16> -> vector<256x36xbf16>
    %cst_29 = arith.constant dense<0.000000e+00> : vector<256x8xf32>
    %36 = tpu.matmul %35, %9, %cst_29 {dimension_numbers = #tpu.dot_dimension_numbers<[1], [0], [0], [1], [0, 0, 1, 1], [], []>} : vector<256x36xbf16>, vector<36x8xbf16>, vector<256x8xf32> -> vector<256x8xf32>
    %37 = vector.broadcast %10 : vector<1x8xf32> to vector<256x8xf32>
    %38 = arith.addf %36, %37 : vector<256x8xf32>
    %39 = vector.shape_cast %38 : vector<256x8xf32> to vector<1x16x16x8xf32>
    %c0_30 = arith.constant 0 : index
    %c0_31 = arith.constant 0 : index
    %c0_32 = arith.constant 0 : index
    %c0_33 = arith.constant 0 : index
    %40 = vector.load %arg4[%c0_30, %c0_31, %c0_32, %c0_33] : memref<1x16x16x8xf32, #tpu.memory_space<vmem>>, vector<1x16x16x8xf32>
    tpu.vector_store %arg4[%c0_30, %c0_31, %c0_32, %c0_33], %39 {strides = array<i32>} : memref<1x16x16x8xf32, #tpu.memory_space<vmem>>, vector<1x16x16x8xf32>,
    return
  }
  func.func @transform_0(%arg0: i32) -> (i32, i32, i32, i32) {
    %c0_i32 = arith.constant 0 : i32
    %c0_i32_0 = arith.constant 0 : i32
    %c0_i32_1 = arith.constant 0 : i32
    %c0_i32_2 = arith.constant 0 : i32
    return %arg0, %c0_i32, %c0_i32_0, %c0_i32_1 : i32, i32, i32, i32
  }
  func.func @transform_1(%arg0: i32) -> (i32, i32) {
    %c0_i32 = arith.constant 0 : i32
    %c0_i32_0 = arith.constant 0 : i32
    %c0_i32_1 = arith.constant 0 : i32
    return %c0_i32, %c0_i32_0 : i32, i32
  }
  func.func @transform_2(%arg0: i32) -> (i32, i32) {
    %c0_i32 = arith.constant 0 : i32
    %c0_i32_0 = arith.constant 0 : i32
    %c0_i32_1 = arith.constant 0 : i32
    return %c0_i32, %c0_i32_0 : i32, i32
  }
  func.func @transform_3(%arg0: i32) -> (i32, i32, i32, i32) {
    %c0_i32 = arith.constant 0 : i32
    %c0_i32_0 = arith.constant 0 : i32
    %c0_i32_1 = arith.constant 0 : i32
    %c0_i32_2 = arith.constant 0 : i32
    return %arg0, %c0_i32, %c0_i32_0, %c0_i32_1 : i32, i32, i32, i32
  }
}

</mosaic_0001>

<bundles_post_ra>
// kernel: tpu_custom_call.1
= control target key start
LH: loop header
LB: loop body
LE: loop exit
PB: predicated region body
PF: predicated region fallthrough
CT: control target
= control target key end

     0   :  { %s3565_s12 = smov 0   ;;  %s5568_s0 = inlined_call_operand.vmem [shape: f32[2,16,16,4], index: 0, kind: input, shape index: {}]   ;;  %s5569_s1 = inlined_call_operand.vmem [shape: bf16[36,8], index: 1, kind: input, shape index: {}]   ;;  %s5570_s2 = inlined_call_operand.vmem [shape: f32[1,8], index: 2, kind: input, shape index: {}]   ;;  %s5571_s3 = inlined_call_operand.vmem [shape: f32[2,16,16,8], index: 3, kind: output, shape index: {}]  }
   0x1 LB: > { %s3414_s13 = sadd.s32 4294967295, %s3534_s12   ;;  %p3418_p0 = scmp.ge.s32.totalorder %s3534_s12, 1  ;;  %s3534_s12 = sphi %s3565_s12, %s13_s12  }
   0x2   : > { %p137_p1 = scmp.lt.s32.totalorder %s3534_s12, 3 }
   0x4   : > { %p138_p2 = pnand %p3418_p0, %p137_p1 }
   0x6   : > { %141 = sbr.rel (%p138_p2) target bundleno = 715 (0x2cb), region = 32 }
   0xb   : > { %vm172_vm0 = vcmask 31744   ;;  %vm175_vm1 = vcmask 25600   ;;  %v3536_v0 = vmov 0.0   ;;  %vm181_vm2 = vcmask 24576   ;;  %p161_p3 = scmp.lt.s32.totalorder %s3414_s13, 1  ;;  %s3537_s14 = smov 4  }
   0xc   : > { %173 = vst.msk [vmem:[#allocation2] sm:$0xff] %vm172_vm0, %v3536_v0  ;;  %vm385_vm3 = vsmask.f32 3328  ;;  %vm386_vm4 = vsmask.f32 7440  ;;  %vm820_vm6 = vcmask 1042432  }
   0xd   : > { %174 = vst.msk [vmem:[#allocation2 + $0x8] sm:$0xff] %vm172_vm0, %v3536_v0  ;;  %vm3614_vm5 = vmor %vm385_vm3, %vm386_vm4  ;;  %s5773_s13 = smov (!%p161_p3, %s3414_s13), 1  ;;  %vm821_vm7 = vcmask 1046532   ;;  %s3538_s19 = smov 8   ;;  %vm2952_vm9 = vcmask 64512   ;;  %vm2985_vm10 = vcmask 97280  }
   0xe   : > { %176 = vst.msk [vmem:[#allocation2 + $0x10] sm:$0x3] %vm175_vm1, %v3536_v0  ;;  %s3497_s15 = sshll.u32 %s5773_s13, 8  ;;  %vm4043_vm8 = vmor %vm820_vm6, %vm821_vm7  ;;  %s3539_s20 = smov 12   ;;  %vm3018_vm11 = vcmask 130048   ;;  %vm3051_vm12 = vcmask 162816  }
   0xf   : > { %180 = vst.msk [vmem:[#allocation2 + $0x1a8] sm:$0x3] %vm175_vm1, %v3536_v0  ;;  %s3675_s18 = scalar_lea.vmem %s5568_s0, %s3497_s15  ;;  %s3540_s21 = smov 16   ;;  %vm3234_vm13 = vcmask 1041408   ;;  %vm3084_vm14 = vcmask 195584   ;;  %vm3117_vm15 = vcmask 228352  }
  0x10   : > { %182 = vst.msk [vmem:[#allocation2] sm:$0x1] %vm181_vm2, %v3536_v0  ;;  %v224_v27 = vld [vmem:[%s3675_s18 + $0x30] sm:$0xff]  ;;  %v225_v28 = vld [vmem:[%s3675_s18 + $0x38] sm:$0xff]  ;;  %v218_v31 = vld [vmem:[%s3675_s18] sm:$0xff]  ;;  %s3541_s22 = smov 20   ;;  %s5431_s9 = scalar_lea.vmem %s5571_s3, %s3497_s15 }
  0x11   : > { %200 = vst.msk [vmem:[#allocation2 + $0x11] sm:$0x1] %vm181_vm2, %v3536_v0  ;;  %v220_v29 = vld [vmem:[%s3675_s18 + $0x10] sm:$0xff]  ;;  %v221_v30 = vld [vmem:[%s3675_s18 + $0x18] sm:$0xff]  ;;  %v219_v32 = vld [vmem:[%s3675_s18 + $0x8] sm:$0xff]  ;;  %s3542_s23 = smov 24  }
  0x12   : > { %178 = vst.msk [vmem:[#allocation2 + $0x198] sm:$0xff] %vm172_vm0, %v3536_v0  ;;  %v226_v33 = vld [vmem:[%s3675_s18 + $0x40] sm:$0xff]  ;;  %v227_v34 = vld [vmem:[%s3675_s18 + $0x48] sm:$0xff]  ;;  %v228_v43 = vld [vmem:[%s3675_s18 + $0x50] sm:$0xff]  ;;  %s3543_s24 = smov 28   ;;  %s3544_s25 = smov 32  }
  0x13   : > { %179 = vst.msk [vmem:[#allocation2 + $0x1a0] sm:$0xff] %vm172_vm0, %v3536_v0  ;;  %v222_v35 = vld [vmem:[%s3675_s18 + $0x20] sm:$0xff]  ;;  %v223_v37 = vld [vmem:[%s3675_s18 + $0x28] sm:$0xff]  ;;  %v229_v47 = vld [vmem:[%s3675_s18 + $0x58] sm:$0xff]  ;;  %vm3201_vm1 = vcmask 293888  }
  0x14   : > { %v290_v1 = vld [vmem:[#allocation2 + $0x8] sm:$0xff]  ;;  %183 = vst.msk [vmem:[#allocation2 + $0x18] sm:$0x1] %vm181_vm2, %v3536_v0  ;;  %v232_v59 = vld [vmem:[%s3675_s18 + $0x70] sm:$0xff]  ;;  %v233_v60 = vld [vmem:[%s3675_s18 + $0x78] sm:$0xff] }
  0x15   : > { %v3589_v2 = vpack.c.bf16 %v290_v1, %v290_v1  ;;  %184 = vst.msk [vmem:[#allocation2 + $0x30] sm:$0x1] %vm181_vm2, %v3536_v0  ;;  %v230_v1 = vld [vmem:[%s3675_s18 + $0x60] sm:$0xff] }
  0x16   : > { %185 = vst.msk [vmem:[#allocation2 + $0x48] sm:$0x1] %vm181_vm2, %v3536_v0 }
  0x17   : > { %v289_v3 = vld [vmem:[#allocation2] sm:$0xff]  ;;  %v398_v4 = vshll.u32 %v3589_v2, 16  ;;  %v402_v5 = vshrl.u32 %v3589_v2, 16  ;;  %186 = vst.msk [vmem:[#allocation2 + $0x60] sm:$0x1] %vm181_vm2, %v3536_v0 }
  0x18   : > { %v291_v6 = vld [vmem:[#allocation2 + $0x10] sm:$0x3]  ;;  %v3599_v7 = vpack.c.bf16 %v289_v3, %v289_v3  ;;  %187 = vst.msk [vmem:[#allocation2 + $0x78] sm:$0x1] %vm181_vm2, %v3536_v0 }
  0x19   : > { %v3603_v8 = vpack.c.bf16 %v291_v6, %v291_v6  ;;  %v400_v9 = vrot.slane %v398_v4, 5  ;;  %v404_v10 = vrot.slane %v402_v5, 4  ;;  %188 = vst.msk [vmem:[#allocation2 + $0x90] sm:$0x1] %vm181_vm2, %v3536_v0 }
  0x1a   : > { %v389_v11 = vshrl.u32 %v3599_v7, 16  ;;  %v392_v12 = vshll.u32 %v3599_v7, 16  ;;  %189 = vst.msk [vmem:[#allocation2 + $0xa8] sm:$0x1] %vm181_vm2, %v3536_v0 }
  0x1b   : > { %v405_v13 = vor.u32 %v404_v10, %v400_v9  ;;  %v408_v14 = vshll.u32 %v3603_v8, 16  ;;  %190 = vst.msk [vmem:[#allocation2 + $0xc0] sm:$0x1] %vm181_vm2, %v3536_v0 }
  0x1c   : > { %v391_v16 = vrot.slane %v389_v11, 4  ;;  %v394_v17 = vrot.slane %v392_v12, 5  ;;  %191 = vst.msk [vmem:[#allocation2 + $0xd8] sm:$0x1] %vm181_vm2, %v3536_v0 }
  0x1d   : > { %v406_v18 = vrot.slane %v405_v13, 4  ;;  %v410_v19 = vrot.slane %v408_v14, 5  ;;  %192 = vst.msk [vmem:[#allocation2 + $0xf0] sm:$0x1] %vm181_vm2, %v3536_v0 }
  0x1e   : > { %v395_v20 = vor.u32 %v394_v17, %v391_v16  ;;  %193 = vst.msk [vmem:[#allocation2 + $0x108] sm:$0x1] %vm181_vm2, %v3536_v0  ;;  %v231_v16 = vld [vmem:[%s3675_s18 + $0x68] sm:$0xff] }
  0x1f   : > { %v411_v21 = vsel %vm3614_vm5, %v406_v18, %v410_v19  ;;  %194 = vst.msk [vmem:[#allocation2 + $0x120] sm:$0x1] %vm181_vm2, %v3536_v0 }
  0x20   : > { %v396_v22 = vrot.slane %v395_v20, 4  ;;  %195 = vst.msk [vmem:[#allocation2 + $0x138] sm:$0x1] %vm181_vm2, %v3536_v0  ;;  %v2265_v23 = vunpack.c.l.b16 %v411_v21  ;;  %v234_v21 = vld [vmem:[%s3675_s18 + $0x80] sm:$0xff] }
  0x21   : > { %196 = vst.msk [vmem:[#allocation2 + $0x150] sm:$0x1] %vm181_vm2, %v3536_v0 }
  0x22   : > { %v401_v24 = vsel %vm3614_vm5, %v396_v22, %v400_v9  ;;  %197 = vst.msk [vmem:[#allocation2 + $0x168] sm:$0x1] %vm181_vm2, %v3536_v0 }
  0x23   : > { %v2264_v25 = vunpack.c.l.b16 %v401_v24  ;;  %198 = vst.msk [vmem:[#allocation2 + $0x180] sm:$0x1] %vm181_vm2, %v3536_v0 }
  0x24   : > { %201 = vst.msk [vmem:[#allocation2 + $0x29] sm:$0x1] %vm181_vm2, %v3536_v0 }
  0x25   : > { %v2296_v26 = vpack.c.b16 %v2265_v23, %v2264_v25  ;;  %202 = vst.msk [vmem:[#allocation2 + $0x41] sm:$0x1] %vm181_vm2, %v3536_v0 }
  0x26   : > { %203 = vst.msk [vmem:[#allocation2 + $0x59] sm:$0x1] %vm181_vm2, %v3536_v0 }
  0x27   : > { %2312 = vrot.lane.b32.xlu0 %v2296_v26, %s3537_s14  ;;  %204 = vst.msk [vmem:[#allocation2 + $0x71] sm:$0x1] %vm181_vm2, %v3536_v0 }
  0x28   : > { %205 = vst.msk [vmem:[#allocation2 + $0x89] sm:$0x1] %vm181_vm2, %v3536_v0 }
  0x29   : > { %206 = vst.msk [vmem:[#allocation2 + $0xa1] sm:$0x1] %vm181_vm2, %v3536_v0 }
  0x2a   : > { %207 = vst.msk [vmem:[#allocation2 + $0xb9] sm:$0x1] %vm181_vm2, %v3536_v0 }
  0x2b   : > { %208 = vst.msk [vmem:[#allocation2 + $0xd1] sm:$0x1] %vm181_vm2, %v3536_v0 }
  0x2c   : > { %209 = vst.msk [vmem:[#allocation2 + $0xe9] sm:$0x1] %vm181_vm2, %v3536_v0 }
  0x2d   : > { %210 = vst.msk [vmem:[#allocation2 + $0x101] sm:$0x1] %vm181_vm2, %v3536_v0 }
  0x2e   : > { %211 = vst.msk [vmem:[#allocation2 + $0x119] sm:$0x1] %vm181_vm2, %v3536_v0 }
  0x2f   : > { %212 = vst.msk [vmem:[#allocation2 + $0x131] sm:$0x1] %vm181_vm2, %v3536_v0 }
  0x30   : > { %213 = vst.msk [vmem:[#allocation2 + $0x149] sm:$0x1] %vm181_vm2, %v3536_v0 }
  0x31   : > { %214 = vst.msk [vmem:[#allocation2 + $0x161] sm:$0x1] %vm181_vm2, %v3536_v0 }
  0x32   : > { %215 = vst.msk [vmem:[#allocation2 + $0x179] sm:$0x1] %vm181_vm2, %v3536_v0 }
  0x33   : > { %216 = vst.msk [vmem:[#allocation2 + $0x191] sm:$0x1] %vm181_vm2, %v3536_v0 }
  0x34   : > { %217 = vst.msk [vmem:[#allocation2 + $0x1a9] sm:$0x1] %vm181_vm2, %v3536_v0 }
  0x35   : > { %257 = vst.msk [vmem:[#allocation2 + $0x61] sm:$0xff] %vm172_vm0, %v224_v27 }
  0x36   : > { %258 = vst.msk [vmem:[#allocation2 + $0x69] sm:$0xff] %vm172_vm0, %v225_v28 }
  0x37   : > { %199 = vst.msk [vmem:[#allocation2 + $0x198] sm:$0x1] %vm181_vm2, %v3536_v0 }
  0x38   : > { %253 = vst.msk [vmem:[#allocation2 + $0x31] sm:$0xff] %vm172_vm0, %v220_v29 }
  0x39   : > { %254 = vst.msk [vmem:[#allocation2 + $0x39] sm:$0xff] %vm172_vm0, %v221_v30  ;;  %v235_v30 = vld [vmem:[%s3675_s18 + $0x88] sm:$0xff] }
  0x3a   : > { %251 = vst.msk [vmem:[#allocation2 + $0x19] sm:$0xff] %vm172_vm0, %v218_v31 }
  0x3b   : > { %252 = vst.msk [vmem:[#allocation2 + $0x21] sm:$0xff] %vm172_vm0, %v219_v32 }
  0x3c   : > { %v301_v36 = vld [vmem:[#allocation2 + $0x60] sm:$0xff]  ;;  %259 = vst.msk [vmem:[#allocation2 + $0x79] sm:$0xff] %vm172_vm0, %v226_v33 }
  0x3d   : > { %v302_v38 = vld [vmem:[#allocation2 + $0x68] sm:$0xff]  ;;  %v303_v39 = vld [vmem:[#allocation2 + $0x70] sm:$0x3]  ;;  %v3706_v40 = vpack.c.bf16 %v301_v36, %v301_v36  ;;  %260 = vst.msk [vmem:[#allocation2 + $0x81] sm:$0xff] %vm172_vm0, %v227_v34 }
  0x3e   : > { %v3709_v41 = vpack.c.bf16 %v302_v38, %v302_v38  ;;  %v3711_v42 = vpack.c.bf16 %v303_v39, %v303_v39  ;;  %255 = vst.msk [vmem:[#allocation2 + $0x49] sm:$0xff] %vm172_vm0, %v222_v35 }
  0x3f   : > { %v485_v44 = vshrl.u32 %v3706_v40, 16  ;;  %v488_v45 = vshll.u32 %v3706_v40, 16  ;;  %v295_v46 = vld [vmem:[#allocation2 + $0x30] sm:$0xff]  ;;  %256 = vst.msk [vmem:[#allocation2 + $0x51] sm:$0xff] %vm172_vm0, %v223_v37  ;;  %v238_v37 = vld [vmem:[%s3675_s18 + $0xa0] sm:$0xff] }
  0x40   : > { %v494_v48 = vshll.u32 %v3709_v41, 16  ;;  %v498_v49 = vshrl.u32 %v3709_v41, 16  ;;  %v504_v50 = vshll.u32 %v3711_v42, 16  ;;  %v296_v51 = vld [vmem:[#allocation2 + $0x38] sm:$0xff]  ;;  %v297_v52 = vld [vmem:[#allocation2 + $0x40] sm:$0x3]  ;;  %v3722_v53 = vpack.c.bf16 %v295_v46, %v295_v46 }
  0x41   : > { %v487_v54 = vrot.slane %v485_v44, 4  ;;  %v490_v55 = vrot.slane %v488_v45, 5  ;;  %v3724_v56 = vpack.c.bf16 %v296_v51, %v296_v51  ;;  %v3726_v57 = vpack.c.bf16 %v297_v52, %v297_v52  ;;  %v292_v58 = vld [vmem:[#allocation2 + $0x18] sm:$0xff]  ;;  %261 = vst.msk [vmem:[#allocation2 + $0x91] sm:$0xff] %vm172_vm0, %v228_v43  ;;  %v239_v46 = vld [vmem:[%s3675_s18 + $0xa8] sm:$0xff]  ;;  %v236_v51 = vld [vmem:[%s3675_s18 + $0x90] sm:$0xff] }
  0x42   : > { %v496_v61 = vrot.slane %v494_v48, 5  ;;  %v500_v62 = vrot.slane %v498_v49, 4  ;;  %v506_v63 = vrot.slane %v504_v50, 5  ;;  %v437_v0 = vshrl.u32 %v3722_v53, 16  ;;  %262 = vst.msk [vmem:[#allocation2 + $0x99] sm:$0xff] %vm172_vm0, %v229_v47  ;;  %v293_v9 = vld [vmem:[#allocation2 + $0x20] sm:$0xff] }
  0x43   : > { %v491_v3 = vor.u32 %v490_v55, %v487_v54  ;;  %v440_v4 = vshll.u32 %v3722_v53, 16  ;;  %v446_v5 = vshll.u32 %v3724_v56, 16  ;;  %v450_v6 = vshrl.u32 %v3724_v56, 16  ;;  %v294_v10 = vld [vmem:[#allocation2 + $0x28] sm:$0x3]  ;;  %265 = vst.msk [vmem:[#allocation2 + $0xc1] sm:$0xff] %vm172_vm0, %v232_v59 }
  0x44   : > { %v501_v11 = vor.u32 %v500_v62, %v496_v61  ;;  %v439_v12 = vrot.slane %v437_v0, 4  ;;  %v456_v13 = vshll.u32 %v3726_v57, 16  ;;  %v3738_v14 = vpack.c.bf16 %v292_v58, %v292_v58  ;;  %266 = vst.msk [vmem:[#allocation2 + $0xc9] sm:$0xff] %vm172_vm0, %v233_v60  ;;  %v304_v35 = vld [vmem:[#allocation2 + $0x78] sm:$0xff]  ;;  %v305_v36 = vld [vmem:[#allocation2 + $0x80] sm:$0xff] }
  0x45   : > { %v492_v17 = vrot.slane %v491_v3, 4  ;;  %v442_v18 = vrot.slane %v440_v4, 5  ;;  %v448_v19 = vrot.slane %v446_v5, 5  ;;  %v452_v20 = vrot.slane %v450_v6, 4  ;;  %263 = vst.msk [vmem:[#allocation2 + $0xa9] sm:$0xff] %vm172_vm0, %v230_v1  ;;  %v237_v59 = vld [vmem:[%s3675_s18 + $0x98] sm:$0xff] }
  0x46   : > { %v502_v22 = vrot.slane %v501_v11, 4  ;;  %v458_v23 = vrot.slane %v456_v13, 5  ;;  %v3744_v24 = vpack.c.bf16 %v293_v9, %v293_v9  ;;  %v3746_v25 = vpack.c.bf16 %v294_v10, %v294_v10  ;;  %264 = vst.msk [vmem:[#allocation2 + $0xb1] sm:$0xff] %vm172_vm0, %v231_v16  ;;  %v306_v45 = vld [vmem:[#allocation2 + $0x88] sm:$0x3]  ;;  %v240_v6 = vld [vmem:[%s3675_s18 + $0xb0] sm:$0xff] }
  0x47   : > { %v497_v26 = vsel %vm3614_vm5, %v492_v17, %v496_v61  ;;  %v443_v27 = vor.u32 %v442_v18, %v439_v12  ;;  %v453_v28 = vor.u32 %v452_v20, %v448_v19  ;;  %v413_v29 = vshrl.u32 %v3738_v14, 16  ;;  %267 = vst.msk [vmem:[#allocation2 + $0xd9] sm:$0xff] %vm172_vm0, %v234_v21  ;;  %v298_v5 = vld [vmem:[#allocation2 + $0x48] sm:$0xff]  ;;  %v241_v9 = vld [vmem:[%s3675_s18 + $0xb8] sm:$0xff]  ;;  %v299_v21 = vld [vmem:[#allocation2 + $0x50] sm:$0xff] }
  0x48   : > { %v507_v31 = vsel %vm3614_vm5, %v502_v22, %v506_v63  ;;  %v2272_v32 = vunpack.c.l.b16 %v497_v26  ;;  %v416_v33 = vshll.u32 %v3738_v14, 16  ;;  %v422_v34 = vshll.u32 %v3744_v24, 16  ;;  %268 = vst.msk [vmem:[#allocation2 + $0xe1] sm:$0xff] %vm172_vm0, %v235_v30  ;;  %v300_v16 = vld [vmem:[#allocation2 + $0x58] sm:$0x3] }
  0x49   : > { %v2273_v38 = vunpack.c.l.b16 %v507_v31  ;;  %v444_v39 = vrot.slane %v443_v27, 4  ;;  %v454_v43 = vrot.slane %v453_v28, 4  ;;  %v415_v44 = vrot.slane %v413_v29, 4  ;;  %271 = vst.msk [vmem:[#allocation2 + $0x109] sm:$0xff] %vm172_vm0, %v238_v37 }
  0x4a   : > { %v418_v47 = vrot.slane %v416_v33, 5  ;;  %v424_v48 = vrot.slane %v422_v34, 5  ;;  %v426_v49 = vshrl.u32 %v3744_v24, 16  ;;  %v432_v50 = vshll.u32 %v3746_v25, 16  ;;  %272 = vst.msk [vmem:[#allocation2 + $0x111] sm:$0xff] %vm172_vm0, %v239_v46 }
  0x4b   : > { %v2300_v52 = vpack.c.b16 %v2273_v38, %v2272_v32  ;;  %v449_v54 = vsel %vm3614_vm5, %v444_v39, %v448_v19  ;;  %v459_v55 = vsel %vm3614_vm5, %v454_v43, %v458_v23  ;;  %v3769_v58 = vpack.c.bf16 %v304_v35, %v304_v35  ;;  %269 = vst.msk [vmem:[#allocation2 + $0xf1] sm:$0xff] %vm172_vm0, %v236_v51 }
  0x4c   : > { %v2268_v60 = vunpack.c.l.b16 %v449_v54  ;;  %v2269_v61 = vunpack.c.l.b16 %v459_v55  ;;  %v419_v62 = vor.u32 %v418_v47, %v415_v44  ;;  %v428_v63 = vrot.slane %v426_v49, 4  ;;  %270 = vst.msk [vmem:[#allocation2 + $0xf9] sm:$0xff] %vm172_vm0, %v237_v59  ;;  %v307_v47 = vld [vmem:[#allocation2 + $0x90] sm:$0xff]  ;;  %v309_v54 = vld [vmem:[#allocation2 + $0xa0] sm:$0x3] }
  0x4d   : > { %2320 = vrot.lane.b32.xlu2 %v2300_v52, %s3537_s14  ;;  %v434_v0 = vrot.slane %v432_v50, 5  ;;  %v3775_v1 = vpack.c.bf16 %v305_v36, %v305_v36  ;;  %v3777_v3 = vpack.c.bf16 %v306_v45, %v306_v45  ;;  %v509_v4 = vshrl.u32 %v3769_v58, 16  ;;  %273 = vst.msk [vmem:[#allocation2 + $0x121] sm:$0xff] %vm172_vm0, %v240_v6  ;;  %v308_v52 = vld [vmem:[#allocation2 + $0x98] sm:$0xff] }
  0x4e   : > { %v2298_v10 = vpack.c.b16 %v2269_v61, %v2268_v60  ;;  %v420_v11 = vrot.slane %v419_v62, 4  ;;  %v429_v12 = vor.u32 %v428_v63, %v424_v48  ;;  %v512_v13 = vshll.u32 %v3769_v58, 16  ;;  %274 = vst.msk [vmem:[#allocation2 + $0x129] sm:$0xff] %vm172_vm0, %v241_v9  ;;  %v313_v62 = vld [vmem:[#allocation2 + $0xc0] sm:$0xff]  ;;  %v244_v63 = vld [vmem:[%s3675_s18 + $0xd0] sm:$0xff] }
  0x4f   : > { %v511_v17 = vrot.slane %v509_v4, 4  ;;  %v518_v18 = vshll.u32 %v3775_v1, 16  ;;  %v522_v19 = vshrl.u32 %v3775_v1, 16  ;;  %v528_v20 = vshll.u32 %v3777_v3, 16  ;;  %277 = vst.msk [vmem:[#allocation2 + $0x151] sm:$0xff] %vm172_vm0, %v244_v63 }
  0x50   : > { %2316 = vrot.lane.b32.xlu1 %v2298_v10, %s3537_s14  ;;  %v425_v22 = vsel %vm3614_vm5, %v420_v11, %v424_v48  ;;  %v430_v23 = vrot.slane %v429_v12, 4  ;;  %v514_v26 = vrot.slane %v512_v13, 5  ;;  %v3792_v27 = vpack.c.bf16 %v298_v5, %v298_v5  ;;  %v242_v10 = vld [vmem:[%s3675_s18 + $0xc0] sm:$0xff]  ;;  %v243_v11 = vld [vmem:[%s3675_s18 + $0xc8] sm:$0xff]  ;;  %v312_v63 = vld [vmem:[#allocation2 + $0xb8] sm:$0x3] }
  0x51   : > { %v2266_v28 = vunpack.c.l.b16 %v425_v22  ;;  %v520_v29 = vrot.slane %v518_v18, 5  ;;  %v524_v30 = vrot.slane %v522_v19, 4  ;;  %v530_v31 = vrot.slane %v528_v20, 5  ;;  %275 = vst.msk [vmem:[#allocation2 + $0x139] sm:$0xff] %vm172_vm0, %v242_v10  ;;  %v311_v10 = vld [vmem:[#allocation2 + $0xb0] sm:$0xff] }
  0x52   : > { %v435_v32 = vsel %vm3614_vm5, %v430_v23, %v434_v0  ;;  %v515_v33 = vor.u32 %v514_v26, %v511_v17  ;;  %v3797_v34 = vpack.c.bf16 %v299_v21, %v299_v21  ;;  %v3799_v35 = vpack.c.bf16 %v300_v16, %v300_v16  ;;  %v245_v0 = vld [vmem:[%s3675_s18 + $0xd8] sm:$0xff]  ;;  %276 = vst.msk [vmem:[#allocation2 + $0x141] sm:$0xff] %vm172_vm0, %v243_v11 }
  0x53   : > { %v2267_v36 = vunpack.c.l.b16 %v435_v32  ;;  %v525_v37 = vor.u32 %v524_v30, %v520_v29  ;;  %v461_v38 = vshrl.u32 %v3792_v27, 16  ;;  %v464_v39 = vshll.u32 %v3792_v27, 16  ;;  %278 = vst.msk [vmem:[#allocation2 + $0x159] sm:$0xff] %vm172_vm0, %v245_v0 }
  0x54   : > { %v516_v43 = vrot.slane %v515_v33, 4  ;;  %v470_v44 = vshll.u32 %v3797_v34, 16  ;;  %v474_v45 = vshrl.u32 %v3797_v34, 16  ;;  %v480_v46 = vshll.u32 %v3799_v35, 16 }
  0x55   : > { %v2297_v48 = vpack.c.b16 %v2267_v36, %v2266_v28  ;;  %v526_v49 = vrot.slane %v525_v37, 4  ;;  %v463_v50 = vrot.slane %v461_v38, 4  ;;  %v466_v51 = vrot.slane %v464_v39, 5  ;;  %v315_v36 = vld [vmem:[#allocation2 + $0xd0] sm:$0x3] }
  0x56   : > { %v521_v55 = vsel %vm3614_vm5, %v516_v43, %v520_v29  ;;  %v472_v59 = vrot.slane %v470_v44, 5  ;;  %v476_v60 = vrot.slane %v474_v45, 4  ;;  %v482_v61 = vrot.slane %v480_v46, 5  ;;  %v314_v29 = vld [vmem:[#allocation2 + $0xc8] sm:$0xff] }
  0x57   : > { %2314 = vrot.lane.b32.xlu0 %v2297_v48, %s3537_s14  ;;  %v531_v4 = vsel %vm3614_vm5, %v526_v49, %v530_v31  ;;  %v2274_v5 = vunpack.c.l.b16 %v521_v55  ;;  %v467_v6 = vor.u32 %v466_v51, %v463_v50  ;;  %v3813_v9 = vpack.c.bf16 %v307_v47, %v307_v47  ;;  %v247_v55 = vld [vmem:[%s3675_s18 + $0xe8] sm:$0xff] }
  0x58   : > { %v2275_v12 = vunpack.c.l.b16 %v531_v4  ;;  %v477_v13 = vor.u32 %v476_v60, %v472_v59  ;;  %v3818_v16 = vpack.c.bf16 %v308_v52, %v308_v52  ;;  %v3820_v17 = vpack.c.bf16 %v309_v54, %v309_v54  ;;  %v310_v52 = vld [vmem:[#allocation2 + $0xa8] sm:$0xff]  ;;  %v246_v54 = vld [vmem:[%s3675_s18 + $0xe0] sm:$0xff]  ;;  %280 = vst.msk [vmem:[#allocation2 + $0x171] sm:$0xff] %vm172_vm0, %v247_v55 }
  0x59   : > { %v468_v18 = vrot.slane %v467_v6, 4  ;;  %v533_v19 = vshrl.u32 %v3813_v9, 16  ;;  %v536_v20 = vshll.u32 %v3813_v9, 16  ;;  %v3825_v21 = vpack.c.bf16 %v313_v62, %v313_v62  ;;  %279 = vst.msk [vmem:[#allocation2 + $0x169] sm:$0xff] %vm172_vm0, %v246_v54  ;;  %v318_v55 = vld [vmem:[#allocation2 + $0xe8] sm:$0x3] }
  0x5a   : > { %v2301_v22 = vpack.c.b16 %v2275_v12, %v2274_v5  ;;  %v3828_v23 = vrot.slane %v477_v13, 4  ;;  %v542_v26 = vshll.u32 %v3818_v16, 16  ;;  %v546_v28 = vshrl.u32 %v3818_v16, 16 }
  0x5b   : > { %v473_v30 = vsel %vm3614_vm5, %v468_v18, %v472_v59  ;;  %v535_v31 = vrot.slane %v533_v19, 4  ;;  %v538_v32 = vrot.slane %v536_v20, 5  ;;  %v552_v33 = vshll.u32 %v3820_v17, 16  ;;  %v316_v19 = vld [vmem:[#allocation2 + $0xd8] sm:$0xff] }
  0x5c   : > { %5641 = vst [vmem:[#allocation3_spill] sm:$0xff] %v3828_v23  ;;  %2322 = vrot.lane.b32.xlu2 %v2301_v22, %s3537_s14  ;;  %v483_v37 = vsel %vm3614_vm5, %v3828_v23, %v482_v61  ;;  %v3840_v38 = vunpack.c.l.b16 %v473_v30  ;;  %v544_v39 = vrot.slane %v542_v26, 5  ;;  %v548_v43 = vrot.slane %v546_v28, 4 }
  0x5d   : > { %v2271_v44 = vunpack.c.l.b16 %v483_v37  ;;  %v539_v45 = vor.u32 %v538_v32, %v535_v31  ;;  %v554_v46 = vrot.slane %v552_v33, 5  ;;  %v3842_v47 = vpack.c.bf16 %v314_v29, %v314_v29 }
  0x5e   : > { %5642 = vst [vmem:[#allocation4_spill] sm:$0xff] %v3840_v38  ;;  %v549_v48 = vor.u32 %v548_v43, %v544_v39  ;;  %v3844_v49 = vpack.c.bf16 %v315_v36, %v315_v36  ;;  %v581_v50 = vshrl.u32 %v3825_v21, 16  ;;  %v584_v51 = vshll.u32 %v3825_v21, 16 }
  0x5f   : > { %v2299_v59 = vpack.c.b16 %v2271_v44, %v3840_v38  ;;  %v540_v60 = vrot.slane %v539_v45, 4  ;;  %v590_v61 = vshll.u32 %v3842_v47, 16  ;;  %v594_v62 = vshrl.u32 %v3842_v47, 16 }
  0x60   : > { %v3854_v0 = vrot.slane %v549_v48, 4  ;;  %v583_v4 = vrot.slane %v581_v50, 4  ;;  %v586_v5 = vrot.slane %v584_v51, 5  ;;  %v600_v6 = vshll.u32 %v3844_v49, 16  ;;  %v317_v48 = vld [vmem:[#allocation2 + $0xe0] sm:$0xff] }
  0x61   : > { %2318 = vrot.lane.b32.xlu1 %v2299_v59, %s3537_s14  ;;  %v545_v11 = vsel %vm3614_vm5, %v540_v60, %v544_v39  ;;  %v592_v12 = vrot.slane %v590_v61, 5  ;;  %v596_v13 = vrot.slane %v594_v62, 4  ;;  %v3861_v18 = vpack.c.bf16 %v310_v52, %v310_v52 }
  0x62   : > { %5643 = vst [vmem:[#allocation5_spill] sm:$0xff] %v3854_v0  ;;  %v555_v20 = vsel %vm3614_vm5, %v3854_v0, %v554_v46  ;;  %v3866_v22 = vunpack.c.l.b16 %v545_v11  ;;  %v587_v26 = vor.u32 %v586_v5, %v583_v4  ;;  %v602_v28 = vrot.slane %v600_v6, 5 }
  0x63   : > { %v2277_v29 = vunpack.c.l.b16 %v555_v20  ;;  %v597_v30 = vor.u32 %v596_v13, %v592_v12  ;;  %v3868_v31 = vpack.c.bf16 %v311_v10, %v311_v10  ;;  %v3870_v32 = vpack.c.bf16 %v312_v63, %v312_v63 }
  0x64   : > { %5644 = vst [vmem:[#allocation6_spill] sm:$0xff] %v3866_v22  ;;  %v588_v33 = vrot.slane %v587_v26, 4  ;;  %v557_v36 = vshrl.u32 %v3861_v18, 16  ;;  %v560_v37 = vshll.u32 %v3861_v18, 16  ;;  %v3874_v39 = vpack.c.bf16 %v316_v19, %v316_v19  ;;  %v322_v19 = vld [vmem:[#allocation2 + $0x108] sm:$0xff] }
  0x65   : > { %v2302_v43 = vpack.c.b16 %v2277_v29, %v3866_v22  ;;  %v3877_v44 = vrot.slane %v597_v30, 4  ;;  %v566_v45 = vshll.u32 %v3868_v31, 16  ;;  %v570_v46 = vshrl.u32 %v3868_v31, 16  ;;  %v323_v30 = vld [vmem:[#allocation2 + $0x110] sm:$0xff] }
  0x66   : > { %v593_v50 = vsel %vm3614_vm5, %v588_v33, %v592_v12  ;;  %v559_v51 = vrot.slane %v557_v36, 4  ;;  %v562_v52 = vrot.slane %v560_v37, 5  ;;  %v576_v54 = vshll.u32 %v3870_v32, 16 }
  0x67   : > { %5645 = vst [vmem:[#allocation7_spill] sm:$0xff] %v3877_v44  ;;  %2324 = vrot.lane.b32.xlu0 %v2302_v43, %s3537_s14  ;;  %v603_v59 = vsel %vm3614_vm5, %v3877_v44, %v602_v28  ;;  %v3888_v60 = vunpack.c.l.b16 %v593_v50  ;;  %v568_v61 = vrot.slane %v566_v45, 5  ;;  %v572_v62 = vrot.slane %v570_v46, 4  ;;  %v324_v45 = vld [vmem:[#allocation2 + $0x118] sm:$0x3] }
  0x68   : > { %v2281_v63 = vunpack.c.l.b16 %v603_v59  ;;  %v563_v4 = vor.u32 %v562_v52, %v559_v51  ;;  %v578_v5 = vrot.slane %v576_v54, 5  ;;  %v3890_v6 = vpack.c.bf16 %v317_v48, %v317_v48  ;;  %v319_v52 = vld [vmem:[#allocation2 + $0xf0] sm:$0xff] }
  0x69   : > { %5646 = vst [vmem:[#allocation8_spill] sm:$0xff] %v3888_v60  ;;  %v573_v10 = vor.u32 %v572_v62, %v568_v61  ;;  %v3892_v11 = vpack.c.bf16 %v318_v55, %v318_v55  ;;  %v605_v12 = vshrl.u32 %v3874_v39, 16  ;;  %v608_v13 = vshll.u32 %v3874_v39, 16 }
  0x6a   : > { %v2304_v20 = vpack.c.b16 %v2281_v63, %v3888_v60  ;;  %v564_v26 = vrot.slane %v563_v4, 4  ;;  %v614_v28 = vshll.u32 %v3890_v6, 16  ;;  %v618_v29 = vshrl.u32 %v3890_v6, 16 }
  0x6b   : > { %v3899_v33 = vrot.slane %v573_v10, 4  ;;  %v607_v36 = vrot.slane %v605_v12, 4  ;;  %v610_v37 = vrot.slane %v608_v13, 5  ;;  %v624_v43 = vshll.u32 %v3892_v11, 16 }
  0x6c   : > { %2328 = vrot.lane.b32.xlu2 %v2304_v20, %s3537_s14  ;;  %v569_v46 = vsel %vm3614_vm5, %v564_v26, %v568_v61  ;;  %v616_v48 = vrot.slane %v614_v28, 5  ;;  %v620_v50 = vrot.slane %v618_v29, 4  ;;  %v3905_v51 = vpack.c.bf16 %v322_v19, %v322_v19 }
  0x6d   : > { %5647 = vst [vmem:[#allocation9_spill] sm:$0xff] %v3899_v33  ;;  %v579_v54 = vsel %vm3614_vm5, %v3899_v33, %v578_v5  ;;  %v3910_v55 = vunpack.c.l.b16 %v569_v46  ;;  %v611_v59 = vor.u32 %v610_v37, %v607_v36  ;;  %v626_v62 = vrot.slane %v624_v43, 5  ;;  %v320_v36 = vld [vmem:[#allocation2 + $0xf8] sm:$0xff]  ;;  %v321_v46 = vld [vmem:[#allocation2 + $0x100] sm:$0x3]  ;;  %v331_v33 = vld [vmem:[#allocation2 + $0x150] sm:$0xff] }
  0x6e   : > { %v2279_v63 = vunpack.c.l.b16 %v579_v54  ;;  %v621_v4 = vor.u32 %v620_v50, %v616_v48  ;;  %v3912_v10 = vpack.c.bf16 %v323_v30, %v323_v30  ;;  %v3914_v12 = vpack.c.bf16 %v324_v45, %v324_v45 }
  0x6f   : > { %5648 = vst [vmem:[#allocation10_spill] sm:$0xff] %v3910_v55  ;;  %v612_v61 = vrot.slane %v611_v59, 4  ;;  %v653_v13 = vshrl.u32 %v3905_v51, 16  ;;  %v656_v19 = vshll.u32 %v3905_v51, 16  ;;  %v3918_v20 = vpack.c.bf16 %v319_v52, %v319_v52 }
  0x70   : > { %v2303_v26 = vpack.c.b16 %v2279_v63, %v3910_v55  ;;  %v3921_v5 = vrot.slane %v621_v4, 4  ;;  %v662_v28 = vshll.u32 %v3912_v10, 16  ;;  %v666_v29 = vshrl.u32 %v3912_v10, 16 }
  0x71   : > { %v617_v30 = vsel %vm3614_vm5, %v612_v61, %v616_v48  ;;  %v655_v37 = vrot.slane %v653_v13, 4  ;;  %v658_v43 = vrot.slane %v656_v19, 5  ;;  %v672_v45 = vshll.u32 %v3914_v12, 16 }
  0x72   : > { %5649 = vst [vmem:[#allocation11_spill] sm:$0xff] %v3921_v5  ;;  %2326 = vrot.lane.b32.xlu1 %v2303_v26, %s3537_s14  ;;  %v627_v50 = vsel %vm3614_vm5, %v3921_v5, %v626_v62  ;;  %v3932_v52 = vunpack.c.l.b16 %v617_v30  ;;  %v664_v54 = vrot.slane %v662_v28, 5  ;;  %v668_v59 = vrot.slane %v666_v29, 4  ;;  %v325_v26 = vld [vmem:[#allocation2 + $0x120] sm:$0xff]  ;;  %v326_v29 = vld [vmem:[#allocation2 + $0x128] sm:$0xff] }
  0x73   : > { %v2283_v63 = vunpack.c.l.b16 %v627_v50  ;;  %v659_v4 = vor.u32 %v658_v43, %v655_v37  ;;  %v674_v60 = vrot.slane %v672_v45, 5  ;;  %v3934_v44 = vpack.c.bf16 %v320_v36, %v320_v36 }
  0x74   : > { %5650 = vst [vmem:[#allocation12_spill] sm:$0xff] %v3932_v52  ;;  %v669_v48 = vor.u32 %v668_v59, %v664_v54  ;;  %v3936_v61 = vpack.c.bf16 %v321_v46, %v321_v46  ;;  %v629_v13 = vshrl.u32 %v3918_v20, 16  ;;  %v632_v19 = vshll.u32 %v3918_v20, 16  ;;  %v327_v46 = vld [vmem:[#allocation2 + $0x130] sm:$0x3] }
  0x75   : > { %v2305_v55 = vpack.c.b16 %v2283_v63, %v3932_v52  ;;  %v660_v62 = vrot.slane %v659_v4, 4  ;;  %v638_v30 = vshll.u32 %v3934_v44, 16  ;;  %v642_v28 = vshrl.u32 %v3934_v44, 16 }
  0x76   : > { %v3943_v37 = vrot.slane %v669_v48, 4  ;;  %v631_v36 = vrot.slane %v629_v13, 4  ;;  %v634_v43 = vrot.slane %v632_v19, 5  ;;  %v648_v45 = vshll.u32 %v3936_v61, 16 }
  0x77   : > { %2330 = vrot.lane.b32.xlu0 %v2305_v55, %s3537_s14  ;;  %v665_v50 = vsel %vm3614_vm5, %v660_v62, %v664_v54  ;;  %v640_v59 = vrot.slane %v638_v30, 5  ;;  %v644_v63 = vrot.slane %v642_v28, 4  ;;  %v3949_v4 = vpack.c.bf16 %v325_v26, %v325_v26 }
  0x78   : > { %5651 = vst [vmem:[#allocation13_spill] sm:$0xff] %v3943_v37  ;;  %v675_v48 = vsel %vm3614_vm5, %v3943_v37, %v674_v60  ;;  %v3954_v38 = vunpack.c.l.b16 %v665_v50  ;;  %v635_v13 = vor.u32 %v634_v43, %v631_v36  ;;  %v650_v19 = vrot.slane %v648_v45, 5  ;;  %v332_v45 = vld [vmem:[#allocation2 + $0x158] sm:$0xff] }
  0x79   : > { %v2287_v23 = vunpack.c.l.b16 %v675_v48  ;;  %v645_v22 = vor.u32 %v644_v63, %v640_v59  ;;  %v3956_v0 = vpack.c.bf16 %v326_v29, %v326_v29  ;;  %v3958_v55 = vpack.c.bf16 %v327_v46, %v327_v46  ;;  %v333_v48 = vld [vmem:[#allocation2 + $0x160] sm:$0x3] }
  0x7a   : > { %5652 = vst [vmem:[#allocation14_spill] sm:$0xff] %v3954_v38  ;;  %v636_v54 = vrot.slane %v635_v13, 4  ;;  %v677_v62 = vshrl.u32 %v3949_v4, 16  ;;  %v680_v26 = vshll.u32 %v3949_v4, 16  ;;  %v3962_v30 = vpack.c.bf16 %v331_v33, %v331_v33 }
  0x7b   : > { %5653 = vst [vmem:[#allocation15_spill] sm:$0xff] %v3958_v55  ;;  %v2307_v28 = vpack.c.b16 %v2287_v23, %v3954_v38  ;;  %v3965_v60 = vrot.slane %v645_v22, 4  ;;  %v686_v36 = vshll.u32 %v3956_v0, 16  ;;  %v690_v43 = vshrl.u32 %v3956_v0, 16 }
  0x7c   : > { %5654 = vst [vmem:[#allocation16_spill] sm:$0xff] %v3962_v30  ;;  %v641_v29 = vsel %vm3614_vm5, %v636_v54, %v640_v59  ;;  %v679_v46 = vrot.slane %v677_v62, 4  ;;  %v682_v50 = vrot.slane %v680_v26, 5  ;;  %v696_v63 = vshll.u32 %v3958_v55, 16 }
  0x7d   : > { %5655 = vst [vmem:[#allocation17_spill] sm:$0xff] %v3965_v60  ;;  %2334 = vrot.lane.b32.xlu2 %v2307_v28, %s3537_s14  ;;  %v651_v23 = vsel %vm3614_vm5, %v3965_v60, %v650_v19  ;;  %v3976_v22 = vunpack.c.l.b16 %v641_v29  ;;  %v688_v33 = vrot.slane %v686_v36, 5  ;;  %v692_v13 = vrot.slane %v690_v43, 4  ;;  %v328_v28 = vld [vmem:[#allocation2 + $0x138] sm:$0xff]  ;;  %v329_v43 = vld [vmem:[#allocation2 + $0x140] sm:$0xff] }
  0x7e   : > { %v2285_v38 = vunpack.c.l.b16 %v651_v23  ;;  %v683_v37 = vor.u32 %v682_v50, %v679_v46  ;;  %v698_v52 = vrot.slane %v696_v63, 5  ;;  %v3978_v5 = vpack.c.bf16 %v332_v45, %v332_v45 }
  0x7f   : > { %5656 = vst [vmem:[#allocation18_spill] sm:$0xff] %v3976_v22  ;;  %v693_v59 = vor.u32 %v692_v13, %v688_v33  ;;  %v3980_v54 = vpack.c.bf16 %v333_v48, %v333_v48  ;;  %v725_v62 = vshrl.u32 %v3962_v30, 16  ;;  %v728_v26 = vshll.u32 %v3962_v30, 16  ;;  %v330_v48 = vld [vmem:[#allocation2 + $0x148] sm:$0x3] }
  0x80   : > { %5657 = vst [vmem:[#allocation19_spill] sm:$0xff] %v3978_v5  ;;  %v2306_v55 = vpack.c.b16 %v2285_v38, %v3976_v22  ;;  %v684_v19 = vrot.slane %v683_v37, 4  ;;  %v734_v29 = vshll.u32 %v3978_v5, 16  ;;  %v738_v36 = vshrl.u32 %v3978_v5, 16  ;;  %v334_v22 = vld [vmem:[#allocation2 + $0x168] sm:$0xff] }
  0x81   : > { %5658 = vst [vmem:[#allocation20_spill] sm:$0xff] %v3980_v54  ;;  %v3987_v46 = vrot.slane %v693_v59, 4  ;;  %v727_v45 = vrot.slane %v725_v62, 4  ;;  %v730_v50 = vrot.slane %v728_v26, 5  ;;  %v744_v63 = vshll.u32 %v3980_v54, 16 }
  0x82   : > { %2332 = vrot.lane.b32.xlu1 %v2306_v55, %s3537_s14  ;;  %v689_v23 = vsel %vm3614_vm5, %v684_v19, %v688_v33  ;;  %v736_v13 = vrot.slane %v734_v29, 5  ;;  %v740_v38 = vrot.slane %v738_v36, 4  ;;  %v3993_v37 = vpack.c.bf16 %v328_v28, %v328_v28 }
  0x83   : > { %5659 = vst [vmem:[#allocation21_spill] sm:$0xff] %v3987_v46  ;;  %v699_v59 = vsel %vm3614_vm5, %v3987_v46, %v698_v52  ;;  %v3998_v60 = vunpack.c.l.b16 %v689_v23  ;;  %v731_v62 = vor.u32 %v730_v50, %v727_v45  ;;  %v746_v26 = vrot.slane %v744_v63, 5  ;;  %v335_v63 = vld [vmem:[#allocation2 + $0x170] sm:$0xff] }
  0x84   : > { %5660 = vst [vmem:[#allocation22_spill] sm:$0xff] %v3993_v37  ;;  %v2289_v54 = vunpack.c.l.b16 %v699_v59  ;;  %v741_v5 = vor.u32 %v740_v38, %v736_v13  ;;  %v4000_v30 = vpack.c.bf16 %v329_v43, %v329_v43  ;;  %v4002_v55 = vpack.c.bf16 %v330_v48, %v330_v48  ;;  %v336_v59 = vld [vmem:[#allocation2 + $0x178] sm:$0x3] }
  0x85   : > { %5661 = vst [vmem:[#allocation23_spill] sm:$0xff] %v3998_v60  ;;  %v732_v33 = vrot.slane %v731_v62, 4  ;;  %v701_v19 = vshrl.u32 %v3993_v37, 16  ;;  %v704_v28 = vshll.u32 %v3993_v37, 16  ;;  %v4006_v29 = vpack.c.bf16 %v334_v22, %v334_v22 }
  0x86   : > { %5662 = vst [vmem:[#allocation24_spill] sm:$0xff] %v4000_v30  ;;  %v2308_v36 = vpack.c.b16 %v2289_v54, %v3998_v60  ;;  %v4009_v52 = vrot.slane %v741_v5, 4  ;;  %v710_v45 = vshll.u32 %v4000_v30, 16  ;;  %v714_v50 = vshrl.u32 %v4000_v30, 16 }
  0x87   : > { %5663 = vst [vmem:[#allocation25_spill] sm:$0xff] %v4002_v55  ;;  %v737_v43 = vsel %vm3614_vm5, %v732_v33, %v736_v13  ;;  %v703_v48 = vrot.slane %v701_v19, 4  ;;  %v706_v23 = vrot.slane %v704_v28, 5  ;;  %v720_v38 = vshll.u32 %v4002_v55, 16 }
  0x88   : > { %5664 = vst [vmem:[#allocation26_spill] sm:$0xff] %v4009_v52  ;;  %2336 = vrot.lane.b32.xlu0 %v2308_v36, %s3537_s14  ;;  %v747_v5 = vsel %vm3614_vm5, %v4009_v52, %v746_v26  ;;  %v4020_v22 = vunpack.c.l.b16 %v737_v43  ;;  %v712_v54 = vrot.slane %v710_v45, 5  ;;  %v716_v62 = vrot.slane %v714_v50, 4 }
  0x89   : > { %v2293_v60 = vunpack.c.l.b16 %v747_v5  ;;  %v707_v46 = vor.u32 %v706_v23, %v703_v48  ;;  %v722_v30 = vrot.slane %v720_v38, 5  ;;  %v4022_v37 = vpack.c.bf16 %v335_v63, %v335_v63 }
  0x8a   : > { %5665 = vst [vmem:[#allocation27_spill] sm:$0xff] %v4020_v22  ;;  %v717_v13 = vor.u32 %v716_v62, %v712_v54  ;;  %v4024_v33 = vpack.c.bf16 %v336_v59, %v336_v59  ;;  %v749_v19 = vshrl.u32 %v4006_v29, 16  ;;  %v752_v28 = vshll.u32 %v4006_v29, 16 }
  0x8b   : > { %v2310_v36 = vpack.c.b16 %v2293_v60, %v4020_v22  ;;  %v708_v55 = vrot.slane %v707_v46, 4  ;;  %v758_v26 = vshll.u32 %v4022_v37, 16  ;;  %v762_v45 = vshrl.u32 %v4022_v37, 16 }
  0x8c   : > { %v4031_v50 = vrot.slane %v717_v13, 4  ;;  %v751_v43 = vrot.slane %v749_v19, 4  ;;  %v754_v48 = vrot.slane %v752_v28, 5  ;;  %v768_v63 = vshll.u32 %v4024_v33, 16 }
  0x8d   : > { %2340 = vrot.lane.b32.xlu2 %v2310_v36, %s3537_s14  ;;  %v713_v23 = vsel %vm3614_vm5, %v708_v55, %v712_v54  ;;  %v760_v38 = vrot.slane %v758_v26, 5  ;;  %v764_v59 = vrot.slane %v762_v45, 4  ;;  %v3423_v28 = vrot.slane %v3599_v7, 9 }
  0x8e   : > { %5666 = vst [vmem:[#allocation28_spill] sm:$0xff] %v4031_v50  ;;  %v723_v60 = vsel %vm3614_vm5, %v4031_v50, %v722_v30  ;;  %v4040_v46 = vunpack.c.l.b16 %v713_v23  ;;  %v755_v5 = vor.u32 %v754_v48, %v751_v43  ;;  %v770_v62 = vrot.slane %v768_v63, 5 }
  0x8f   : > { %v2291_v13 = vunpack.c.l.b16 %v723_v60  ;;  %v765_v19 = vor.u32 %v764_v59, %v760_v38  ;;  %v825_v55 = vrot.slane %v3589_v2, 5  ;;  %v828_v54 = vrot.slane %v3603_v8, 5 }
  0x90   : > { %5667 = vst [vmem:[#allocation29_spill] sm:$0xff] %v4040_v46  ;;  %v756_v36 = vrot.slane %v755_v5, 4  ;;  %v3424_v30 = vrot.slane %v3738_v14, 9  ;;  %v832_v43 = vrot.slane %v3744_v24, 5  ;;  %v835_v48 = vrot.slane %v3746_v25, 5 }
  0x91   : > { %v2309_v26 = vpack.c.b16 %v2291_v13, %v4040_v46  ;;  %v4051_v45 = vrot.slane %v765_v19, 4  ;;  %v826_v23 = vsel %vm4043_vm8, %v3423_v28, %v825_v55  ;;  %v827_v59 = vrot.slane %v825_v55, 4 }
  0x92   : > { %v761_v63 = vsel %vm3614_vm5, %v756_v36, %v760_v38  ;;  %v3425_v60 = vrot.slane %v3722_v53, 9  ;;  %v2344_v13 = vunpack.c.l.b16 %v826_v23  ;;  %v833_v25 = vsel %vm4043_vm8, %v3424_v30, %v832_v43 }
  0x93   : > { %5670 = vst [vmem:[#allocation30_spill] sm:$0xff] %v4051_v45  ;;  %2338 = vrot.lane.b32.xlu1 %v2309_v26, %s3537_s14  ;;  %v771_v8 = vsel %vm3614_vm5, %v4051_v45, %v770_v62  ;;  %v4064_v5 = vunpack.c.l.b16 %v761_v63  ;;  %v829_v38 = vsel %vm4043_vm8, %v827_v59, %v828_v54  ;;  %v834_v28 = vrot.slane %v832_v43, 4  ;;  %v5696_v45 = vld [vmem:[#allocation20_spill] sm:$0xff] }
  0x94   : > { %v2295_v19 = vunpack.c.l.b16 %v771_v8  ;;  %v2346_v36 = vunpack.c.l.b16 %v833_v25  ;;  %v2345_v55 = vunpack.c.l.b16 %v829_v38  ;;  %v839_v52 = vrot.slane %v3724_v56, 5 }
  0x95   : > { %5671 = vst [vmem:[#allocation31_spill] sm:$0xff] %v4064_v5  ;;  %v842_v26 = vrot.slane %v3726_v57, 5  ;;  %v3426_v46 = vrot.slane %v3792_v27, 9  ;;  %v836_v63 = vsel %vm4043_vm8, %v834_v28, %v835_v48  ;;  %v846_v30 = vrot.slane %v3797_v34, 5 }
  0x96   : > { %v2311_v62 = vpack.c.b16 %v2295_v19, %v4064_v5  ;;  %v849_v23 = vrot.slane %v3799_v35, 5  ;;  %v2376_v8 = vpack.c.b16 %v2345_v55, %v2344_v13  ;;  %v2347_v54 = vunpack.c.l.b16 %v836_v63 }
  0x97   : > { %v840_v43 = vsel %vm4043_vm8, %v3425_v60, %v839_v52  ;;  %v841_v59 = vrot.slane %v839_v52, 4  ;;  %v4083_v25 = vsel %vm4043_vm8, %v3426_v46, %v846_v30  ;;  %v4085_v19 = vrot.slane %v846_v30, 4 }
  0x98   : > { %2342 = vrot.lane.b32.xlu0 %v2311_v62, %s3537_s14  ;;  %v2348_v57 = vunpack.c.l.b16 %v840_v43  ;;  %5672 = vst [vmem:[#allocation32_spill] sm:$0xff] %v4083_v25  ;;  %v3427_v48 = vrot.slane %v3706_v40, 9  ;;  %v2377_v38 = vpack.c.b16 %v2347_v54, %v2346_v36  ;;  %v5603_v13 = vunpack.c.l.b16 %v4083_v25  ;;  %v5691_v25 = vld [vmem:[#allocation25_spill] sm:$0xff] }
  0x99   : > { %5673 = vst [vmem:[#allocation33_spill] sm:$0xff] %v4085_v19  ;;  %v843_v35 = vsel %vm4043_vm8, %v841_v59, %v842_v26  ;;  %v853_v60 = vrot.slane %v3709_v41, 5  ;;  %v850_v28 = vsel %vm4043_vm8, %v4085_v19, %v849_v23  ;;  %v856_v46 = vrot.slane %v3711_v42, 5 }
  0x9a   : > { %v2349_v52 = vunpack.c.l.b16 %v843_v35  ;;  %v3428_v55 = vrot.slane %v3769_v58, 9  ;;  %2394 = vrot.lane.b32.xlu2 %v2377_v38, %s3538_s19  ;;  %v2351_v36 = vunpack.c.l.b16 %v850_v28  ;;  %v860_v63 = vrot.slane %v3775_v1, 5 }
  0x9b   : > { %2392 = vrot.lane.b32.xlu1 %v2376_v8, %s3538_s19  ;;  %v854_v26 = vsel %vm4043_vm8, %v3427_v48, %v853_v60  ;;  %v855_v62 = vrot.slane %v853_v60, 4  ;;  %v863_v23 = vrot.slane %v3777_v3, 5  ;;  %v3429_v42 = vrot.slane %v3813_v9, 9 }
  0x9c   : > { %v2378_v30 = vpack.c.b16 %v2349_v52, %v2348_v57  ;;  %v2352_v54 = vunpack.c.l.b16 %v854_v26  ;;  %v2379_v43 = vpack.c.b16 %v2351_v36, %v5603_v13  ;;  %v861_v59 = vsel %vm4043_vm8, %v3428_v55, %v860_v63 }
  0x9d   : > { %v857_v8 = vsel %vm4043_vm8, %v855_v62, %v856_v46  ;;  %v862_v38 = vrot.slane %v860_v63, 4  ;;  %v2354_v35 = vunpack.c.l.b16 %v861_v59  ;;  %v867_v60 = vrot.slane %v3818_v16, 5 }
  0x9e   : > { %v2353_v48 = vunpack.c.l.b16 %v857_v8  ;;  %v870_v57 = vrot.slane %v3820_v17, 5  ;;  %v3430_v52 = vrot.slane %v3861_v18, 9  ;;  %v874_v28 = vrot.slane %v3868_v31, 5 }
  0x9f   : > { %v864_v3 = vsel %vm4043_vm8, %v862_v38, %v863_v23  ;;  %v877_v36 = vrot.slane %v3870_v32, 5  ;;  %v4120_v26 = vsel %vm4043_vm8, %v3429_v42, %v867_v60  ;;  %v4122_v62 = vrot.slane %v867_v60, 4 }
  0xa0   : > { %2396 = vrot.lane.b32.xlu0 %v2378_v30, %s3538_s19  ;;  %v2380_v46 = vpack.c.b16 %v2353_v48, %v2352_v54  ;;  %v2355_v55 = vunpack.c.l.b16 %v864_v3  ;;  %5674 = vst [vmem:[#allocation34_spill] sm:$0xff] %v4120_v26  ;;  %v5606_v17 = vunpack.c.l.b16 %v4120_v26  ;;  %v4127_v63 = vsel %vm4043_vm8, %v3430_v52, %v874_v28  ;;  %v938_v26 = vld [vmem:[#allocation2 + $0x30] sm:$0xff] }
  0xa1   : > { %5675 = vst [vmem:[#allocation35_spill] sm:$0xff] %v4122_v62  ;;  %v4129_v23 = vrot.slane %v874_v28, 4  ;;  %v3431_v32 = vrot.slane %v3825_v21, 9  ;;  %v871_v30 = vsel %vm4043_vm8, %v4122_v62, %v870_v57  ;;  %v5604_v54 = vunpack.c.l.b16 %v4127_v63 }
  0xa2   : > { %5676 = vst [vmem:[#allocation36_spill] sm:$0xff] %v4127_v63  ;;  %v2381_v8 = vpack.c.b16 %v2355_v55, %v2354_v35  ;;  %v881_v42 = vrot.slane %v3842_v47, 5  ;;  %2400 = vrot.lane.b32.xlu2 %v2380_v46, %s3538_s19  ;;  %v2357_v59 = vunpack.c.l.b16 %v871_v30  ;;  %v884_v48 = vrot.slane %v3844_v49, 5 }
  0xa3   : > { %5677 = vst [vmem:[#allocation37_spill] sm:$0xff] %v4129_v23  ;;  %2398 = vrot.lane.b32.xlu1 %v2379_v43, %s3538_s19  ;;  %v878_v38 = vsel %vm4043_vm8, %v4129_v23, %v877_v36  ;;  %v3432_v35 = vrot.slane %v3874_v39, 9  ;;  %v888_v43 = vrot.slane %v3890_v6, 5  ;;  %v891_v28 = vrot.slane %v3892_v11, 5  ;;  %v5692_v23 = vld [vmem:[#allocation16_spill] sm:$0xff] }
  0xa4   : > { %v2359_v60 = vunpack.c.l.b16 %v878_v38  ;;  %v4146_v57 = vsel %vm4043_vm8, %v3431_v32, %v881_v42  ;;  %v4148_v3 = vrot.slane %v881_v42, 4  ;;  %v2382_v52 = vpack.c.b16 %v2357_v59, %v5606_v17 }
  0xa5   : > { %5678 = vst [vmem:[#allocation38_spill] sm:$0xff] %v4146_v57  ;;  %v3433_v36 = vrot.slane %v3918_v20, 9  ;;  %v5605_v46 = vunpack.c.l.b16 %v4146_v57  ;;  %v4161_v55 = vsel %vm4043_vm8, %v3432_v35, %v888_v43  ;;  %v4163_v32 = vrot.slane %v888_v43, 4 }
  0xa6   : > { %5679 = vst [vmem:[#allocation39_spill] sm:$0xff] %v4148_v3  ;;  %v885_v49 = vsel %vm4043_vm8, %v4148_v3, %v884_v48  ;;  %v2383_v30 = vpack.c.b16 %v2359_v60, %v5604_v54  ;;  %v895_v11 = vrot.slane %v3934_v44, 5  ;;  %v898_v59 = vrot.slane %v3936_v61, 5 }
  0xa7   : > { %5680 = vst [vmem:[#allocation40_spill] sm:$0xff] %v4161_v55  ;;  %v2361_v42 = vunpack.c.l.b16 %v885_v49  ;;  %v892_v38 = vsel %vm4043_vm8, %v4163_v32, %v891_v28  ;;  %v3434_v48 = vrot.slane %v3905_v51, 9  ;;  %v902_v35 = vrot.slane %v3912_v10, 5 }
  0xa8   : > { %2402 = vrot.lane.b32.xlu0 %v2381_v8, %s3538_s19  ;;  %v905_v43 = vrot.slane %v3914_v12, 5  ;;  %v2363_v60 = vunpack.c.l.b16 %v892_v38  ;;  %v4179_v49 = vsel %vm4043_vm8, %v3433_v36, %v895_v11  ;;  %v4181_v61 = vrot.slane %v895_v11, 4 }
  0xa9   : > { %5681 = vst [vmem:[#allocation41_spill] sm:$0xff] %v4179_v49  ;;  %v2384_v8 = vpack.c.b16 %v2361_v42, %v5605_v46  ;;  %v4185_v54 = vrot.slane %v902_v35, 4  ;;  %v3435_v28 = vrot.slane %v3949_v4, 9  ;;  %v4196_v11 = vsel %vm4043_vm8, %v3434_v48, %v902_v35  ;;  %v5690_v35 = vld [vmem:[#allocation24_spill] sm:$0xff] }
  0xaa   : > { %5682 = vst [vmem:[#allocation42_spill] sm:$0xff] %v4181_v61  ;;  %2406 = vrot.lane.b32.xlu2 %v2383_v30, %s3538_s19  ;;  %v899_v12 = vsel %vm4043_vm8, %v4181_v61, %v898_v59  ;;  %v909_v42 = vrot.slane %v3956_v0, 5  ;;  %v5686_v30 = vld [vmem:[#allocation22_spill] sm:$0xff]  ;;  %v5687_v57 = vunpack.c.l.b16 %v4161_v55  ;;  %v916_v3 = vrot.slane %v5690_v35, 5  ;;  %v2321_v61 = vpop.permute.xlu2 %2320 }
  0xab   : > { %5683 = vst [vmem:[#allocation43_spill] sm:$0xff] %v4185_v54  ;;  %2404 = vrot.lane.b32.xlu1 %v2382_v52, %s3538_s19  ;;  %v2365_v38 = vunpack.c.l.b16 %v899_v12  ;;  %v906_v46 = vsel %vm4043_vm8, %v4185_v54, %v905_v43  ;;  %v5685_v52 = vld [vmem:[#allocation15_spill] sm:$0xff]  ;;  %v3436_v13 = vrot.slane %v5686_v30, 9  ;;  %v919_v43 = vrot.slane %v5691_v25, 5 }
  0xac   : > { %5684 = vst [vmem:[#allocation44_spill] sm:$0xff] %v4196_v11  ;;  %v912_v17 = vrot.slane %v5685_v52, 5  ;;  %v2385_v59 = vpack.c.b16 %v2363_v60, %v5687_v57  ;;  %v4208_v36 = vsel %vm4043_vm8, %v3435_v28, %v909_v42  ;;  %v4210_v48 = vrot.slane %v909_v42, 4  ;;  %v5695_v42 = vld [vmem:[#allocation19_spill] sm:$0xff] }
  0xad   : > { %5688 = vst [vmem:[#allocation15_spill] sm:$0xff] %v4208_v36  ;;  %v2367_v63 = vunpack.c.l.b16 %v906_v46  ;;  %v3437_v52 = vrot.slane %v5692_v23, 9  ;;  %v5693_v19 = vunpack.c.l.b16 %v4179_v49  ;;  %v4223_v60 = vsel %vm4043_vm8, %v3436_v13, %v916_v3 }
  0xae   : > { %5689 = vst [vmem:[#allocation22_spill] sm:$0xff] %v4210_v48  ;;  %v913_v57 = vsel %vm4043_vm8, %v4210_v48, %v912_v17  ;;  %v4225_v28 = vrot.slane %v916_v3, 4  ;;  %v923_v12 = vrot.slane %v5695_v42, 5  ;;  %v926_v54 = vrot.slane %v5696_v45, 5  ;;  %v936_v48 = vld [vmem:[#allocation2 + $0x20] sm:$0xff] }
  0xaf   : > { %v2386_v5 = vpack.c.b16 %v2365_v38, %v5693_v19  ;;  %5694 = vst [vmem:[#allocation24_spill] sm:$0xff] %v4223_v60  ;;  %v2369_v25 = vunpack.c.l.b16 %v913_v57  ;;  %v935_v19 = vld [vmem:[#allocation2 + $0x18] sm:$0xff]  ;;  %v3438_v38 = vrot.slane %v4006_v29, 9  ;;  %v930_v13 = vrot.slane %v4022_v37, 5 }
  0xb0   : > { %2408 = vrot.lane.b32.xlu0 %v2384_v8, %s3538_s19  ;;  %v920_v17 = vsel %vm4043_vm8, %v4225_v28, %v919_v43  ;;  %v933_v3 = vrot.slane %v4024_v33, 5  ;;  %v4240_v57 = vsel %vm4043_vm8, %v3437_v52, %v923_v12  ;;  %v4242_v45 = vrot.slane %v923_v12, 4 }
  0xb1   : > { %v2371_v46 = vunpack.c.l.b16 %v920_v17  ;;  %5697 = vst [vmem:[#allocation25_spill] sm:$0xff] %v4240_v57  ;;  %v4248_v43 = vsel %vm4043_vm8, %v3438_v38, %v930_v13  ;;  %v4250_v33 = vrot.slane %v930_v13, 4  ;;  %v4252_v62 = vpack.c.bf16 %v935_v19, %v935_v19  ;;  %v939_v17 = vld [vmem:[#allocation2 + $0x38] sm:$0xff]  ;;  %v948_v13 = vld [vmem:[#allocation2 + $0x80] sm:$0xff] }
  0xb2   : > { %5698 = vst [vmem:[#allocation16_spill] sm:$0xff] %v4242_v45  ;;  %2412 = vrot.lane.b32.xlu2 %v2386_v5, %s3538_s19  ;;  %v5701_v8 = vunpack.c.l.b16 %v4196_v11  ;;  %v927_v12 = vsel %vm4043_vm8, %v4242_v45, %v926_v54  ;;  %v4260_v49 = vpack.c.bf16 %v936_v48, %v936_v48  ;;  %v944_v5 = vld [vmem:[#allocation2 + $0x60] sm:$0xff]  ;;  %v4266_v55 = vpack.c.bf16 %v938_v26, %v938_v26  ;;  %v947_v26 = vld [vmem:[#allocation2 + $0x78] sm:$0xff] }
  0xb3   : > { %2410 = vrot.lane.b32.xlu1 %v2385_v59, %s3538_s19  ;;  %5699 = vst [vmem:[#allocation19_spill] sm:$0xff] %v4248_v43  ;;  %v2373_v38 = vunpack.c.l.b16 %v927_v12  ;;  %v934_v19 = vsel %vm4043_vm8, %v4250_v33, %v933_v3  ;;  %v5703_v54 = vunpack.c.l.b16 %v4223_v60  ;;  %v4272_v45 = vpack.c.bf16 %v939_v17, %v939_v17 }
  0xb4   : > { %5700 = vst [vmem:[#allocation20_spill] sm:$0xff] %v4250_v33  ;;  %v2387_v52 = vpack.c.b16 %v2367_v63, %v5701_v8  ;;  %v945_v63 = vld [vmem:[#allocation2 + $0x68] sm:$0xff]  ;;  %v5702_v8 = vunpack.c.l.b16 %v4208_v36  ;;  %v2375_v48 = vunpack.c.l.b16 %v934_v19  ;;  %v2424_v12 = vunpack.c.l.b16 %v4252_v62 }
  0xb5   : > { %v2389_v59 = vpack.c.b16 %v2371_v46, %v5703_v54  ;;  %v2425_v50 = vunpack.c.l.b16 %v4260_v49  ;;  %v2428_v3 = vunpack.c.l.b16 %v3792_v27  ;;  %v4277_v33 = vpack.c.bf16 %v944_v5, %v944_v5 }
  0xb6   : > { %v2388_v11 = vpack.c.b16 %v2369_v25, %v5702_v8  ;;  %v5705_v25 = vunpack.c.l.b16 %v4240_v57  ;;  %v2426_v46 = vunpack.c.l.b16 %v4266_v55  ;;  %v2429_v17 = vunpack.c.l.b16 %v3797_v34 }
  0xb7   : > { %5704 = vst [vmem:[#allocation45_spill] sm:$0xff] %v4277_v33  ;;  %v4284_v19 = vpack.c.bf16 %v945_v63, %v945_v63  ;;  %v5707_v54 = vunpack.c.l.b16 %v4248_v43  ;;  %v2427_v27 = vunpack.c.l.b16 %v4272_v45  ;;  %v2224_v5 = vunpack.c.l.b16 %v3706_v40 }
  0xb8   : > { %2414 = vrot.lane.b32.xlu0 %v2387_v52, %s3538_s19  ;;  %v2390_v8 = vpack.c.b16 %v2373_v38, %v5705_v25  ;;  %v2225_v60 = vunpack.c.l.b16 %v3709_v41  ;;  %v2430_v52 = vunpack.c.l.b16 %v4277_v33  ;;  %v4293_v38 = vpack.c.bf16 %v947_v26, %v947_v26  ;;  %v249_v33 = vld [vmem:[%s3675_s18 + $0xf8] sm:$0xff] }
  0xb9   : > { %5706 = vst [vmem:[#allocation46_spill] sm:$0xff] %v4284_v19  ;;  %v2391_v36 = vpack.c.b16 %v2375_v48, %v5707_v54  ;;  %v2431_v57 = vunpack.c.l.b16 %v4284_v19  ;;  %v4295_v25 = vpack.c.bf16 %v948_v13, %v948_v13  ;;  %v2456_v34 = vpack.c.b16 %v2425_v50, %v2424_v12 }
  0xba   : > { %2418 = vrot.lane.b32.xlu2 %v2389_v59, %s3538_s19  ;;  %v2252_v63 = vpack.c.b16 %v2225_v60, %v2224_v5  ;;  %v2434_v48 = vunpack.c.l.b16 %v3813_v9  ;;  %v2435_v40 = vunpack.c.l.b16 %v3818_v16  ;;  %v2432_v41 = vunpack.c.l.b16 %v4293_v38  ;;  %v2323_v16 = vpop.permute.xlu2 %2322  ;;  %282 = vst.msk [vmem:[#allocation2 + $0x189] sm:$0xff] %vm172_vm0, %v249_v33 }
  0xbb   : > { %2416 = vrot.lane.b32.xlu1 %v2388_v11, %s3538_s19  ;;  %v2433_v54 = vunpack.c.l.b16 %v4295_v25  ;;  %v2436_v26 = vunpack.c.l.b16 %v3861_v18  ;;  %v2437_v13 = vunpack.c.l.b16 %v3868_v31  ;;  %v4305_v19 = vpack.c.b16 %v2427_v27, %v2426_v46  ;;  %v248_v18 = vld [vmem:[%s3675_s18 + $0xf0] sm:$0xff] }
  0xbc   : > { %v4307_v11 = vpack.c.b16 %v2429_v17, %v2428_v3  ;;  %v2226_v50 = vunpack.c.l.b16 %v3769_v58  ;;  %v2227_v60 = vunpack.c.l.b16 %v3775_v1  ;;  %v2459_v9 = vpack.c.b16 %v2431_v57, %v2430_v52  ;;  %281 = vst.msk [vmem:[#allocation2 + $0x181] sm:$0xff] %vm172_vm0, %v248_v18  ;;  %v2313_v52 = vpop.permute.xlu0 %2312 }
  0xbd   : > { %v4312_v59 = vsel %vm172_vm0, %v2252_v63, %v2321_v61  ;;  %v2438_v12 = vunpack.c.l.b16 %v3825_v21  ;;  %v2439_v5 = vunpack.c.l.b16 %v3842_v47  ;;  %v4318_v31 = vpack.c.b16 %v2435_v40, %v2434_v48 }
  0xbe   : > { %v2253_v46 = vpack.c.b16 %v2227_v60, %v2226_v50  ;;  %v2440_v3 = vunpack.c.l.b16 %v3874_v39  ;;  %v2441_v58 = vunpack.c.l.b16 %v3890_v6  ;;  %v4324_v1 = vpack.c.b16 %v2433_v54, %v2432_v41 }
  0xbf   : > { %v4326_v61 = vpack.c.b16 %v2437_v13, %v2436_v26  ;;  %v4328_v21 = vpack.c.b16 %v2439_v5, %v2438_v12  ;;  %v2442_v47 = vunpack.c.l.b16 %v3918_v20  ;;  %v2443_v39 = vunpack.c.l.b16 %v3934_v44 }
  0xc0   : > { %2420 = vrot.lane.b32.xlu0 %v2390_v8, %s3538_s19  ;;  %v4333_v57 = vsel %vm172_vm0, %v2253_v46, %v2323_v16  ;;  %v2444_v6 = vunpack.c.l.b16 %v3905_v51  ;;  %v2445_v17 = vunpack.c.l.b16 %v3912_v10  ;;  %v2216_v8 = vunpack.c.l.b16 %v3599_v7 }
  0xc1   : > { %v2217_v27 = vunpack.c.l.b16 %v3589_v2  ;;  %v4342_v20 = vpack.c.b16 %v2441_v58, %v2440_v3  ;;  %v2446_v33 = vunpack.c.l.b16 %v3949_v4  ;;  %v2447_v44 = vunpack.c.l.b16 %v3956_v0 }
  0xc2   : > { %2472 = vrot.lane.b32.xlu2 %v2456_v34, %s3539_s20  ;;  %v2448_v51 = vunpack.c.l.b16 %v5686_v30  ;;  %v2449_v10 = vunpack.c.l.b16 %v5690_v35  ;;  %v4348_v7 = vpack.c.b16 %v2443_v39, %v2442_v47  ;;  %v2220_v2 = vunpack.c.l.b16 %v3722_v53  ;;  %v937_v30 = vld [vmem:[#allocation2 + $0x28] sm:$0x3]  ;;  %v2317_v13 = vpop.permute.xlu1 %2316  ;;  %v940_v47 = vld [vmem:[#allocation2 + $0x40] sm:$0x3] }
  0xc3   : > { %2422 = vrot.lane.b32.xlu1 %v2391_v36, %s3538_s19  ;;  %v2248_v63 = vpack.c.b16 %v2217_v27, %v2216_v8  ;;  %v2221_v36 = vunpack.c.l.b16 %v3724_v56  ;;  %v4352_v48 = vpack.c.b16 %v2445_v17, %v2444_v6  ;;  %v4357_v40 = vpack.c.b16 %v2447_v44, %v2446_v33  ;;  %v980_v4 = vld [vmem:[#allocation2 + $0x180] sm:$0xff]  ;;  %v981_v26 = vld [vmem:[#allocation2 + $0x188] sm:$0xff] }
  0xc4   : > { %v2450_v0 = vunpack.c.l.b16 %v5692_v23  ;;  %v4360_v41 = vpack.c.b16 %v2449_v10, %v2448_v51  ;;  %v2451_v54 = vunpack.c.l.b16 %v5695_v42  ;;  %v4363_v53 = vpack.c.bf16 %v980_v4, %v980_v4 }
  0xc5   : > { %v4355_v34 = vsel %vm172_vm0, %v2248_v63, %v2313_v52  ;;  %v2250_v35 = vpack.c.b16 %v2221_v36, %v2220_v2  ;;  %v2218_v50 = vunpack.c.l.b16 %v3738_v14  ;;  %v2219_v60 = vunpack.c.l.b16 %v3744_v24 }
  0xc6   : > { %5708 = vst [vmem:[#allocation47_spill] sm:$0xff] %v4363_v53  ;;  %v2329_v56 = vpop.permute.xlu2 %2328  ;;  %v2452_v23 = vunpack.c.l.b16 %v4006_v29  ;;  %v2453_v42 = vunpack.c.l.b16 %v4022_v37  ;;  %v4375_v12 = vpack.c.bf16 %v981_v26, %v981_v26  ;;  %v4377_v5 = vpack.c.bf16 %v937_v30, %v937_v30  ;;  %v961_v30 = vld [vmem:[#allocation2 + $0xe8] sm:$0x3] }
  0xc7   : > { %v4372_v16 = vsel %vm172_vm0, %v4328_v21, %v2329_v56  ;;  %v2249_v18 = vpack.c.b16 %v2219_v60, %v2218_v50  ;;  %v1032_v46 = vshrl.u32 %v4252_v62, 16  ;;  %v1035_v3 = vshll.u32 %v4252_v62, 16 }
  0xc8   : > { %2474 = vrot.lane.b32.xlu0 %v4305_v19, %s3539_s20  ;;  %5709 = vst [vmem:[#allocation48_spill] sm:$0xff] %v4375_v12  ;;  %v1041_v14 = vshll.u32 %v4260_v49, 16  ;;  %v4386_v24 = vsel %vm172_vm0, %v2250_v35, %v2317_v13  ;;  %v4388_v37 = vpack.c.b16 %v2451_v54, %v2450_v0  ;;  %v4390_v29 = vpack.c.b16 %v2453_v42, %v2452_v23 }
  0xc9   : > { %v2454_v58 = vunpack.c.l.b16 %v4363_v53  ;;  %v2315_v39 = vpop.permute.xlu0 %2314  ;;  %v2455_v6 = vunpack.c.l.b16 %v4375_v12  ;;  %v1034_v17 = vrot.slane %v1032_v46, 4  ;;  %v1037_v27 = vrot.slane %v1035_v3, 5 }
  0xca   : > { %2478 = vrot.lane.b32.xlu2 %v2459_v9, %s3539_s20  ;;  %v4395_v8 = vsel %vm172_vm0, %v2249_v18, %v2315_v39  ;;  %v1043_v52 = vrot.slane %v1041_v14, 5  ;;  %v1045_v9 = vshrl.u32 %v4260_v49, 16  ;;  %v1051_v33 = vshll.u32 %v4377_v5, 16 }
  0xcb   : > { %2476 = vrot.lane.b32.xlu1 %v4307_v11, %s3539_s20  ;;  %v4399_v44 = vpack.c.bf16 %v940_v47, %v940_v47  ;;  %v1038_v51 = vor.u32 %v1037_v27, %v1034_v17  ;;  %v1056_v63 = vshrl.u32 %v4266_v55, 16  ;;  %v1059_v10 = vshll.u32 %v4266_v55, 16 }
  0xcc   : > { %v1065_v2 = vshll.u32 %v4272_v45, 16  ;;  %v4406_v36 = vpack.c.b16 %v2455_v6, %v2454_v58  ;;  %v1047_v0 = vrot.slane %v1045_v9, 4  ;;  %v1053_v4 = vrot.slane %v1051_v33, 5 }
  0xcd   : > { %5710 = vst [vmem:[#allocation49_spill] sm:$0xff] %v4399_v44  ;;  %v1039_v35 = vrot.slane %v1038_v51, 4  ;;  %v1058_v54 = vrot.slane %v1056_v63, 4  ;;  %v1061_v26 = vrot.slane %v1059_v10, 5  ;;  %v1069_v50 = vshrl.u32 %v4272_v45, 16 }
  0xce   : > { %v1048_v56 = vor.u32 %v1047_v0, %v1043_v52  ;;  %v1067_v13 = vrot.slane %v1065_v2, 5  ;;  %v1075_v60 = vshll.u32 %v4399_v44, 16  ;;  %v1009_v23 = vpack.c.bf16 %v961_v30, %v961_v30  ;;  %v973_v10 = vld [vmem:[#allocation2 + $0x148] sm:$0x3] }
  0xcf   : > { %v1044_v42 = vsel %vm3614_vm5, %v1039_v35, %v1043_v52  ;;  %v1071_v46 = vrot.slane %v1069_v50, 4 }
  0xd0   : > { %2480 = vrot.lane.b32.xlu0 %v4324_v1, %s3539_s20  ;;  %v1062_v1 = vor.u32 %v1061_v26, %v1058_v54  ;;  %v1049_v18 = vrot.slane %v1048_v56, 4  ;;  %v1077_v14 = vrot.slane %v1075_v60, 5  ;;  %v1243_v17 = vshll.u32 %v1009_v23, 16  ;;  %v1600_v60 = vld [vmem:[#allocation2 + $0xf0] sm:$0xff] }
  0xd1   : > { %v1072_v39 = vor.u32 %v1071_v46, %v1067_v13  ;;  %v4422_v9 = vunpack.c.l.b16 %v1044_v42  ;;  %v1021_v54 = vpack.c.bf16 %v973_v10, %v973_v10  ;;  %v1524_v26 = vrot.slane %v1009_v23, 5  ;;  %v5711_v42 = vld [vmem:[#allocation11_spill] sm:$0xff]  ;;  %v5713_v10 = vld [vmem:[#allocation40_spill] sm:$0xff] }
  0xd2   : > { %2484 = vrot.lane.b32.xlu2 %v4326_v61, %s3539_s20  ;;  %v1063_v3 = vrot.slane %v1062_v1, 4  ;;  %v1054_v47 = vsel %vm3614_vm5, %v1049_v18, %v1053_v4  ;;  %v1245_v30 = vrot.slane %v1243_v17, 5  ;;  %v1601_v1 = vld [vmem:[#allocation2 + $0xf8] sm:$0xff] }
  0xd3   : > { %2482 = vrot.lane.b32.xlu1 %v4318_v31, %s3539_s20  ;;  %v2319_v58 = vpop.permute.xlu1 %2318  ;;  %v4424_v52 = vunpack.c.l.b16 %v1054_v47  ;;  %v4426_v33 = vrot.slane %v1072_v39, 4  ;;  %v1552_v50 = vrot.slane %v1021_v54, 5  ;;  %v1525_v46 = vsel %vm4043_vm8, %v4163_v32, %v1524_v26  ;;  %v1613_v17 = vld [vmem:[#allocation2 + $0x158] sm:$0xff] }
  0xd4   : > { %v1068_v6 = vsel %vm3614_vm5, %v1063_v3, %v1067_v13  ;;  %v4434_v63 = vsel %vm172_vm0, %v4307_v11, %v2319_v58  ;;  %v1339_v13 = vshll.u32 %v1021_v54, 16  ;;  %v1246_v18 = vsel %vm3614_vm5, %v5711_v42, %v1245_v30  ;;  %v5712_v32 = vld [vmem:[#allocation28_spill] sm:$0xff] }
  0xd5   : > { %v4439_v2 = vunpack.c.l.b16 %v1068_v6  ;;  %v2601_v23 = vunpack.c.l.b16 %v1525_v46  ;;  %v1553_v3 = vsel %vm4043_vm8, %v4225_v28, %v1552_v50  ;;  %v4468_v47 = vpack.c.bf16 %v1600_v60, %v1600_v60  ;;  %v1612_v6 = vld [vmem:[#allocation2 + $0x150] sm:$0xff]  ;;  %v5715_v30 = vld [vmem:[#allocation24_spill] sm:$0xff] }
  0xd6   : > { %v2609_v58 = vunpack.c.l.b16 %v1553_v3  ;;  %v4470_v39 = vpack.c.bf16 %v1601_v1, %v1601_v1  ;;  %v5716_v54 = vunpack.c.l.b16 %v5715_v30  ;;  %v4491_v1 = vpack.c.bf16 %v1612_v6, %v1612_v6  ;;  %v5717_v46 = vld [vmem:[#allocation12_spill] sm:$0xff]  ;;  %v1614_v30 = vld [vmem:[#allocation2 + $0x160] sm:$0x3] }
  0xd7   : > { %v2335_v27 = vpop.permute.xlu2 %2334  ;;  %v4493_v42 = vpack.c.bf16 %v1613_v17, %v1613_v17  ;;  %v1865_v3 = vshrl.u32 %v4468_v47, 16  ;;  %v1868_v17 = vshll.u32 %v4468_v47, 16  ;;  %v1662_v53 = vpack.c.bf16 %v1614_v30, %v1614_v30 }
  0xd8   : > { %2486 = vrot.lane.b32.xlu0 %v4328_v21, %s3539_s20  ;;  %v4430_v51 = vsel %vm172_vm0, %v4352_v48, %v2335_v27  ;;  %v1078_v21 = vsel %vm3614_vm5, %v4426_v33, %v1077_v14  ;;  %v4466_v14 = vunpack.c.l.b16 %v1246_v18  ;;  %v1602_v27 = vld [vmem:[#allocation2 + $0x100] sm:$0x3]  ;;  %v4487_v26 = vpack.c.b16 %v2609_v58, %v5716_v54 }
  0xd9   : > { %v2325_v0 = vpop.permute.xlu0 %2324  ;;  %v4445_v4 = vunpack.c.l.b16 %v1078_v21  ;;  %v5714_v21 = vunpack.c.l.b16 %v5713_v10  ;;  %v2681_v50 = vunpack.c.l.b16 %v4470_v39  ;;  %v4495_v18 = vpack.c.bf16 %v1602_v27, %v1602_v27  ;;  %v5718_v58 = vld [vmem:[#allocation29_spill] sm:$0xff] }
  0xda   : > { %2490 = vrot.lane.b32.xlu2 %v4348_v7, %s3539_s20  ;;  %v4451_v35 = vsel %vm172_vm0, %v4318_v31, %v2325_v0  ;;  %v1341_v31 = vrot.slane %v1339_v13, 5  ;;  %v2680_v13 = vunpack.c.l.b16 %v4468_v47  ;;  %v2689_v6 = vunpack.c.l.b16 %v4493_v42 }
  0xdb   : > { %2488 = vrot.lane.b32.xlu1 %v4342_v20, %s3539_s20  ;;  %v4477_v0 = vpack.c.b16 %v2601_v23, %v5714_v21  ;;  %v1867_v10 = vrot.slane %v1865_v3, 4  ;;  %v1874_v21 = vshll.u32 %v4470_v39, 16  ;;  %v1961_v43 = vshrl.u32 %v4491_v1, 16 }
  0xdd   : > { %v1876_v3 = vrot.slane %v1874_v21, 5 }
  0xe0   : > { %2492 = vrot.lane.b32.xlu0 %v4352_v48, %s3539_s20  ;;  %v1342_v48 = vsel %vm3614_vm5, %v5712_v32, %v1341_v31  ;;  %v2544_v31 = vpack.c.b16 %v4466_v14, %v5717_v46  ;;  %v1878_v14 = vshrl.u32 %v4470_v39, 16  ;;  %v1870_v46 = vrot.slane %v1868_v17, 5 }
  0xe1   : > { %v4483_v28 = vunpack.c.l.b16 %v1342_v48  ;;  %v2688_v48 = vunpack.c.l.b16 %v4491_v1  ;;  %v1963_v17 = vrot.slane %v1961_v43, 4 }
  0xe2   : > { %2496 = vrot.lane.b32.xlu2 %v4360_v41, %s3539_s20  ;;  %v1880_v56 = vrot.slane %v1878_v14, 4  ;;  %v1871_v11 = vor.u32 %v1870_v46, %v1867_v10  ;;  %v1980_v10 = vshll.u32 %v1662_v53, 16 }
  0xe3   : > { %2494 = vrot.lane.b32.xlu1 %v4357_v40, %s3539_s20  ;;  %v4520_v32 = vpack.c.b16 %v2689_v6, %v2688_v48 }
  0xe4   : > { %v2327_v60 = vpop.permute.xlu1 %2326  ;;  %v1872_v6 = vrot.slane %v1871_v11, 4  ;;  %v3463_v11 = vrot.slane %v4468_v47, 9 }
  0xe5   : > { %v4501_v23 = vsel %vm172_vm0, %v4326_v61, %v2327_v60  ;;  %v1884_v61 = vshll.u32 %v4495_v18, 16  ;;  %v4518_v60 = vpack.c.b16 %v2681_v50, %v2680_v13  ;;  %v1964_v13 = vshll.u32 %v4491_v1, 16 }
  0xe6   : > { %v1970_v50 = vshll.u32 %v4493_v42, 16 }
  0xe7   : > { %v2341_v27 = vpop.permute.xlu2 %2340  ;;  %v1886_v12 = vrot.slane %v1884_v61, 5  ;;  %v1966_v61 = vrot.slane %v1964_v13, 5 }
  0xe8   : > { %2498 = vrot.lane.b32.xlu0 %v4388_v37, %s3539_s20  ;;  %v4516_v54 = vsel %vm172_vm0, %v4388_v37, %v2341_v27  ;;  %v1881_v37 = vor.u32 %v1880_v56, %v1876_v3  ;;  %v1974_v27 = vshrl.u32 %v4493_v42, 16  ;;  %v1972_v30 = vrot.slane %v1970_v50, 5 }
  0xe9   : > { %v2331_v48 = vpop.permute.xlu0 %2330  ;;  %v1967_v43 = vor.u32 %v1966_v61, %v1963_v17  ;;  %v1982_v50 = vrot.slane %v1980_v10, 5  ;;  %v2190_v17 = vrot.slane %v4493_v42, 5  ;;  %v949_v42 = vld [vmem:[#allocation2 + $0x88] sm:$0x3] }
  0xea   : > { %2502 = vrot.lane.b32.xlu2 %v4406_v36, %s3539_s20  ;;  %v4532_v21 = vsel %vm172_vm0, %v4342_v20, %v2331_v48  ;;  %v1882_v14 = vrot.slane %v1881_v37, 4  ;;  %v1877_v36 = vsel %vm3614_vm5, %v1872_v6, %v1876_v3  ;;  %v1976_v56 = vrot.slane %v1974_v27, 4 }
  0xeb   : > { %2500 = vrot.lane.b32.xlu1 %v4390_v29, %s3539_s20  ;;  %v4538_v44 = vunpack.c.l.b16 %v1877_v36  ;;  %v5719_v20 = vpack.c.b16 %v4424_v52, %v4422_v9  ;;  %v2162_v3 = vrot.slane %v4470_v39, 5  ;;  %v1968_v48 = vrot.slane %v1967_v43, 4 }
  0xec   : > { %v1887_v46 = vsel %vm3614_vm5, %v1882_v14, %v1886_v12  ;;  %v1977_v13 = vor.u32 %v1976_v56, %v1972_v30  ;;  %v2165_v12 = vrot.slane %v4495_v18, 5  ;;  %v3467_v6 = vrot.slane %v4491_v1, 9 }
  0xed   : > { %v4545_v37 = vunpack.c.l.b16 %v1887_v46  ;;  %v2163_v27 = vsel %vm4043_vm8, %v3463_v11, %v2162_v3  ;;  %v2164_v14 = vrot.slane %v2162_v3, 4  ;;  %v5720_v9 = vpack.c.b16 %v4445_v4, %v4439_v2 }
  0xee   : > { %v1978_v47 = vrot.slane %v1977_v13, 4  ;;  %v1973_v39 = vsel %vm3614_vm5, %v1968_v48, %v1972_v30  ;;  %v2192_v1 = vrot.slane %v2190_v17, 4  ;;  %v2191_v4 = vsel %vm4043_vm8, %v3467_v6, %v2190_v17 }
  0xef   : > { %v2784_v52 = vpack.c.b16 %v4545_v37, %v4538_v44  ;;  %v2166_v61 = vsel %vm4043_vm8, %v2164_v14, %v2165_v12  ;;  %v2193_v36 = vrot.slane %v1662_v53, 5  ;;  %v4568_v56 = vunpack.c.l.b16 %v1973_v39 }
  0xf0   : > { %2552 = vrot.lane.b32.xlu0 %v5719_v20, %s3540_s21  ;;  %v1983_v10 = vsel %vm3614_vm5, %v1978_v47, %v1982_v50  ;;  %v2840_v43 = vunpack.c.l.b16 %v2163_v27  ;;  %v2841_v30 = vunpack.c.l.b16 %v2166_v61  ;;  %v997_v13 = vpack.c.bf16 %v949_v42, %v949_v42  ;;  %v1588_v61 = vld [vmem:[#allocation2 + $0x90] sm:$0xff] }
  0xf1   : > { %v4570_v46 = vunpack.c.l.b16 %v1983_v10  ;;  %v2194_v20 = vsel %vm4043_vm8, %v2192_v1, %v2193_v36  ;;  %v1128_v50 = vshrl.u32 %v4293_v38, 16  ;;  %v2848_v3 = vunpack.c.l.b16 %v2191_v4 }
  0xf2   : > { %2568 = vrot.lane.b32.xlu2 %v2544_v31, %s3540_s21  ;;  %v2849_v48 = vunpack.c.l.b16 %v2194_v20  ;;  %v1131_v12 = vshll.u32 %v4293_v38, 16  ;;  %v5721_v6 = vpack.c.b16 %v4483_v28, %v5718_v58  ;;  %v1137_v17 = vshll.u32 %v4295_v25, 16 }
  0xf3   : > { %2554 = vrot.lane.b32.xlu1 %v5720_v9, %s3540_s21  ;;  %v1141_v47 = vshrl.u32 %v4295_v25, 16  ;;  %v1147_v27 = vshll.u32 %v997_v13, 16  ;;  %v2788_v14 = vpack.c.b16 %v4570_v46, %v4568_v56  ;;  %v3439_v9 = vrot.slane %v4252_v62, 9 }
  0xf4   : > { %v2333_v18 = vpop.permute.xlu1 %2332  ;;  %v2395_v31 = vpop.permute.xlu2 %2394  ;;  %v1465_v39 = vrot.slane %v4260_v49, 5  ;;  %v4594_v1 = vpack.c.b16 %v2841_v30, %v2840_v43  ;;  %v1139_v42 = vrot.slane %v1137_v17, 5  ;;  %v1468_v28 = vrot.slane %v4377_v5, 5  ;;  %v1589_v43 = vld [vmem:[#allocation2 + $0x98] sm:$0xff] }
  0xf5   : > { %v4574_v11 = vsel %vm2952_vm9, %v4395_v8, %v2395_v31  ;;  %v4581_v53 = vsel %vm172_vm0, %v4348_v7, %v2333_v18  ;;  %v1130_v8 = vrot.slane %v1128_v50, 4  ;;  %v1133_v7 = vrot.slane %v1131_v12, 5 }
  0xf6   : > { %v1143_v18 = vrot.slane %v1141_v47, 4  ;;  %v4601_v58 = vpack.c.b16 %v2849_v48, %v2848_v3  ;;  %v1466_v62 = vsel %vm4043_vm8, %v3439_v9, %v1465_v39  ;;  %v1467_v49 = vrot.slane %v1465_v39, 4 }
  0xf7   : > { %v1134_v10 = vor.u32 %v1133_v7, %v1130_v8  ;;  %v1149_v36 = vrot.slane %v1147_v27, 5  ;;  %v3443_v31 = vrot.slane %v4293_v38, 9  ;;  %v1493_v5 = vrot.slane %v4295_v25, 5  ;;  %v1578_v8 = vld [vmem:[#allocation2 + $0x40] sm:$0x3] }
  0xf8   : > { %2576 = vrot.lane.b32.xlu0 %v5721_v6, %s3540_s21  ;;  %v1144_v4 = vor.u32 %v1143_v18, %v1139_v42  ;;  %v2584_v20 = vunpack.c.l.b16 %v1466_v62  ;;  %v1496_v50 = vrot.slane %v997_v13, 5  ;;  %v4613_v6 = vpack.c.bf16 %v1588_v61, %v1588_v61  ;;  %v1590_v13 = vld [vmem:[#allocation2 + $0xa0] sm:$0x3] }
  0xf9   : > { %v1494_v17 = vsel %vm4043_vm8, %v3443_v31, %v1493_v5  ;;  %v1495_v47 = vrot.slane %v1493_v5, 4  ;;  %v4619_v27 = vpack.c.bf16 %v1589_v43, %v1589_v43 }
  0xfa   : > { %2656 = vrot.lane.b32.xlu2 %v4487_v26, %s3541_s22  ;;  %v1469_v26 = vsel %vm4043_vm8, %v1467_v49, %v1468_v28  ;;  %v1145_v48 = vrot.slane %v1144_v4, 4  ;;  %v2337_v38 = vpop.permute.xlu0 %2336  ;;  %v2672_v39 = vunpack.c.l.b16 %v4613_v6  ;;  %v1638_v49 = vpack.c.bf16 %v1590_v13, %v1590_v13 }
  0xfb   : > { %2648 = vrot.lane.b32.xlu1 %v4477_v0, %s3541_s22  ;;  %v1135_v0 = vrot.slane %v1134_v10, 4  ;;  %v2585_v12 = vunpack.c.l.b16 %v1469_v26  ;;  %v1497_v18 = vsel %vm4043_vm8, %v1495_v47, %v1496_v50  ;;  %v2673_v28 = vunpack.c.l.b16 %v4619_v27 }
  0xfc   : > { %v2401_v30 = vpop.permute.xlu2 %2400  ;;  %v1150_v7 = vsel %vm3614_vm5, %v1145_v48, %v1149_v36  ;;  %v1626_v10 = vpack.c.bf16 %v1578_v8, %v1578_v8  ;;  %v2593_v62 = vunpack.c.l.b16 %v1497_v18  ;;  %v1772_v31 = vshll.u32 %v4613_v6, 16 }
  0xfd   : > { %v4611_v3 = vsel %vm2952_vm9, %v4312_v59, %v2401_v30  ;;  %v1140_v25 = vsel %vm3614_vm5, %v1135_v0, %v1139_v42  ;;  %v4625_v59 = vsel %vm172_vm0, %v4357_v40, %v2337_v38  ;;  %v4632_v42 = vunpack.c.l.b16 %v1150_v7 }
  0xfe   : > { %v4629_v9 = vunpack.c.l.b16 %v1140_v25  ;;  %v1769_v40 = vshrl.u32 %v4613_v6, 16  ;;  %v4646_v4 = vpack.c.b16 %v2585_v12, %v2584_v20  ;;  %v1692_v36 = vshll.u32 %v1626_v10, 16 }
  0xff   : > { %v4649_v5 = vpack.c.b16 %v2673_v28, %v2672_v39  ;;  %v1778_v30 = vshll.u32 %v4619_v27, 16  ;;  %v1774_v44 = vrot.slane %v1772_v31, 5  ;;  %v1788_v37 = vshll.u32 %v1638_v49, 16  ;;  %v964_v28 = vld [vmem:[#allocation2 + $0x100] sm:$0x3] }
 0x100   : > { %2728 = vrot.lane.b32.xlu0 %v4518_v60, %s3542_s23  ;;  %v2592_v60 = vunpack.c.l.b16 %v1494_v17  ;;  %v2540_v61 = vpack.c.b16 %v4632_v42, %v4629_v9  ;;  %v1771_v43 = vrot.slane %v1769_v40, 4  ;;  %v1694_v50 = vrot.slane %v1692_v36, 5 }
 0x101   : > { %v1780_v12 = vrot.slane %v1778_v30, 5  ;;  %v1790_v17 = vrot.slane %v1788_v37, 5  ;;  %v2106_v47 = vrot.slane %v4272_v45, 5  ;;  %v2109_v13 = vrot.slane %v1626_v10, 5  ;;  %v976_v30 = vld [vmem:[#allocation2 + $0x160] sm:$0x3] }
 0x102   : > { %2808 = vrot.lane.b32.xlu2 %v2784_v52, %s3543_s24  ;;  %v3455_v52 = vrot.slane %v4266_v55, 9  ;;  %v2620_v48 = vpack.c.b16 %v2593_v62, %v2592_v60  ;;  %v1695_v38 = vsel %vm3614_vm5, %v4426_v33, %v1694_v50  ;;  %v1775_v25 = vor.u32 %v1774_v44, %v1771_v43 }
 0x103   : > { %2736 = vrot.lane.b32.xlu1 %v4520_v32, %s3542_s23  ;;  %v1782_v32 = vshrl.u32 %v4619_v27, 16  ;;  %v4666_v55 = vunpack.c.l.b16 %v1695_v38  ;;  %v3459_v7 = vrot.slane %v4613_v6, 9  ;;  %v4673_v33 = vrot.slane %v2106_v47, 4 }
 0x104   : > { %v2407_v26 = vpop.permute.xlu2 %2406  ;;  %v1776_v9 = vrot.slane %v1775_v25, 4  ;;  %v4671_v39 = vsel %vm4043_vm8, %v3455_v52, %v2106_v47  ;;  %v2134_v45 = vrot.slane %v4619_v27, 5  ;;  %v2137_v18 = vrot.slane %v1638_v49, 5 }
 0x105   : > { %v2339_v0 = vpop.permute.xlu1 %2338  ;;  %v4656_v20 = vsel %vm2952_vm9, %v4501_v23, %v2407_v26  ;;  %v1784_v8 = vrot.slane %v1782_v32, 4  ;;  %v2776_v6 = vpack.c.b16 %v4666_v55, %v4439_v2  ;;  %v1012_v43 = vpack.c.bf16 %v964_v28, %v964_v28 }
 0x106   : > { %v2945_v42 = vsel %vm172_vm0, %v4360_v41, %v2339_v0  ;;  %v1781_v27 = vsel %vm3614_vm5, %v1776_v9, %v1780_v12  ;;  %v2110_v41 = vsel %vm4043_vm8, %v4673_v33, %v2109_v13  ;;  %v2136_v10 = vrot.slane %v2134_v45, 4  ;;  %v1603_v9 = vld [vmem:[#allocation2 + $0x108] sm:$0xff] }
 0x107   : > { %v1785_v23 = vor.u32 %v1784_v8, %v1780_v12  ;;  %v2752_v62 = vunpack.c.l.b16 %v1781_v27  ;;  %v2825_v49 = vunpack.c.l.b16 %v2110_v41  ;;  %v1267_v37 = vshll.u32 %v1012_v43, 16 }
 0x108   : > { %2816 = vrot.lane.b32.xlu0 %v2788_v14, %s3543_s24  ;;  %v2824_v14 = vunpack.c.l.b16 %v4671_v39  ;;  %v2138_v31 = vsel %vm4043_vm8, %v2136_v10, %v2137_v18  ;;  %v1024_v52 = vpack.c.bf16 %v976_v30, %v976_v30 }
 0x109   : > { %v1786_v46 = vrot.slane %v1785_v23, 4  ;;  %v2833_v50 = vunpack.c.l.b16 %v2138_v31  ;;  %v1269_v8 = vrot.slane %v1267_v37, 5  ;;  %v1531_v23 = vrot.slane %v1012_v43, 5  ;;  %v5727_v31 = vld [vmem:[#allocation27_spill] sm:$0xff] }
 0x10a   : > { %v2343_v56 = vpop.permute.xlu0 %2342  ;;  %2896 = vrot.lane.b32.xlu2 %v4601_v58, %s3544_s25  ;;  %v4708_v26 = vpack.c.b16 %v2825_v49, %v2824_v14 }
 0x10b   : > { %2888 = vrot.lane.b32.xlu1 %v4594_v1, %s3544_s25  ;;  %v1791_v60 = vsel %vm3614_vm5, %v1786_v46, %v1790_v17  ;;  %v2135_v1 = vsel %vm4043_vm8, %v3459_v7, %v2134_v45  ;;  %v4696_v58 = vsel %vm172_vm0, %v4390_v29, %v2343_v56  ;;  %v1559_v7 = vrot.slane %v1024_v52, 5  ;;  %v5724_v46 = vld [vmem:[#allocation42_spill] sm:$0xff] }
 0x10c   : > { %v2413_v40 = vpop.permute.xlu2 %2412  ;;  %v2753_v36 = vunpack.c.l.b16 %v1791_v60  ;;  %v2832_v29 = vunpack.c.l.b16 %v2135_v1  ;;  %v1532_v18 = vsel %vm4043_vm8, %v5724_v46, %v1531_v23  ;;  %v1616_v60 = vld [vmem:[#allocation2 + $0x170] sm:$0xff]  ;;  %v5725_v1 = vld [vmem:[#allocation18_spill] sm:$0xff]  ;;  %vm3150_vm0 = vcmask 261120  }
 0x10d   : > { %v2393_v2 = vpop.permute.xlu1 %2392  ;;  %v4704_v0 = vsel %vm2952_vm9, %v4581_v53, %v2413_v40  ;;  %v1363_v53 = vshll.u32 %v1024_v52, 16  ;;  %v2603_v41 = vunpack.c.l.b16 %v1532_v18  ;;  %v5726_v40 = vld [vmem:[#allocation16_spill] sm:$0xff] }
 0x10e   : > { %v2954_v32 = vsel %vm2952_vm9, %v4355_v34, %v2393_v2  ;;  %v2780_v44 = vpack.c.b16 %v2753_v36, %v2752_v62  ;;  %v2860_v47 = vpack.c.b16 %v2833_v50, %v2832_v29  ;;  %v1560_v36 = vsel %vm4043_vm8, %v5726_v40, %v1559_v7 }
 0x10f   : > { %v1365_v55 = vrot.slane %v1363_v53, 5  ;;  %v2611_v30 = vunpack.c.l.b16 %v1560_v36 }
 0x110   : > { %2560 = vrot.lane.b32.xlu0 %v2540_v61, %s3540_s21 }
 0x112   : > { %v2397_v12 = vpop.permute.xlu0 %2396  ;;  %2640 = vrot.lane.b32.xlu2 %v2620_v48, %s3541_s22 }
 0x113   : > { %v4713_v34 = vsel %vm2952_vm9, %v4386_v24, %v2397_v12  ;;  %2632 = vrot.lane.b32.xlu1 %v4646_v4, %s3541_s22  ;;  %v5722_v24 = vld [vmem:[#allocation17_spill] sm:$0xff] }
 0x114   : > { %v2419_v25 = vpop.permute.xlu2 %2418  ;;  %v1270_v4 = vsel %vm3614_vm5, %v5722_v24, %v1269_v8  ;;  %v5728_v12 = vld [vmem:[#allocation41_spill] sm:$0xff] }
 0x115   : > { %v2399_v38 = vpop.permute.xlu1 %2398  ;;  %v4723_v17 = vsel %vm2952_vm9, %v2945_v42, %v2419_v25  ;;  %v4730_v48 = vunpack.c.l.b16 %v1270_v4  ;;  %v5729_v8 = vunpack.c.l.b16 %v5728_v12 }
 0x116   : > { %v4720_v61 = vsel %vm2952_vm9, %v4434_v63, %v2399_v38  ;;  %v1604_v63 = vld [vmem:[#allocation2 + $0x110] sm:$0xff]  ;;  %v5730_v38 = vld [vmem:[#allocation25_spill] sm:$0xff] }
 0x117   : > { %v4749_v10 = vpack.c.bf16 %v1604_v63, %v1604_v63  ;;  %v2545_v2 = vpack.c.b16 %v4730_v48, %v5725_v1  ;;  %v2625_v53 = vpack.c.b16 %v2603_v41, %v5729_v8  ;;  %v5731_v25 = vunpack.c.l.b16 %v5730_v38 }
 0x118   : > { %2712 = vrot.lane.b32.xlu0 %v4305_v19, %s3542_s23  ;;  %v5723_v19 = vld [vmem:[#allocation26_spill] sm:$0xff] }
 0x119   : > { %v1366_v42 = vsel %vm3614_vm5, %v5723_v19, %v1365_v55  ;;  %v2683_v50 = vunpack.c.l.b16 %v4749_v10  ;;  %v4779_v55 = vpack.c.b16 %v2611_v30, %v5731_v25  ;;  %v1898_v4 = vshll.u32 %v4749_v10, 16 }
 0x11a   : > { %v2403_v13 = vpop.permute.xlu0 %2402  ;;  %2792 = vrot.lane.b32.xlu2 %v2776_v6, %s3543_s24  ;;  %v4742_v56 = vunpack.c.l.b16 %v1366_v42  ;;  %v1605_v6 = vld [vmem:[#allocation2 + $0x118] sm:$0x3] }
 0x11b   : > { %v4734_v45 = vsel %vm2952_vm9, %v4333_v57, %v2403_v13  ;;  %2720 = vrot.lane.b32.xlu1 %v4649_v5, %s3542_s23  ;;  %v4747_v57 = vpack.c.bf16 %v1603_v9, %v1603_v9  ;;  %v1615_v5 = vld [vmem:[#allocation2 + $0x168] sm:$0xff]  ;;  %v4772_v37 = vpack.c.bf16 %v1605_v6, %v1605_v6  ;;  %v1902_v9 = vshrl.u32 %v4749_v10, 16 }
 0x11c   : > { %v2473_v27 = vpop.permute.xlu2 %2472  ;;  %v2549_v43 = vpack.c.b16 %v4742_v56, %v5727_v31  ;;  %v1900_v42 = vrot.slane %v1898_v4, 5 }
 0x11d   : > { %v2405_v28 = vpop.permute.xlu1 %2404  ;;  %v4756_v49 = vsel %vm2985_vm10, %v2954_v32, %v2473_v27  ;;  %v2682_v29 = vunpack.c.l.b16 %v4747_v57  ;;  %v4770_v32 = vpack.c.bf16 %v1616_v60, %v1616_v60  ;;  %v1889_v52 = vshrl.u32 %v4747_v57, 16 }
 0x11e   : > { %v4753_v62 = vsel %vm2952_vm9, %v4451_v35, %v2405_v28  ;;  %v4768_v35 = vpack.c.bf16 %v1615_v5, %v1615_v5  ;;  %v1892_v24 = vshll.u32 %v4747_v57, 16  ;;  %v1908_v56 = vshll.u32 %v4772_v37, 16 }
 0x11f   : > { %v4783_v23 = vpack.c.b16 %v2683_v50, %v2682_v29  ;;  %v1891_v7 = vrot.slane %v1889_v52, 4  ;;  %v2691_v46 = vunpack.c.l.b16 %v4770_v32  ;;  %v1904_v18 = vrot.slane %v1902_v9, 4 }
 0x120   : > { %2800 = vrot.lane.b32.xlu0 %v2780_v44, %s3543_s24  ;;  %v1617_v44 = vld [vmem:[#allocation2 + $0x178] sm:$0x3]  ;;  %v2690_v13 = vunpack.c.l.b16 %v4768_v35  ;;  %v1894_v19 = vrot.slane %v1892_v24, 5  ;;  %v1985_v27 = vshrl.u32 %v4768_v35, 16  ;;  %v1988_v6 = vshll.u32 %v4768_v35, 16 }
 0x121   : > { %v1665_v28 = vpack.c.bf16 %v1617_v44, %v1617_v44  ;;  %v1905_v40 = vor.u32 %v1904_v18, %v1900_v42  ;;  %v1998_v50 = vshrl.u32 %v4770_v32, 16  ;;  %v3464_v8 = vrot.slane %v4747_v57, 9 }
 0x122   : > { %v2409_v48 = vpop.permute.xlu0 %2408  ;;  %2880 = vrot.lane.b32.xlu2 %v2860_v47, %s3544_s25  ;;  %v1895_v60 = vor.u32 %v1894_v19, %v1891_v7  ;;  %v1987_v36 = vrot.slane %v1985_v27, 4  ;;  %v1990_v30 = vrot.slane %v1988_v6, 5  ;;  %v2709_v38 = vpack.c.b16 %v2691_v46, %v2690_v13 }
 0x123   : > { %v4789_v63 = vsel %vm2952_vm9, %v4372_v16, %v2409_v48  ;;  %2872 = vrot.lane.b32.xlu1 %v4708_v26, %s3544_s25  ;;  %v1910_v16 = vrot.slane %v1908_v56, 5  ;;  %v1994_v26 = vshll.u32 %v4770_v32, 16  ;;  %v1906_v52 = vrot.slane %v1905_v40, 4 }
 0x124   : > { %v2479_v5 = vpop.permute.xlu2 %2478  ;;  %v1896_v31 = vrot.slane %v1895_v60, 4  ;;  %v2004_v12 = vshll.u32 %v1665_v28, 16  ;;  %v1991_v25 = vor.u32 %v1990_v30, %v1987_v36  ;;  %v2000_v24 = vrot.slane %v1998_v50, 4 }
 0x125   : > { %v2411_v41 = vpop.permute.xlu1 %2410  ;;  %v4805_v1 = vsel %vm2985_vm10, %v4720_v61, %v2479_v5  ;;  %v1996_v29 = vrot.slane %v1994_v26, 5  ;;  %v1911_v44 = vsel %vm3614_vm5, %v1906_v52, %v1910_v16  ;;  %v2172_v7 = vrot.slane %v4772_v37, 5 }
 0x126   : > { %v4801_v47 = vsel %vm2952_vm9, %v4532_v21, %v2411_v41  ;;  %v2169_v21 = vrot.slane %v4749_v10, 5  ;;  %v1901_v61 = vsel %vm3614_vm5, %v1896_v31, %v1900_v42  ;;  %v1992_v10 = vrot.slane %v1991_v25, 4  ;;  %v5732_v25 = vld [vmem:[#allocation49_spill] sm:$0xff] }
 0x127   : > { %v2762_v48 = vunpack.c.l.b16 %v1901_v61  ;;  %v2001_v13 = vor.u32 %v2000_v24, %v1996_v29  ;;  %v2006_v9 = vrot.slane %v2004_v12, 5  ;;  %v2763_v19 = vunpack.c.l.b16 %v1911_v44  ;;  %v1580_v44 = vld [vmem:[#allocation2 + $0x50] sm:$0xff] }
 0x128   : > { %2570 = vrot.lane.b32.xlu0 %v2545_v2, %s3540_s21  ;;  %v2170_v2 = vsel %vm4043_vm8, %v3464_v8, %v2169_v21  ;;  %v2171_v42 = vrot.slane %v2169_v21, 4  ;;  %v3468_v56 = vrot.slane %v4768_v35, 9  ;;  %v2197_v46 = vrot.slane %v4770_v32, 5 }
 0x129   : > { %v1997_v37 = vsel %vm3614_vm5, %v1992_v10, %v1996_v29  ;;  %v2842_v41 = vunpack.c.l.b16 %v2170_v2  ;;  %v2200_v5 = vrot.slane %v1665_v28, 5  ;;  %v1475_v24 = vrot.slane %v5732_v25, 5  ;;  %v1591_v10 = vld [vmem:[#allocation2 + $0xa8] sm:$0xff] }
 0x12a   : > { %v2415_v4 = vpop.permute.xlu0 %2414  ;;  %2650 = vrot.lane.b32.xlu2 %v2625_v53, %s3541_s22  ;;  %v2770_v16 = vunpack.c.l.b16 %v1997_v37  ;;  %v2173_v35 = vsel %vm4043_vm8, %v2171_v42, %v2172_v7  ;;  %v2198_v26 = vsel %vm4043_vm8, %v3468_v56, %v2197_v46  ;;  %v2199_v28 = vrot.slane %v2197_v46, 4  ;;  %v1581_v42 = vld [vmem:[#allocation2 + $0x58] sm:$0x3] }
 0x12b   : > { %v4820_v57 = vsel %vm2952_vm9, %v4430_v51, %v2415_v4  ;;  %2578 = vrot.lane.b32.xlu1 %v2549_v43, %s3540_s21  ;;  %v2002_v51 = vrot.slane %v2001_v13, 4  ;;  %v952_v43 = vld [vmem:[#allocation2 + $0xa0] sm:$0x3]  ;;  %v2843_v6 = vunpack.c.l.b16 %v2173_v35  ;;  %v2850_v31 = vunpack.c.l.b16 %v2198_v26  ;;  %v1579_v4 = vld [vmem:[#allocation2 + $0x48] sm:$0xff] }
 0x12c   : > { %v2485_v27 = vpop.permute.xlu2 %2484  ;;  %v1000_v36 = vpack.c.bf16 %v952_v43, %v952_v43  ;;  %v4863_v2 = vpack.c.bf16 %v1580_v44, %v1580_v44  ;;  %v1476_v7 = vsel %vm4043_vm8, %v4673_v33, %v1475_v24  ;;  %v4889_v26 = vpack.c.bf16 %v1581_v42, %v1581_v42 }
 0x12d   : > { %v2417_v18 = vpop.permute.xlu1 %2416  ;;  %v4832_v60 = vsel %vm2985_vm10, %v4753_v62, %v2485_v27  ;;  %v2007_v32 = vsel %vm3614_vm5, %v2002_v51, %v2006_v9  ;;  %v2201_v62 = vsel %vm4043_vm8, %v2199_v28, %v2200_v5  ;;  %v2865_v50 = vpack.c.b16 %v2843_v6, %v2842_v41  ;;  %v5733_v9 = vld [vmem:[#allocation5_spill] sm:$0xff]  ;;  %v1593_v28 = vld [vmem:[#allocation2 + $0xb8] sm:$0x3] }
 0x12e   : > { %v2978_v53 = vsel %vm2952_vm9, %v4625_v59, %v2417_v18  ;;  %v2785_v59 = vpack.c.b16 %v2763_v19, %v2762_v48  ;;  %v2771_v40 = vunpack.c.l.b16 %v2007_v32  ;;  %v2851_v12 = vunpack.c.l.b16 %v2201_v62  ;;  %v5734_v18 = vld [vmem:[#allocation35_spill] sm:$0xff] }
 0x12f   : > { %v2587_v19 = vunpack.c.l.b16 %v1476_v7  ;;  %v2667_v41 = vunpack.c.l.b16 %v4863_v2  ;;  %v4882_v5 = vpack.c.bf16 %v1591_v10, %v1591_v10 }
 0x130   : > { %2658 = vrot.lane.b32.xlu0 %v4779_v55, %s3541_s22  ;;  %v2789_v29 = vpack.c.b16 %v2771_v40, %v2770_v16  ;;  %v1171_v55 = vshll.u32 %v1000_v36, 16  ;;  %v2869_v37 = vpack.c.b16 %v2851_v12, %v2850_v31  ;;  %v5735_v16 = vld [vmem:[#allocation6_spill] sm:$0xff]  ;;  %v4908_v12 = vpack.c.bf16 %v1593_v28, %v1593_v28 }
 0x131   : > { %v2617_v32 = vpack.c.b16 %v2587_v19, %v2824_v14  ;;  %v1793_v25 = vshrl.u32 %v4882_v5, 16  ;;  %v1796_v7 = vshll.u32 %v4882_v5, 16 }
 0x132   : > { %v2421_v30 = vpop.permute.xlu0 %2420  ;;  %2738 = vrot.lane.b32.xlu2 %v2709_v38, %s3542_s23  ;;  %v1173_v61 = vrot.slane %v1171_v55, 5  ;;  %v4861_v38 = vpack.c.bf16 %v1579_v4, %v1579_v4  ;;  %v1710_v55 = vshrl.u32 %v4863_v2, 16 }
 0x133   : > { %v4846_v52 = vsel %vm2952_vm9, %v4516_v54, %v2421_v30  ;;  %2730 = vrot.lane.b32.xlu1 %v4783_v23, %s3542_s23  ;;  %v1503_v23 = vrot.slane %v1000_v36, 5  ;;  %v5736_v36 = vld [vmem:[#allocation34_spill] sm:$0xff] }
 0x134   : > { %v2491_v21 = vpop.permute.xlu2 %2490  ;;  %v2666_v27 = vunpack.c.l.b16 %v4861_v38  ;;  %v5737_v62 = vunpack.c.l.b16 %v5736_v36  ;;  %v1697_v14 = vshrl.u32 %v4861_v38, 16  ;;  %v1712_v44 = vrot.slane %v1710_v55, 4 }
 0x135   : > { %v2423_v8 = vpop.permute.xlu1 %2422  ;;  %v4858_v54 = vsel %vm2985_vm10, %v4801_v47, %v2491_v21  ;;  %v1592_v47 = vld [vmem:[#allocation2 + $0xb0] sm:$0xff]  ;;  %v1504_v33 = vsel %vm4043_vm8, %v5734_v18, %v1503_v23 }
 0x136   : > { %v4854_v48 = vsel %vm2952_vm9, %v4696_v58, %v2423_v8  ;;  %v1174_v58 = vsel %vm3614_vm5, %v5733_v9, %v1173_v61  ;;  %v2595_v51 = vunpack.c.l.b16 %v1504_v33  ;;  %v4887_v6 = vpack.c.bf16 %v1592_v47, %v1592_v47 }
 0x137   : > { %v2515_v46 = vunpack.c.l.b16 %v1174_v58  ;;  %v2697_v30 = vpack.c.b16 %v2667_v41, %v2666_v27  ;;  %v1699_v21 = vrot.slane %v1697_v14, 4  ;;  %v1795_v9 = vrot.slane %v1793_v25, 4 }
 0x138   : > { %2810 = vrot.lane.b32.xlu0 %v2785_v59, %s3543_s24  ;;  %v2621_v31 = vpack.c.b16 %v2595_v51, %v5737_v62  ;;  %v2675_v39 = vunpack.c.l.b16 %v4887_v6  ;;  %v1802_v58 = vshll.u32 %v4887_v6, 16  ;;  %v1798_v47 = vrot.slane %v1796_v7, 5 }
 0x139   : > { %v2541_v35 = vpack.c.b16 %v2515_v46, %v5735_v16  ;;  %v1806_v42 = vshrl.u32 %v4887_v6, 16  ;;  %v1812_v46 = vshll.u32 %v4908_v12, 16  ;;  %v2113_v51 = vrot.slane %v4863_v2, 5 }
 0x13a   : > { %v2475_v13 = vpop.permute.xlu0 %2474  ;;  %2890 = vrot.lane.b32.xlu2 %v2865_v50, %s3544_s25  ;;  %v1700_v50 = vshll.u32 %v4861_v38, 16  ;;  %v1799_v16 = vor.u32 %v1798_v47, %v1795_v9 }
 0x13b   : > { %v4873_v56 = vsel %vm2985_vm10, %v4574_v11, %v2475_v13  ;;  %2818 = vrot.lane.b32.xlu1 %v2789_v29, %s3543_s24  ;;  %v2674_v29 = vunpack.c.l.b16 %v4882_v5  ;;  %v1814_v28 = vrot.slane %v1812_v46, 5  ;;  %v2115_v62 = vrot.slane %v2113_v51, 4 }
 0x13c   : > { %v2497_v11 = vpop.permute.xlu2 %2496  ;;  %v1702_v61 = vrot.slane %v1700_v50, 5  ;;  %v1800_v36 = vrot.slane %v1799_v16, 4  ;;  %v967_v50 = vld [vmem:[#allocation2 + $0x118] sm:$0x3] }
 0x13d   : > { %v2477_v43 = vpop.permute.xlu1 %2476  ;;  %v4896_v40 = vsel %vm2985_vm10, %v2978_v53, %v2497_v11  ;;  %v1716_v53 = vshll.u32 %v4889_v26, 16  ;;  %v2701_v8 = vpack.c.b16 %v2675_v39, %v2674_v29  ;;  %v2116_v39 = vrot.slane %v4889_v26, 5 }
 0x13e   : > { %v4893_v59 = vsel %vm2985_vm10, %v4713_v34, %v2477_v43  ;;  %v1706_v34 = vshll.u32 %v4863_v2, 16  ;;  %v1703_v13 = vor.u32 %v1702_v61, %v1699_v21  ;;  %v2144_v21 = vrot.slane %v4908_v12, 5 }
 0x13f   : > { %v1718_v23 = vrot.slane %v1716_v53, 5  ;;  %v3460_v53 = vrot.slane %v4882_v5, 9 }
 0x140   : > { %2898 = vrot.lane.b32.xlu0 %v2869_v37, %s3544_s25  ;;  %v1708_v4 = vrot.slane %v1706_v34, 5  ;;  %v1704_v27 = vrot.slane %v1703_v13, 4  ;;  %v3456_v37 = vrot.slane %v4861_v38, 9 }
 0x142   : > { %v2481_v24 = vpop.permute.xlu0 %2480  ;;  %2634 = vrot.lane.b32.xlu2 %v2617_v32, %s3541_s22  ;;  %v1713_v19 = vor.u32 %v1712_v44, %v1708_v4  ;;  %v1808_v32 = vrot.slane %v1806_v42, 4  ;;  %v2114_v38 = vsel %vm4043_vm8, %v3456_v37, %v2113_v51  ;;  %v1015_v44 = vpack.c.bf16 %v967_v50, %v967_v50  ;;  %v5740_v50 = vld [vmem:[#allocation14_spill] sm:$0xff] }
 0x143   : > { %v4914_v10 = vsel %vm2985_vm10, %v4611_v3, %v2481_v24  ;;  %2562 = vrot.lane.b32.xlu1 %v2541_v35, %s3540_s21  ;;  %v1804_v3 = vrot.slane %v1802_v58, 5  ;;  %v1709_v35 = vsel %vm3614_vm5, %v1704_v27, %v1708_v4  ;;  %v2826_v14 = vunpack.c.l.b16 %v2114_v38  ;;  %v979_v58 = vld [vmem:[#allocation2 + $0x178] sm:$0x3] }
 0x144   : > { %v2503_v33 = vpop.permute.xlu2 %2502  ;;  %v1714_v11 = vrot.slane %v1713_v19, 4  ;;  %v2746_v2 = vunpack.c.l.b16 %v1709_v35  ;;  %v2117_v4 = vsel %vm4043_vm8, %v2115_v62, %v2116_v39  ;;  %v1027_v27 = vpack.c.bf16 %v979_v58, %v979_v58  ;;  %v5739_v62 = vld [vmem:[#allocation43_spill] sm:$0xff]  ;;  %v1618_v39 = vld [vmem:[#allocation2 + $0x180] sm:$0xff] }
 0x145   : > { %v2483_v18 = vpop.permute.xlu1 %2482  ;;  %v4929_v43 = vsel %vm2985_vm10, %v4854_v48, %v2503_v33  ;;  %v1809_v29 = vor.u32 %v1808_v32, %v1804_v3  ;;  %v1805_v55 = vsel %vm3614_vm5, %v1800_v36, %v1804_v3  ;;  %v2827_v7 = vunpack.c.l.b16 %v2117_v4  ;;  %v5745_v58 = vld [vmem:[#allocation31_spill] sm:$0xff] }
 0x146   : > { %v4925_v41 = vsel %vm2985_vm10, %v4734_v45, %v2483_v18  ;;  %v1719_v45 = vsel %vm3614_vm5, %v1714_v11, %v1718_v23  ;;  %v2754_v24 = vunpack.c.l.b16 %v1805_v55  ;;  %v1291_v33 = vshll.u32 %v1015_v44, 16 }
 0x147   : > { %v2747_v48 = vunpack.c.l.b16 %v1719_v45  ;;  %v1810_v25 = vrot.slane %v1809_v29, 4  ;;  %v2857_v47 = vpack.c.b16 %v2827_v7, %v2826_v14  ;;  %v1387_v11 = vshll.u32 %v1027_v27, 16 }
 0x148   : > { %2642 = vrot.lane.b32.xlu0 %v2621_v31, %s3541_s22  ;;  %v2141_v31 = vrot.slane %v4887_v6, 5  ;;  %v1293_v37 = vrot.slane %v1291_v33, 5  ;;  %v1538_v38 = vrot.slane %v1015_v44, 5  ;;  %v1566_v29 = vrot.slane %v1027_v27, 5  ;;  %v5742_v44 = vld [vmem:[#allocation44_spill] sm:$0xff]  ;;  %v5746_v27 = vld [vmem:[#allocation19_spill] sm:$0xff] }
 0x149   : > { %v2777_v26 = vpack.c.b16 %v2747_v48, %v2746_v2  ;;  %v1389_v32 = vrot.slane %v1387_v11, 5  ;;  %v1606_v2 = vld [vmem:[#allocation2 + $0x120] sm:$0xff]  ;;  %v4996_v4 = vpack.c.bf16 %v1618_v39, %v1618_v39  ;;  %v1620_v33 = vld [vmem:[#allocation2 + $0x190] sm:$0x3] }
 0x14a   : > { %v2487_v34 = vpop.permute.xlu0 %2486  ;;  %2722 = vrot.lane.b32.xlu2 %v2701_v8, %s3542_s23  ;;  %v2142_v5 = vsel %vm4043_vm8, %v3460_v53, %v2141_v31  ;;  %v2143_v6 = vrot.slane %v2141_v31, 4  ;;  %v1539_v48 = vsel %vm4043_vm8, %v5739_v62, %v1538_v38  ;;  %v4988_v53 = vpack.c.bf16 %v1606_v2, %v1606_v2  ;;  %v1619_v31 = vld [vmem:[#allocation2 + $0x188] sm:$0xff] }
 0x14b   : > { %v4946_v61 = vsel %vm2985_vm10, %v4656_v20, %v2487_v34  ;;  %2714 = vrot.lane.b32.xlu1 %v2697_v30, %s3542_s23  ;;  %v1815_v20 = vsel %vm3614_vm5, %v1810_v25, %v1814_v28  ;;  %v2834_v30 = vunpack.c.l.b16 %v2142_v5  ;;  %v5738_v28 = vld [vmem:[#allocation13_spill] sm:$0xff]  ;;  %v2605_v55 = vunpack.c.l.b16 %v1539_v48  ;;  %v1608_v5 = vld [vmem:[#allocation2 + $0x130] sm:$0x3] }
 0x14c   : > { %v2569_v23 = vpop.permute.xlu2 %2568  ;;  %v2755_v13 = vunpack.c.l.b16 %v1815_v20  ;;  %v2145_v9 = vsel %vm4043_vm8, %v2143_v6, %v2144_v21  ;;  %v5741_v21 = vld [vmem:[#allocation30_spill] sm:$0xff]  ;;  %v5744_v20 = vld [vmem:[#allocation20_spill] sm:$0xff] }
 0x14d   : > { %v2489_v12 = vpop.permute.xlu1 %2488  ;;  %v2835_v42 = vunpack.c.l.b16 %v2145_v9  ;;  %v1567_v7 = vsel %vm4043_vm8, %v5744_v20, %v1566_v29  ;;  %v5009_v9 = vpack.c.bf16 %v1619_v31, %v1619_v31  ;;  %v5031_v29 = vpack.c.bf16 %v1620_v33, %v1620_v33 }
 0x14e   : > { %v3003_v8 = vsel %vm2985_vm10, %v4789_v63, %v2489_v12  ;;  %v2781_v46 = vpack.c.b16 %v2755_v13, %v2754_v24  ;;  %v5743_v12 = vunpack.c.l.b16 %v5742_v44 }
 0x14f   : > { %v4961_v19 = vsel %vm3018_vm11, %v3003_v8, %v2569_v23  ;;  %v2861_v18 = vpack.c.b16 %v2835_v42, %v2834_v30  ;;  %v2613_v30 = vunpack.c.l.b16 %v1567_v7  ;;  %v2684_v8 = vunpack.c.l.b16 %v4988_v53 }
 0x150   : > { %2794 = vrot.lane.b32.xlu0 %v2777_v26, %s3543_s24  ;;  %v1390_v26 = vsel %vm3614_vm5, %v5741_v21, %v1389_v32  ;;  %v2626_v23 = vpack.c.b16 %v2605_v55, %v5743_v12  ;;  %v2693_v11 = vunpack.c.l.b16 %v5009_v9  ;;  %v1916_v32 = vshll.u32 %v4988_v53, 16 }
 0x151   : > { %v2012_v21 = vshll.u32 %v4996_v4, 16  ;;  %v2028_v44 = vshll.u32 %v5031_v29, 16 }
 0x152   : > { %v2493_v3 = vpop.permute.xlu0 %2492  ;;  %2874 = vrot.lane.b32.xlu2 %v2857_v47, %s3544_s25  ;;  %v1918_v48 = vrot.slane %v1916_v32, 5 }
 0x153   : > { %v4966_v63 = vsel %vm2985_vm10, %v4704_v0, %v2493_v3  ;;  %2802 = vrot.lane.b32.xlu1 %v2781_v46, %s3543_s24  ;;  %v1294_v0 = vsel %vm3614_vm5, %v5738_v28, %v1293_v37  ;;  %v5016_v46 = vpack.c.bf16 %v1608_v5, %v1608_v5  ;;  %v5747_v3 = vunpack.c.l.b16 %v5746_v27 }
 0x154   : > { %v4974_v35 = vpop.permute.xlu2 %2656  ;;  %v2525_v45 = vunpack.c.l.b16 %v1294_v0 }
 0x155   : > { %v2495_v51 = vpop.permute.xlu1 %2494  ;;  %v2630_v37 = vpack.c.b16 %v2613_v30, %v5747_v3  ;;  %v1932_v2 = vshll.u32 %v5016_v46, 16  ;;  %v287_v30 = vld [vmem:[%s5569_s1 + $0x10] sm:$0x3] }
 0x156   : > { %v4972_v16 = vsel %vm2985_vm10, %v4820_v57, %v2495_v51  ;;  %v1607_v57 = vld [vmem:[#allocation2 + $0x128] sm:$0xff]  ;;  %v2546_v34 = vpack.c.b16 %v2525_v45, %v5740_v50  ;;  %v3195_v32 = vunpack.c.l.b16 %v287_v30 }
 0x157   : > { %v4994_v24 = vpack.c.bf16 %v1607_v57, %v1607_v57  ;;  %v1934_v50 = vrot.slane %v1932_v2, 5 }
 0x158   : > { %2882 = vrot.lane.b32.xlu0 %v2861_v18, %s3544_s25  ;;  %v1913_v18 = vshrl.u32 %v4988_v53, 16 }
 0x159   : > { %v2685_v13 = vunpack.c.l.b16 %v4994_v24  ;;  %v1922_v38 = vshll.u32 %v4994_v24, 16  ;;  %v1926_v45 = vshrl.u32 %v4994_v24, 16 }
 0x15a   : > { %v2499_v36 = vpop.permute.xlu0 %2498  ;;  %v1915_v0 = vrot.slane %v1913_v18, 4  ;;  %v2176_v18 = vrot.slane %v4994_v24, 5 }
 0x15b   : > { %v4985_v14 = vsel %vm2985_vm10, %v4723_v17, %v2499_v36  ;;  %2572 = vrot.lane.b32.xlu1 %v2546_v34, %s3540_s21  ;;  %v2533_v17 = vunpack.c.l.b16 %v1390_v26  ;;  %v2706_v51 = vpack.c.b16 %v2685_v13, %v2684_v8  ;;  %v1924_v57 = vrot.slane %v1922_v38, 5 }
 0x15c   : > { %v5012_v42 = vpop.permute.xlu2 %2808  ;;  %v1928_v39 = vrot.slane %v1926_v45, 4  ;;  %v2009_v34 = vshrl.u32 %v4996_v4, 16  ;;  %v1919_v31 = vor.u32 %v1918_v48, %v1915_v0  ;;  %v2018_v26 = vshll.u32 %v5009_v9, 16 }
 0x15d   : > { %v2501_v25 = vpop.permute.xlu1 %2500  ;;  %v2550_v47 = vpack.c.b16 %v2533_v17, %v5745_v58  ;;  %v2030_v13 = vrot.slane %v2028_v44, 5  ;;  %v3198_v45 = vpack.c.b16 %v3195_v32, %v3195_v32  ;;  %v5748_v32 = vld [vmem:[#allocation3_spill] sm:$0xff] }
 0x15e   : > { %v5000_v6 = vsel %vm2985_vm10, %v4846_v52, %v2501_v25  ;;  %v2692_v52 = vunpack.c.l.b16 %v4996_v4  ;;  %v1929_v5 = vor.u32 %v1928_v39, %v1924_v57  ;;  %v2011_v17 = vrot.slane %v2009_v34, 4  ;;  %v943_v39 = vld [vmem:[#allocation2 + $0x58] sm:$0x3] }
 0x15f   : > { %2580 = vrot.lane.b32.xlu2 %v2550_v47, %s3540_s21  ;;  %v1920_v12 = vrot.slane %v1919_v31, 4  ;;  %v2020_v20 = vrot.slane %v2018_v26, 5  ;;  %v3469_v26 = vrot.slane %v4996_v4, 9  ;;  %v991_v44 = vpack.c.bf16 %v943_v39, %v943_v39 }
 0x160   : > { %2652 = vrot.lane.b32.xlu0 %v2626_v23, %s3541_s22  ;;  %v2710_v62 = vpack.c.b16 %v2693_v11, %v2692_v52  ;;  %v2014_v23 = vrot.slane %v2012_v21, 5  ;;  %v1930_v8 = vrot.slane %v1929_v5, 4  ;;  %v2179_v11 = vrot.slane %v5016_v46, 5 }
 0x161   : > { %v1925_v58 = vsel %vm3614_vm5, %v1920_v12, %v1924_v57  ;;  %v3236_v21 = vsel %vm3234_vm13, %v3198_v45, 0  ;;  %v2204_v5 = vrot.slane %v5009_v9, 5 }
 0x162   : > { %v2553_v28 = vpop.permute.xlu0 %2552  ;;  %v2015_v47 = vor.u32 %v2014_v23, %v2011_v17  ;;  %v1935_v3 = vsel %vm3614_vm5, %v1930_v8, %v1934_v50  ;;  %3503 = vmatpush.bf16.msra.mxu3 %v3236_v21  ;;  %v2207_v17 = vrot.slane %v5031_v29, 5  ;;  %3502 = vmatpush.bf16.msra.mxu2 %v3236_v21 }
 0x163   : > { %v5029_v36 = vsel %vm3018_vm11, %v4756_v49, %v2553_v28  ;;  %2660 = vrot.lane.b32.xlu1 %v2630_v37, %s3541_s22  ;;  %v2022_v49 = vshrl.u32 %v5009_v9, 16  ;;  %v2764_v37 = vunpack.c.l.b16 %v1925_v58  ;;  %v2765_v28 = vunpack.c.l.b16 %v1935_v3  ;;  %3501 = vmatpush.bf16.msra.mxu1 %v3236_v21  ;;  %v955_v9 = vld [vmem:[#allocation2 + $0xb8] sm:$0x3]  ;;  %v3499_v58 = vld [vmem:[%s5569_s1] sm:$0xff] }
 0x164   : > { %v5052_v33 = vpop.permute.xlu2 %2896  ;;  %v2016_v0 = vrot.slane %v2015_v47, 4  ;;  %3243 = vmatpush.bf16.msra.mxu0 %v3236_v21  ;;  %v2205_v4 = vsel %vm4043_vm8, %v3469_v26, %v2204_v5 }
 0x165   : > { %v2555_v55 = vpop.permute.xlu1 %2554  ;;  %v2024_v7 = vrot.slane %v2022_v49, 4  ;;  %v2786_v2 = vpack.c.b16 %v2765_v28, %v2764_v37  ;;  %v2852_v30 = vunpack.c.l.b16 %v2205_v4 }
 0x166   : > { %v5040_v25 = vsel %vm3018_vm11, %v4873_v56, %v2555_v55  ;;  %v3465_v56 = vrot.slane %v4988_v53, 9 }
 0x167   : > { %v2025_v52 = vor.u32 %v2024_v7, %v2020_v20  ;;  %2732 = vrot.lane.b32.xlu2 %v2706_v51, %s3542_s23  ;;  %v2178_v51 = vrot.slane %v2176_v18, 4  ;;  %v1099_v7 = vshll.u32 %v991_v44, 16 }
 0x168   : > { %2740 = vrot.lane.b32.xlu0 %v2710_v62, %s3542_s23  ;;  %v2177_v24 = vsel %vm4043_vm8, %v3465_v56, %v2176_v18  ;;  %v2021_v62 = vsel %vm3614_vm5, %v2016_v0, %v2020_v20  ;;  %v2206_v20 = vrot.slane %v2204_v5, 4  ;;  %v1595_v5 = vld [vmem:[#allocation2 + $0xc8] sm:$0xff] }
 0x169   : > { %v2026_v38 = vrot.slane %v2025_v52, 4  ;;  %v2844_v57 = vunpack.c.l.b16 %v2177_v24  ;;  %v2180_v55 = vsel %vm4043_vm8, %v2178_v51, %v2179_v11  ;;  %v1101_v56 = vrot.slane %v1099_v7, 5  ;;  %v5749_v51 = vld [vmem:[#allocation4_spill] sm:$0xff] }
 0x16a   : > { %v2577_v27 = vpop.permute.xlu0 %2576  ;;  %v2845_v31 = vunpack.c.l.b16 %v2180_v55  ;;  %v1482_v24 = vrot.slane %v991_v44, 5  ;;  %v5754_v7 = vld [vmem:[#allocation32_spill] sm:$0xff] }
 0x16b   : > { %v3044_v53 = vsel %vm3018_vm11, %v4896_v40, %v2577_v27  ;;  %v2031_v46 = vsel %vm3614_vm5, %v2026_v38, %v2030_v13  ;;  %v2772_v40 = vunpack.c.l.b16 %v2021_v62  ;;  %2812 = vrot.lane.b32.xlu1 %v2786_v2, %s3543_s24  ;;  %v2208_v13 = vsel %vm4043_vm8, %v2206_v20, %v2207_v17  ;;  %v5752_v17 = vld [vmem:[#allocation10_spill] sm:$0xff] }
 0x16c   : > { %v2773_v50 = vunpack.c.l.b16 %v2031_v46  ;;  %v2866_v12 = vpack.c.b16 %v2845_v31, %v2844_v57  ;;  %v5081_v8 = vpop.permute.xlu2 %2640  ;;  %v2853_v47 = vunpack.c.l.b16 %v2208_v13  ;;  %v3077_v18 = vsel %vm3051_vm12, %v3044_v53, %v4974_v35  ;;  %v5750_v57 = vld [vmem:[#allocation9_spill] sm:$0xff] }
 0x16d   : > { %v2649_v48 = vpop.permute.xlu1 %2648  ;;  %v1003_v27 = vpack.c.bf16 %v955_v9, %v955_v9  ;;  %v1102_v28 = vsel %vm3614_vm5, %v5748_v32, %v1101_v56  ;;  %v5755_v9 = vunpack.c.l.b16 %v5754_v7 }
 0x16e   : > { %v3069_v34 = vsel %vm3051_vm12, %v4961_v19, %v2649_v48  ;;  %v2790_v49 = vpack.c.b16 %v2773_v50, %v2772_v40  ;;  %v3500_v19 = vld [vmem:[%s5569_s1 + $0x8] sm:$0xff]  ;;  %v2870_v37 = vpack.c.b16 %v2853_v47, %v2852_v30  ;;  %v2509_v35 = vunpack.c.l.b16 %v1102_v28  ;;  %v1582_v48 = vld [vmem:[#allocation2 + $0x60] sm:$0xff] }
 0x16f   : > { %3506 = vmatpush.bf16.msra.mxu3 %v3500_v19  ;;  %3505 = vmatpush.bf16.msra.mxu2 %v3500_v19  ;;  %v1195_v11 = vshll.u32 %v1003_v27, 16  ;;  %v1510_v2 = vrot.slane %v1003_v27, 5  ;;  %v1583_v40 = vld [vmem:[#allocation2 + $0x68] sm:$0xff]  ;;  %v5108_v26 = vpack.c.bf16 %v1582_v48, %v1582_v48 }
 0x170   : > { %2820 = vrot.lane.b32.xlu2 %v2790_v49, %s3543_s24  ;;  %2892 = vrot.lane.b32.xlu0 %v2866_v12, %s3544_s25  ;;  %v2538_v45 = vpack.c.b16 %v2509_v35, %v5749_v51  ;;  %v1594_v49 = vld [vmem:[#allocation2 + $0xc0] sm:$0xff] }
 0x171   : > { %3504 = vmatpush.bf16.msra.mxu1 %v3500_v19  ;;  %3244 = vmatpush.bf16.msra.mxu0 %v3500_v19  ;;  %v1197_v0 = vrot.slane %v1195_v11, 5  ;;  %v5753_v19 = vld [vmem:[#allocation37_spill] sm:$0xff]  ;;  %v2668_v56 = vunpack.c.l.b16 %v5108_v26  ;;  %v1721_v11 = vshrl.u32 %v5108_v26, 16  ;;  %v1724_v32 = vshll.u32 %v5108_v26, 16 }
 0x172   : > { %v2729_v23 = vpop.permute.xlu0 %2728  ;;  %v1511_v12 = vsel %vm4043_vm8, %v5753_v19, %v1510_v2 }
 0x173   : > { %v3102_v29 = vsel %vm3084_vm14, %v3069_v34, %v2729_v23  ;;  %3509 = vmatpush.bf16.msra.mxu3 %v3499_v58  ;;  %3508 = vmatpush.bf16.msra.mxu2 %v3499_v58  ;;  %v1198_v39 = vsel %vm3614_vm5, %v5750_v57, %v1197_v0  ;;  %v5751_v34 = vld [vmem:[#allocation33_spill] sm:$0xff]  ;;  %v5115_v23 = vpack.c.bf16 %v1583_v40, %v1583_v40  ;;  %v2597_v13 = vunpack.c.l.b16 %v1511_v12  ;;  %v1596_v0 = vld [vmem:[#allocation2 + $0xd0] sm:$0x3] }
 0x174   : > { %2900 = vrot.lane.b32.xlu1 %v2870_v37, %s3544_s25  ;;  %v5097_v46 = vpop.permute.xlu2 %2792  ;;  %v2517_v50 = vunpack.c.l.b16 %v1198_v39  ;;  %v1483_v55 = vsel %vm4043_vm8, %v5751_v34, %v1482_v24  ;;  %v3135_v4 = vsel %vm3117_vm15, %v3102_v29, %v5012_v42  ;;  %v5130_v42 = vpack.c.bf16 %v1594_v49, %v1594_v49 }
 0x175   : > { %v2737_v52 = vpop.permute.xlu1 %2736  ;;  %3507 = vmatpush.bf16.msra.mxu1 %v3499_v58  ;;  %3245 = vmatpush.bf16.msra.mxu0 %v3499_v58  ;;  %v2589_v31 = vunpack.c.l.b16 %v1483_v55  ;;  %v2669_v47 = vunpack.c.l.b16 %v5115_v23  ;;  %v5132_v29 = vpack.c.bf16 %v1595_v5, %v1595_v5  ;;  %v1723_v24 = vrot.slane %v1721_v11, 4 }
 0x176   : > { %v3110_v3 = vsel %vm3084_vm14, %v3077_v18, %v2737_v52  ;;  %v2542_v44 = vpack.c.b16 %v2517_v50, %v5752_v17  ;;  %v5756_v18 = vld [vmem:[#allocation36_spill] sm:$0xff]  ;;  %v1726_v51 = vrot.slane %v1724_v32, 5  ;;  %v1644_v40 = vpack.c.bf16 %v1596_v0, %v1596_v0 }
 0x177   : > { %v2618_v30 = vpack.c.b16 %v2589_v31, %v5755_v9  ;;  %v5757_v27 = vunpack.c.l.b16 %v5756_v18  ;;  %v2677_v35 = vunpack.c.l.b16 %v5132_v29  ;;  %v1817_v31 = vshrl.u32 %v5130_v42, 16 }
 0x178   : > { %2556 = vrot.lane.b32.xlu2 %v2538_v45, %s3540_s21  ;;  %2564 = vrot.lane.b32.xlu0 %v2542_v44, %s3540_s21  ;;  %v1734_v45 = vshrl.u32 %v5115_v23, 16  ;;  %v1727_v50 = vor.u32 %v1726_v51, %v1723_v24  ;;  %v1826_v49 = vshll.u32 %v5132_v29, 16  ;;  %v1830_v5 = vshrl.u32 %v5132_v29, 16 }
 0x179   : > { %v1836_v17 = vshll.u32 %v1644_v40, 16  ;;  %v2148_v24 = vrot.slane %v5132_v29, 5  ;;  %v2151_v51 = vrot.slane %v1644_v40, 5 }
 0x17a   : > { %v2817_v38 = vpop.permute.xlu0 %2816  ;;  %v1736_v34 = vrot.slane %v1734_v45, 4  ;;  %v1728_v19 = vrot.slane %v1727_v50, 4  ;;  %v1832_v7 = vrot.slane %v1830_v5, 4  ;;  %v970_v45 = vld [vmem:[#allocation2 + $0x130] sm:$0x3] }
 0x17b   : > { %v3143_v53 = vsel %vm3117_vm15, %v3110_v3, %v2817_v38  ;;  %v2622_v3 = vpack.c.b16 %v2597_v13, %v5757_v27  ;;  %v2698_v38 = vpack.c.b16 %v2669_v47, %v2668_v56  ;;  %v1838_v9 = vrot.slane %v1836_v17, 5 }
 0x17c   : > { %v3176_v21 = vsel %vm3150_vm0, %v3143_v53, %v5052_v33  ;;  %v1584_v33 = vld [vmem:[#allocation2 + $0x70] sm:$0x3]  ;;  %2636 = vrot.lane.b32.xlu1 %v2618_v30, %s3541_s22  ;;  %v1730_v53 = vshll.u32 %v5115_v23, 16  ;;  %v3457_v56 = vrot.slane %v5108_v26, 9  ;;  %v2150_v40 = vrot.slane %v2148_v24, 4 }
 0x17d   : > { %v2889_v62 = vpop.permute.xlu1 %2888  ;;  %3491 = vmatmul.msk.bf16.vlgmr.msra.gmra.mxu3 %vm3201_vm1, %v3176_v21  ;;  %v1632_v37 = vpack.c.bf16 %v1584_v33, %v1584_v33  ;;  %v1820_v21 = vshll.u32 %v5130_v42, 16  ;;  %v1828_v33 = vrot.slane %v1826_v49, 5  ;;  %v982_v49 = vld [vmem:[#allocation2 + $0x190] sm:$0x3] }
 0x17e   : > { %v3168_v58 = vsel %vm3150_vm0, %v3135_v4, %v2889_v62  ;;  %v5144_v62 = vpop.permute.xlu2 %2880  ;;  %v1732_v57 = vrot.slane %v1730_v53, 5  ;;  %v1819_v4 = vrot.slane %v1817_v31, 4  ;;  %v2152_v17 = vsel %vm4043_vm8, %v2150_v40, %v2151_v51 }
 0x17f   : > { %3487 = vmatmul.msk.bf16.vlgmr.msra.gmra.mxu2 %vm3201_vm1, %v3168_v58  ;;  %v1740_v2 = vshll.u32 %v1632_v37, 16  ;;  %v2120_v58 = vrot.slane %v5115_v23, 5  ;;  %v2123_v11 = vrot.slane %v1632_v37, 5 }
 0x180   : > { %2644 = vrot.lane.b32.xlu2 %v2622_v3, %s3541_s22  ;;  %v1737_v12 = vor.u32 %v1736_v34, %v1732_v57  ;;  %2716 = vrot.lane.b32.xlu0 %v2698_v38, %s3542_s23  ;;  %v1733_v30 = vsel %vm3614_vm5, %v1728_v19, %v1732_v57  ;;  %v1833_v3 = vor.u32 %v1832_v7, %v1828_v33  ;;  %v3461_v38 = vrot.slane %v5130_v42, 9 }
 0x181   : > { %v1742_v55 = vrot.slane %v1740_v2, 5  ;;  %v2748_v18 = vunpack.c.l.b16 %v1733_v30  ;;  %v2122_v0 = vrot.slane %v2120_v58, 4  ;;  %v2837_v19 = vunpack.c.l.b16 %v2152_v17  ;;  %v1621_v17 = vld [vmem:[#allocation2 + $0x198] sm:$0xff] }
 0x182   : > { %v2561_v20 = vpop.permute.xlu0 %2560  ;;  %v1738_v13 = vrot.slane %v1737_v12, 4  ;;  %v1834_v53 = vrot.slane %v1833_v3, 4  ;;  %v2149_v29 = vsel %vm4043_vm8, %v3461_v38, %v2148_v24 }
 0x183   : > { %v5128_v52 = vsel %vm3018_vm11, %v4914_v10, %v2561_v20  ;;  %v2676_v10 = vunpack.c.l.b16 %v5130_v42  ;;  %v2124_v23 = vsel %vm4043_vm8, %v2122_v0, %v2123_v11 }
 0x184   : > { %v1743_v32 = vsel %vm3614_vm5, %v1738_v13, %v1742_v55  ;;  %v3061_v37 = vsel %vm3051_vm12, %v5128_v52, %v5081_v8  ;;  %v1839_v57 = vsel %vm3614_vm5, %v1834_v53, %v1838_v9  ;;  %v2836_v52 = vunpack.c.l.b16 %v2149_v29  ;;  %v5758_v9 = vld [vmem:[#allocation47_spill] sm:$0xff] }
 0x185   : > { %v2633_v28 = vpop.permute.xlu1 %2632  ;;  %v2702_v48 = vpack.c.b16 %v2677_v35, %v2676_v10  ;;  %v2749_v10 = vunpack.c.l.b16 %v1743_v32  ;;  %v2757_v55 = vunpack.c.l.b16 %v1839_v57  ;;  %v1392_v30 = vshrl.u32 %v5758_v9, 16 }
 0x186   : > { %v3053_v39 = vsel %vm3051_vm12, %v5029_v36, %v2633_v28  ;;  %v1822_v36 = vrot.slane %v1820_v21, 5  ;;  %v2121_v28 = vsel %vm4043_vm8, %v3457_v56, %v2120_v58  ;;  %v1018_v21 = vpack.c.bf16 %v970_v45, %v970_v45  ;;  %v5759_v56 = vld [vmem:[#allocation48_spill] sm:$0xff] }
 0x187   : > { %2724 = vrot.lane.b32.xlu1 %v2702_v48, %s3542_s23  ;;  %v2828_v26 = vunpack.c.l.b16 %v2121_v28  ;;  %v2778_v2 = vpack.c.b16 %v2749_v10, %v2748_v18  ;;  %v5172_v48 = vpop.permute.xlu2 %2650  ;;  %v1395_v13 = vshll.u32 %v5758_v9, 16  ;;  %v1401_v58 = vshll.u32 %v5759_v56, 16 }
 0x188   : > { %v1823_v27 = vor.u32 %v1822_v36, %v1819_v4  ;;  %v1315_v12 = vshll.u32 %v1018_v21, 16  ;;  %v1030_v36 = vpack.c.bf16 %v982_v49, %v982_v49  ;;  %v1394_v3 = vrot.slane %v1392_v30, 4 }
 0x189   : > { %2796 = vrot.lane.b32.xlu2 %v2778_v2, %s3543_s24  ;;  %v1397_v11 = vrot.slane %v1395_v13, 5  ;;  %v1403_v32 = vrot.slane %v1401_v58, 5  ;;  %v1570_v57 = vrot.slane %v5759_v56, 5 }
 0x18a   : > { %v2713_v44 = vpop.permute.xlu0 %2712  ;;  %v1824_v35 = vrot.slane %v1823_v27, 4  ;;  %v1317_v7 = vrot.slane %v1315_v12, 5  ;;  %v1411_v18 = vshll.u32 %v1030_v36, 16 }
 0x18b   : > { %v5153_v20 = vsel %vm3084_vm14, %v3053_v39, %v2713_v44  ;;  %v2829_v39 = vunpack.c.l.b16 %v2124_v23  ;;  %v1398_v10 = vor.u32 %v1397_v11, %v1394_v3  ;;  %v5760_v23 = vld [vmem:[#allocation21_spill] sm:$0xff] }
 0x18c   : > { %v1829_v42 = vsel %vm3614_vm5, %v1824_v35, %v1828_v33  ;;  %v2862_v33 = vpack.c.b16 %v2837_v19, %v2836_v52  ;;  %v1413_v38 = vrot.slane %v1411_v18, 5  ;;  %v1545_v35 = vrot.slane %v1018_v21, 5  ;;  %v1610_v52 = vld [vmem:[#allocation2 + $0x140] sm:$0xff] }
 0x18d   : > { %v2721_v47 = vpop.permute.xlu1 %2720  ;;  %v2756_v34 = vunpack.c.l.b16 %v1829_v42  ;;  %v2858_v8 = vpack.c.b16 %v2829_v39, %v2828_v26  ;;  %v1318_v24 = vsel %vm3614_vm5, %v5760_v23, %v1317_v7  ;;  %v1399_v45 = vrot.slane %v1398_v10, 4  ;;  %v1622_v19 = vld [vmem:[#allocation2 + $0x1a0] sm:$0xff] }
 0x18e   : > { %v3094_v31 = vsel %vm3084_vm14, %v3061_v37, %v2721_v47  ;;  %v1405_v47 = vshrl.u32 %v5759_v56, 16  ;;  %v2527_v37 = vunpack.c.l.b16 %v1318_v24  ;;  %v3454_v42 = vrot.slane %v5758_v9, 9  ;;  %v1611_v56 = vld [vmem:[#allocation2 + $0x148] sm:$0x3] }
 0x18f   : > { %v2782_v5 = vpack.c.b16 %v2757_v55, %v2756_v34  ;;  %2876 = vrot.lane.b32.xlu1 %v2858_v8, %s3544_s25  ;;  %v5192_v28 = vpop.permute.xlu2 %2738  ;;  %v1573_v39 = vrot.slane %v1030_v36, 5  ;;  %v5762_v55 = vld [vmem:[#allocation22_spill] sm:$0xff]  ;;  %v3119_v40 = vsel %vm3117_vm15, %v5153_v20, %v5097_v46  ;;  %v1609_v8 = vld [vmem:[#allocation2 + $0x138] sm:$0xff]  ;;  %v1572_v36 = vrot.slane %v1570_v57, 4  ;;  %v5763_v46 = vld [vmem:[#allocation15_spill] sm:$0xff] }
 0x190   : > { %v1407_v0 = vrot.slane %v1405_v47, 4  ;;  %v1546_v29 = vsel %vm4043_vm8, %v5762_v55, %v1545_v35  ;;  %v5764_v20 = vunpack.c.l.b16 %v5763_v46  ;;  %v5220_v30 = vpack.c.bf16 %v1609_v8, %v1609_v8 }
 0x191   : > { %2804 = vrot.lane.b32.xlu0 %v2782_v5, %s3543_s24  ;;  %2884 = vrot.lane.b32.xlu2 %v2862_v33, %s3544_s25  ;;  %v2607_v49 = vunpack.c.l.b16 %v1546_v29  ;;  %v1571_v5 = vsel %vm4043_vm8, %v3454_v42, %v1570_v57  ;;  %v5222_v13 = vpack.c.bf16 %v1610_v52, %v1610_v52  ;;  %v1574_v47 = vsel %vm4043_vm8, %v1572_v36, %v1573_v39 }
 0x192   : > { %v2801_v50 = vpop.permute.xlu0 %2800  ;;  %v1408_v51 = vor.u32 %v1407_v0, %v1403_v32  ;;  %v2614_v9 = vunpack.c.l.b16 %v1571_v5  ;;  %v5226_v18 = vpack.c.bf16 %v1621_v17, %v1621_v17  ;;  %v5228_v3 = vpack.c.bf16 %v1622_v19, %v1622_v19 }
 0x193   : > { %v3127_v4 = vsel %vm3117_vm15, %v3094_v31, %v2801_v50  ;;  %v5761_v50 = vld [vmem:[#allocation23_spill] sm:$0xff]  ;;  %v2627_v7 = vpack.c.b16 %v2607_v49, %v5764_v20  ;;  %v2687_v10 = vunpack.c.l.b16 %v5222_v13  ;;  %v1659_v24 = vpack.c.bf16 %v1611_v56, %v1611_v56 }
 0x194   : > { %v3160_v53 = vsel %vm3150_vm0, %v3127_v4, %v5144_v62  ;;  %v1409_v2 = vrot.slane %v1408_v51, 4  ;;  %v2547_v34 = vpack.c.b16 %v2527_v37, %v5761_v50  ;;  %v1404_v62 = vsel %vm3614_vm5, %v1399_v45, %v1403_v32  ;;  %v1623_v51 = vld [vmem:[#allocation2 + $0x1a8] sm:$0x3] }
 0x195   : > { %v2873_v44 = vpop.permute.xlu1 %2872  ;;  %3483 = vmatmul.msk.bf16.vlgmr.msra.gmra.mxu1 %vm3201_vm1, %v3160_v53  ;;  %v2534_v21 = vunpack.c.l.b16 %v1404_v62  ;;  %v2615_v32 = vunpack.c.l.b16 %v1574_v47  ;;  %v2694_v35 = vunpack.c.l.b16 %v5226_v18  ;;  %v2695_v53 = vunpack.c.l.b16 %v5228_v3 }
 0x196   : > { %v1414_v31 = vsel %vm3614_vm5, %v1409_v2, %v1413_v38  ;;  %v3152_v33 = vsel %vm3150_vm0, %v3119_v40, %v2873_v44  ;;  %v2686_v38 = vunpack.c.l.b16 %v5220_v30  ;;  %v1937_v2 = vshrl.u32 %v5220_v30, 16 }
 0x197   : > { %v2535_v4 = vunpack.c.l.b16 %v1414_v31  ;;  %3479 = vmatmul.msk.bf16.vlgmr.msra.gmra.mxu0 %vm3201_vm1, %v3152_v33  ;;  %v5233_v11 = vpop.permute.xlu2 %2890  ;;  %v2631_v37 = vpack.c.b16 %v2615_v32, %v2614_v9  ;;  %v1946_v42 = vshll.u32 %v5222_v13, 16  ;;  %v1950_v57 = vshrl.u32 %v5222_v13, 16 }
 0x198   : > { %v2707_v45 = vpack.c.b16 %v2687_v10, %v2686_v38  ;;  %v1956_v39 = vshll.u32 %v1659_v24, 16  ;;  %v1939_v50 = vrot.slane %v1937_v2, 4  ;;  %v2033_v8 = vshrl.u32 %v5226_v18, 16 }
 0x199   : > { %2574 = vrot.lane.b32.xlu0 %v2547_v34, %s3540_s21  ;;  %v2551_v58 = vpack.c.b16 %v2535_v4, %v2534_v21  ;;  %2654 = vrot.lane.b32.xlu2 %v2627_v7, %s3541_s22  ;;  %v1948_v55 = vrot.slane %v1946_v42, 5  ;;  %v1952_v29 = vrot.slane %v1950_v57, 4  ;;  %v2036_v31 = vshll.u32 %v5226_v18, 16 }
 0x19a   : > { %v2571_v27 = vpop.permute.xlu0 %2570  ;;  %v1958_v40 = vrot.slane %v1956_v39, 5  ;;  %v2042_v21 = vshll.u32 %v5228_v3, 16  ;;  %v2046_v49 = vshrl.u32 %v5228_v3, 16  ;;  %v2035_v17 = vrot.slane %v2033_v8, 4 }
 0x19b   : > { %v3038_v0 = vsel %vm3018_vm11, %v4858_v54, %v2571_v27  ;;  %2582 = vrot.lane.b32.xlu1 %v2551_v58, %s3540_s21  ;;  %v1940_v54 = vshll.u32 %v5220_v30, 16  ;;  %v2711_v27 = vpack.c.b16 %v2695_v53, %v2694_v35  ;;  %v1953_v5 = vor.u32 %v1952_v29, %v1948_v55 }
 0x19c   : > { %v2038_v33 = vrot.slane %v2036_v31, 5  ;;  %v2044_v46 = vrot.slane %v2042_v21, 5  ;;  %v2048_v20 = vrot.slane %v2046_v49, 4  ;;  %v2183_v56 = vrot.slane %v5222_v13, 5 }
 0x19d   : > { %v2579_v26 = vpop.permute.xlu1 %2578  ;;  %v1942_v34 = vrot.slane %v1940_v54, 5  ;;  %v1954_v7 = vrot.slane %v1953_v5, 4  ;;  %v2186_v58 = vrot.slane %v1659_v24, 5  ;;  %v3071_v10 = vsel %vm3051_vm12, %v3038_v0, %v5172_v48 }
 0x19e   : > { %v3046_v23 = vsel %vm3018_vm11, %v4985_v14, %v2579_v26  ;;  %v5251_v14 = vpack.c.bf16 %v1623_v51, %v1623_v51  ;;  %v2039_v32 = vor.u32 %v2038_v33, %v2035_v17  ;;  %v2049_v38 = vor.u32 %v2048_v20, %v2044_v46  ;;  %v5765_v17 = vld [vmem:[#allocation45_spill] sm:$0xff]  ;;  %v5766_v33 = vld [vmem:[#allocation46_spill] sm:$0xff] }
 0x19f   : > { %v1943_v52 = vor.u32 %v1942_v34, %v1939_v50  ;;  %v5265_v47 = vpop.permute.xlu2 %2634  ;;  %v1959_v35 = vsel %vm3614_vm5, %v1954_v7, %v1958_v40  ;;  %v2185_v51 = vrot.slane %v2183_v56, 4  ;;  %v3470_v48 = vrot.slane %v5226_v18, 9  ;;  %v946_v34 = vld [vmem:[#allocation2 + $0x70] sm:$0x3] }
 0x1a0   : > { %v2052_v19 = vshll.u32 %v5251_v14, 16  ;;  %v2767_v13 = vunpack.c.l.b16 %v1959_v35  ;;  %v2040_v24 = vrot.slane %v2039_v32, 4  ;;  %v2211_v0 = vrot.slane %v5228_v3, 5 }
 0x1a1   : > { %2662 = vrot.lane.b32.xlu0 %v2631_v37, %s3541_s22  ;;  %2742 = vrot.lane.b32.xlu2 %v2711_v27, %s3542_s23  ;;  %v1944_v36 = vrot.slane %v1943_v52, 4  ;;  %v2050_v37 = vrot.slane %v2049_v38, 4  ;;  %v2187_v54 = vsel %vm4043_vm8, %v2185_v51, %v2186_v58  ;;  %v2214_v3 = vrot.slane %v5251_v14, 5 }
 0x1a2   : > { %v2659_v12 = vpop.permute.xlu0 %2658  ;;  %v2054_v9 = vrot.slane %v2052_v19, 5  ;;  %v2045_v57 = vsel %vm3614_vm5, %v2040_v24, %v2044_v46  ;;  %v2847_v50 = vunpack.c.l.b16 %v2187_v54  ;;  %v2212_v40 = vsel %vm4043_vm8, %v3470_v48, %v2211_v0 }
 0x1a3   : > { %v5249_v62 = vsel %vm3051_vm12, %v3046_v23, %v2659_v12  ;;  %v3466_v12 = vrot.slane %v5220_v30, 9  ;;  %2734 = vrot.lane.b32.xlu1 %v2707_v45, %s3542_s23  ;;  %v1949_v30 = vsel %vm3614_vm5, %v1944_v36, %v1948_v55  ;;  %v2774_v55 = vunpack.c.l.b16 %v2045_v57 }
 0x1a4   : > { %v2766_v53 = vunpack.c.l.b16 %v1949_v30  ;;  %v2055_v39 = vsel %vm3614_vm5, %v2050_v37, %v2054_v9  ;;  %v2213_v8 = vrot.slane %v2211_v0, 4  ;;  %v2854_v31 = vunpack.c.l.b16 %v2212_v40  ;;  %v1597_v40 = vld [vmem:[#allocation2 + $0xd8] sm:$0xff] }
 0x1a5   : > { %v5230_v44 = vpop.permute.xlu1 %2730  ;;  %v2184_v23 = vsel %vm4043_vm8, %v3466_v12, %v2183_v56  ;;  %v2775_v29 = vunpack.c.l.b16 %v2055_v39  ;;  %v994_v5 = vpack.c.bf16 %v946_v34, %v946_v34  ;;  %v1104_v19 = vshrl.u32 %v5765_v17, 16 }
 0x1a6   : > { %v2846_v45 = vunpack.c.l.b16 %v2184_v23  ;;  %v3104_v27 = vsel %vm3084_vm14, %v3071_v10, %v5230_v44  ;;  %v2787_v42 = vpack.c.b16 %v2767_v13, %v2766_v53  ;;  %v958_v44 = vld [vmem:[#allocation2 + $0xd0] sm:$0x3]  ;;  %v1107_v12 = vshll.u32 %v5765_v17, 16 }
 0x1a7   : > { %v2791_v49 = vpack.c.b16 %v2775_v29, %v2774_v55  ;;  %v2215_v36 = vsel %vm4043_vm8, %v2213_v8, %v2214_v3  ;;  %v1113_v46 = vshll.u32 %v5766_v33, 16  ;;  %v1117_v20 = vshrl.u32 %v5766_v33, 16  ;;  %v5300_v58 = vpop.permute.xlu2 %2722  ;;  %v5767_v8 = vld [vmem:[#allocation7_spill] sm:$0xff] }
 0x1a8   : > { %v2867_v18 = vpack.c.b16 %v2847_v50, %v2846_v45  ;;  %v1006_v7 = vpack.c.bf16 %v958_v44, %v958_v44  ;;  %v2855_v14 = vunpack.c.l.b16 %v2215_v36  ;;  %v1109_v9 = vrot.slane %v1107_v12, 5  ;;  %v1586_v36 = vld [vmem:[#allocation2 + $0x80] sm:$0xff] }
 0x1a9   : > { %2814 = vrot.lane.b32.xlu0 %v2787_v42, %s3543_s24  ;;  %v1123_v56 = vshll.u32 %v994_v5, 16  ;;  %v1115_v30 = vrot.slane %v1113_v46, 5  ;;  %v1119_v32 = vrot.slane %v1117_v20, 4  ;;  %v3112_v54 = vsel %vm3084_vm14, %v5249_v62, %v5192_v28  ;;  %v5768_v20 = vld [vmem:[#allocation8_spill] sm:$0xff] }
 0x1aa   : > { %v2811_v26 = vpop.permute.xlu0 %2810  ;;  %2894 = vrot.lane.b32.xlu2 %v2867_v18, %s3544_s25  ;;  %v2871_v10 = vpack.c.b16 %v2855_v14, %v2854_v31  ;;  %v1219_v13 = vshll.u32 %v1006_v7, 16  ;;  %v3442_v42 = vrot.slane %v5765_v17, 9  ;;  %v1486_v50 = vrot.slane %v5766_v33, 5  ;;  %v1598_v31 = vld [vmem:[#allocation2 + $0xe0] sm:$0xff]  ;;  %v1587_v33 = vld [vmem:[#allocation2 + $0x88] sm:$0x3] }
 0x1ab   : > { %v3137_v21 = vsel %vm3117_vm15, %v3104_v27, %v2811_v26  ;;  %2822 = vrot.lane.b32.xlu1 %v2791_v49, %s3543_s24  ;;  %v1106_v26 = vrot.slane %v1104_v19, 4  ;;  %v1125_v53 = vrot.slane %v1123_v56, 5  ;;  %v1120_v23 = vor.u32 %v1119_v32, %v1115_v30 }
 0x1ac   : > { %v3170_v24 = vsel %vm3150_vm0, %v3137_v21, %v5233_v11  ;;  %v1221_v48 = vrot.slane %v1219_v13, 5  ;;  %v1489_v34 = vrot.slane %v994_v5, 5  ;;  %v1487_v29 = vsel %vm4043_vm8, %v3442_v42, %v1486_v50  ;;  %v1585_v5 = vld [vmem:[#allocation2 + $0x78] sm:$0xff]  ;;  %v1599_v42 = vld [vmem:[#allocation2 + $0xe8] sm:$0x3] }
 0x1ad   : > { %v5260_v4 = vpop.permute.xlu1 %2818  ;;  %v1110_v35 = vor.u32 %v1109_v9, %v1106_v26  ;;  %v1121_v45 = vrot.slane %v1120_v23, 4  ;;  %3488 = vmatmul.msk.bf16.gmra.mxu2 %vm3201_vm1, %v3170_v24  ;;  %v2590_v3 = vunpack.c.l.b16 %v1487_v29  ;;  %v1517_v49 = vrot.slane %v1006_v7, 5  ;;  %v5769_v26 = vld [vmem:[#allocation39_spill] sm:$0xff]  ;;  %v5770_v23 = vld [vmem:[#allocation38_spill] sm:$0xff] }
 0x1ae   : > { %v3145_v0 = vsel %vm3117_vm15, %v3112_v54, %v5260_v4  ;;  %v1488_v4 = vrot.slane %v1486_v50, 4  ;;  %v1222_v44 = vsel %vm3614_vm5, %v5767_v8, %v1221_v48  ;;  %v5331_v12 = vpack.c.bf16 %v1597_v40, %v1597_v40 }
 0x1af   : > { %v1111_v51 = vrot.slane %v1110_v35, 4  ;;  %v1126_v11 = vsel %vm3614_vm5, %v1121_v45, %v1125_v53  ;;  %v2875_v18 = vpop.permute.xlu2 %2874  ;;  %v2519_v21 = vunpack.c.l.b16 %v1222_v44  ;;  %v3055_v46 = vsel %vm3051_vm12, %v5040_v25, %v5265_v47 }
 0x1b0   : > { %v2511_v39 = vunpack.c.l.b16 %v1126_v11  ;;  %v1518_v9 = vsel %vm4043_vm8, %v5769_v26, %v1517_v49  ;;  %v5340_v56 = vpack.c.bf16 %v1598_v31, %v1598_v31  ;;  %v2678_v25 = vunpack.c.l.b16 %v5331_v12 }
 0x1b1   : > { %2902 = vrot.lane.b32.xlu0 %v2871_v10, %s3544_s25  ;;  %v1116_v27 = vsel %vm3614_vm5, %v1111_v51, %v1115_v30  ;;  %v2543_v14 = vpack.c.b16 %v2519_v21, %v5768_v20  ;;  %v2599_v30 = vunpack.c.l.b16 %v1518_v9  ;;  %v5345_v10 = vpack.c.bf16 %v1585_v5, %v1585_v5 }
 0x1b2   : > { %v2899_v2 = vpop.permute.xlu0 %2898  ;;  %v2510_v57 = vunpack.c.l.b16 %v1116_v27  ;;  %v2679_v47 = vunpack.c.l.b16 %v5340_v56  ;;  %v1634_v35 = vpack.c.bf16 %v1586_v36, %v1586_v36  ;;  %v1635_v53 = vpack.c.bf16 %v1587_v33, %v1587_v33 }
 0x1b3   : > { %v3178_v55 = vsel %vm3150_vm0, %v3145_v0, %v2899_v2  ;;  %v1490_v2 = vsel %vm4043_vm8, %v1488_v4, %v1489_v34  ;;  %2566 = vrot.lane.b32.xlu2 %v2543_v14, %s3540_s21  ;;  %v5771_v51 = vunpack.c.l.b16 %v5770_v23  ;;  %v1745_v24 = vshrl.u32 %v5345_v10, 16 }
 0x1b4   : > { %3492 = vmatmul.msk.bf16.gmra.mxu3 %vm3201_vm1, %v3178_v55  ;;  %v2539_v62 = vpack.c.b16 %v2511_v39, %v2510_v57  ;;  %v2591_v19 = vunpack.c.l.b16 %v1490_v2  ;;  %v1748_v45 = vshll.u32 %v5345_v10, 16  ;;  %v1754_v54 = vshll.u32 %v1634_v35, 16 }
 0x1b5   : > { %v5287_v52 = vpop.permute.xlu1 %2562  ;;  %v2623_v13 = vpack.c.b16 %v2599_v30, %v5771_v51  ;;  %v1758_v27 = vshrl.u32 %v1634_v35, 16  ;;  %v1764_v48 = vshll.u32 %v1635_v53, 16  ;;  %v3458_v0 = vrot.slane %v5345_v10, 9 }
 0x1b6   : > { %2558 = vrot.lane.b32.xlu1 %v2539_v62, %s3540_s21  ;;  %v2619_v7 = vpack.c.b16 %v2591_v19, %v2590_v3  ;;  %v3030_v32 = vsel %vm3018_vm11, %v4925_v41, %v5287_v52  ;;  %v1747_v11 = vrot.slane %v1745_v24, 4  ;;  %v1750_v57 = vrot.slane %v1748_v45, 5 }
 0x1b7   : > { %v2127_v39 = vrot.slane %v1634_v35, 5  ;;  %v2130_v50 = vrot.slane %v1635_v53, 5  ;;  %v1756_v55 = vrot.slane %v1754_v54, 5  ;;  %v1760_v62 = vrot.slane %v1758_v27, 4 }
 0x1b8   : > { %v2703_v4 = vpack.c.b16 %v2679_v47, %v2678_v25  ;;  %v1751_v40 = vor.u32 %v1750_v57, %v1747_v11  ;;  %v1647_v44 = vpack.c.bf16 %v1599_v42, %v1599_v42  ;;  %v1766_v31 = vrot.slane %v1764_v48, 5 }
 0x1b9   : > { %2638 = vrot.lane.b32.xlu0 %v2619_v7, %s3541_s22  ;;  %v5361_v29 = vpop.permute.xlu2 %2580  ;;  %v2129_v8 = vrot.slane %v2127_v39, 4  ;;  %v1761_v3 = vor.u32 %v1760_v62, %v1756_v55  ;;  %v2128_v21 = vsel %vm4043_vm8, %v3458_v0, %v2127_v39  ;;  %v2155_v2 = vrot.slane %v5340_v56, 5 }
 0x1ba   : > { %v5302_v38 = vpop.permute.xlu0 %2642  ;;  %v1752_v5 = vrot.slane %v1751_v40, 4  ;;  %v2830_v14 = vunpack.c.l.b16 %v2128_v21  ;;  %v2670_v9 = vunpack.c.l.b16 %v5345_v10  ;;  %v2671_v23 = vunpack.c.l.b16 %v1634_v35 }
 0x1bb   : > { %v3063_v34 = vsel %vm3051_vm12, %v3030_v32, %v5302_v38  ;;  %v2131_v38 = vsel %vm4043_vm8, %v2129_v8, %v2130_v50  ;;  %v1762_v36 = vrot.slane %v1761_v3, 4  ;;  %v2157_v33 = vrot.slane %v2155_v2, 4 }
 0x1bc   : > { %v1757_v20 = vsel %vm3614_vm5, %v1752_v5, %v1756_v55  ;;  %v2831_v26 = vunpack.c.l.b16 %v2131_v38  ;;  %v1844_v24 = vshll.u32 %v5331_v12, 16  ;;  %v1850_v54 = vshll.u32 %v5340_v56, 16 }
 0x1bd   : > { %v2715_v37 = vpop.permute.xlu1 %2714  ;;  %v1767_v30 = vsel %vm3614_vm5, %v1762_v36, %v1766_v31  ;;  %v2750_v32 = vunpack.c.l.b16 %v1757_v20  ;;  %v1860_v35 = vshll.u32 %v1647_v44, 16  ;;  %v3048_v15 = vsel %vm3018_vm11, %v5000_v6, %v5361_v29 }
 0x1be   : > { %v3088_v41 = vsel %vm3084_vm14, %v3055_v46, %v2715_v37  ;;  %2646 = vrot.lane.b32.xlu1 %v2623_v13, %s3541_s22  ;;  %v2158_v46 = vrot.slane %v1647_v44, 5  ;;  %v2751_v25 = vunpack.c.l.b16 %v1767_v30  ;;  %v1841_v13 = vshrl.u32 %v5331_v12, 16  ;;  %v5418_v30 = vld [vmem:[%s5570_s2] ss:$0 sm:$0xff] }
 0x1bf   : > { %v1846_v48 = vrot.slane %v1844_v24, 5 }
 0x1c0   : > { %v2159_v51 = vsel %vm4043_vm8, %v2157_v33, %v2158_v46  ;;  %v2779_v45 = vpack.c.b16 %v2751_v25, %v2750_v32  ;;  %v1843_v27 = vrot.slane %v1841_v13, 4 }
 0x1c1   : > { %2726 = vrot.lane.b32.xlu0 %v2703_v4, %s3542_s23  ;;  %v2839_v42 = vunpack.c.l.b16 %v2159_v51 }
 0x1c2   : > { %v2795_v28 = vpop.permute.xlu0 %2794  ;;  %v1847_v11 = vor.u32 %v1846_v48, %v1843_v27 }
 0x1c3   : > { %v3121_v37 = vsel %vm3117_vm15, %v3088_v41, %v2795_v28  ;;  %v3462_v28 = vrot.slane %v5331_v12, 9  ;;  %v2859_v41 = vpack.c.b16 %v2831_v26, %v2830_v14  ;;  %v1852_v12 = vrot.slane %v1850_v54, 5 }
 0x1c4   : > { %v3154_v19 = vsel %vm3150_vm0, %v3121_v37, %v2875_v18  ;;  %v3096_v18 = vsel %vm3084_vm14, %v3063_v34, %v5300_v58  ;;  %v2699_v58 = vpack.c.b16 %v2671_v23, %v2670_v9  ;;  %v1848_v39 = vrot.slane %v1847_v11, 4 }
 0x1c5   : > { %v5329_v17 = vpop.permute.xlu1 %2802  ;;  %3480 = vmatmul.msk.bf16.gmra.mxu0 %vm3201_vm1, %v3154_v19  ;;  %v2156_v47 = vsel %vm4043_vm8, %v3462_v28, %v2155_v2  ;;  %v1862_v34 = vrot.slane %v1860_v35, 5 }
 0x1c6   : > { %v3129_v53 = vsel %vm3117_vm15, %v3096_v18, %v5329_v17  ;;  %v1854_v17 = vshrl.u32 %v5340_v56, 16  ;;  %2798 = vrot.lane.b32.xlu1 %v2779_v45, %s3543_s24  ;;  %v2838_v0 = vunpack.c.l.b16 %v2156_v47  ;;  %2718 = vrot.lane.b32.xlu2 %v2699_v58, %s3542_s23  ;;  %v1853_v56 = vsel %vm3614_vm5, %v1848_v39, %v1852_v12 }
 0x1c7   : > { %v2758_v4 = vunpack.c.l.b16 %v1853_v56 }
 0x1c8   : > { %v1856_v57 = vrot.slane %v1854_v17, 4  ;;  %v2863_v62 = vpack.c.b16 %v2839_v42, %v2838_v0 }
 0x1c9   : > { %2878 = vrot.lane.b32.xlu0 %v2859_v41, %s3544_s25 }
 0x1ca   : > { %v2883_v52 = vpop.permute.xlu0 %2882  ;;  %v1857_v50 = vor.u32 %v1856_v57, %v1852_v12 }
 0x1cb   : > { %v3162_v10 = vsel %vm3150_vm0, %v3129_v53, %v2883_v52  ;;  %v2733_v52 = vpop.permute.xlu2 %2732 }
 0x1cc   : > { %3484 = vmatmul.msk.bf16.gmra.mxu1 %vm3201_vm1, %v3162_v10  ;;  %v1858_v37 = vrot.slane %v1857_v50, 4 }
 0x1cd   : > { %v2573_v49 = vpop.permute.xlu1 %2572 }
 0x1ce   : > { %v1863_v40 = vsel %vm3614_vm5, %v1858_v37, %v1862_v34  ;;  %2886 = vrot.lane.b32.xlu1 %v2863_v62, %s3544_s25  ;;  %v3040_v8 = vsel %vm3018_vm11, %v4966_v63, %v2573_v49 }
 0x1cf   : > { %v2759_v44 = vunpack.c.l.b16 %v1863_v40 }
 0x1d1   : > { %v2783_v2 = vpack.c.b16 %v2759_v44, %v2758_v4 }
 0x1d2   : > { %v2653_v7 = vpop.permute.xlu0 %2652 }
 0x1d3   : > { %v3073_v3 = vsel %vm3051_vm12, %v3040_v8, %v2653_v7  ;;  %v2821_v21 = vpop.permute.xlu2 %2820  ;;  %2806 = vrot.lane.b32.xlu2 %v2783_v2, %s3543_s24 }
 0x1d4   : > { %v3106_v5 = vsel %vm3084_vm14, %v3073_v3, %v2733_v52 }
 0x1d5   : > { %v2661_v22 = vpop.permute.xlu1 %2660 }
 0x1d6   : > { %v3081_v63 = vsel %vm3051_vm12, %v3048_v15, %v2661_v22 }
 0x1da   : > { %v2741_v55 = vpop.permute.xlu0 %2740 }
 0x1db   : > { %v3114_v49 = vsel %vm3084_vm14, %v3081_v63, %v2741_v55  ;;  %v2557_v46 = vpop.permute.xlu2 %2556 }
 0x1dc   : > { %v3147_v33 = vsel %vm3117_vm15, %v3114_v49, %v2821_v21  ;;  %v3024_v32 = vsel %vm3018_vm11, %v4893_v59, %v2557_v46 }
 0x1dd   : > { %v2813_v31 = vpop.permute.xlu1 %2812 }
 0x1de   : > { %v3139_v38 = vsel %vm3117_vm15, %v3106_v5, %v2813_v31 }
 0x1e2   : > { %v2893_v28 = vpop.permute.xlu0 %2892 }
 0x1e3   : > { %v3172_v19 = vsel %vm3150_vm0, %v3139_v38, %v2893_v28  ;;  %v2645_v14 = vpop.permute.xlu2 %2644 }
 0x1e4   : > { %3489 = vmatmul.msk.bf16.gmra.mxu2 %vm3201_vm1, %v3172_v19 }
 0x1e6   : > { %v2901_v36 = vpop.permute.xlu1 %2900 }
 0x1e7   : > { %v3180_v20 = vsel %vm3150_vm0, %v3147_v33, %v2901_v36 }
 0x1e8   : > { %3493 = vmatmul.msk.bf16.gmra.mxu3 %vm3201_vm1, %v3180_v20 }
 0x1ea   : > { %v2565_v26 = vpop.permute.xlu0 %2564 }
 0x1eb   : > { %v2797_v7 = vpop.permute.xlu2 %2796  ;;  %v3032_v25 = vsel %vm3018_vm11, %v4832_v60, %v2565_v26 }
 0x1ec   : > { %v3065_v59 = vsel %vm3051_vm12, %v3032_v25, %v2645_v14 }
 0x1ee   : > { %v2637_v6 = vpop.permute.xlu1 %2636 }
 0x1ef   : > { %v3057_v18 = vsel %vm3051_vm12, %v3024_v32, %v2637_v6 }
 0x1f2   : > { %v2717_v29 = vpop.permute.xlu0 %2716 }
 0x1f3   : > { %v3090_v47 = vsel %vm3084_vm14, %v3057_v18, %v2717_v29  ;;  %v2885_v58 = vpop.permute.xlu2 %2884 }
 0x1f4   : > { %v3123_v60 = vsel %vm3117_vm15, %v3090_v47, %v2797_v7 }
 0x1f9   : > { %v2725_v9 = vpop.permute.xlu1 %2724 }
 0x1fa   : > { %v3098_v24 = vsel %vm3084_vm14, %v3065_v59, %v2725_v9 }
 0x1fb   : > { %v2655_v52 = vpop.permute.xlu2 %2654 }
 0x200   : > { %v3307_v53 = vpop.f32.mrf.mxu3 }
 0x201   : > { %v3308_v23 = vadd.f32 %v5418_v30, %v3307_v53  ;;  %v2877_v10 = vpop.permute.xlu1 %2876 }
 0x202   : > { %v3287_v51 = vpop.f32.mrf.mxu2  ;;  %v3156_v41 = vsel %vm3150_vm0, %v3123_v60, %v2877_v10 }
 0x203   : > { %3351 = vst.msk [vmem:[%s5431_s9 + $0xc0] sm:$0xff] %vm2952_vm9, %v3308_v23  ;;  %v3288_v13 = vadd.f32 %v5418_v30, %v3287_v51  ;;  %v2805_v45 = vpop.permute.xlu0 %2804  ;;  %3481 = vmatmul.msk.bf16.gmra.mxu0 %vm3201_vm1, %v3156_v41  ;;  %v2743_v39 = vpop.permute.xlu2 %2742 }
 0x204   : > { %v3131_v54 = vsel %vm3117_vm15, %v3098_v24, %v2805_v45 }
 0x205   : > { %3343 = vst.msk [vmem:[%s5431_s9 + $0x80] sm:$0xff] %vm2952_vm9, %v3288_v13  ;;  %v3164_v27 = vsel %vm3150_vm0, %v3131_v54, %v2885_v58 }
 0x206   : > { %3485 = vmatmul.msk.bf16.gmra.mxu1 %vm3201_vm1, %v3164_v27 }
 0x208   : > { %v3309_v48 = vpop.f32.mrf.mxu3 }
 0x209   : > { %v3310_v17 = vadd.f32 %v5418_v30, %v3309_v48 }
 0x20a   : > { %v3289_v35 = vpop.f32.mrf.mxu2 }
 0x20b   : > { %3352 = vst.msk [vmem:[%s5431_s9 + $0xc8] sm:$0xff] %vm2952_vm9, %v3310_v17  ;;  %v3290_v22 = vadd.f32 %v5418_v30, %v3289_v35  ;;  %v2575_v0 = vpop.permute.xlu0 %2574  ;;  %v2895_v44 = vpop.permute.xlu2 %2894 }
 0x20c   : > { %v3042_v56 = vsel %vm3018_vm11, %v4972_v16, %v2575_v0 }
 0x20d   : > { %3344 = vst.msk [vmem:[%s5431_s9 + $0x88] sm:$0xff] %vm2952_vm9, %v3290_v22  ;;  %v2583_v42 = vpop.permute.xlu1 %2582  ;;  %v3075_v4 = vsel %vm3051_vm12, %v3042_v56, %v2655_v52 }
 0x20e   : > { %v3050_v16 = vsel %vm3018_vm11, %v4929_v43, %v2583_v42 }
 0x212   : > { %v3267_v12 = vpop.f32.mrf.mxu1 }
 0x213   : > { %v3268_v11 = vadd.f32 %v5418_v30, %v3267_v12  ;;  %v2663_v57 = vpop.permute.xlu0 %2662  ;;  %v2567_v36 = vpop.permute.xlu2 %2566 }
 0x214   : > { %v3247_v50 = vpop.f32.mrf.mxu0  ;;  %v3083_v5 = vsel %vm3051_vm12, %v3050_v16, %v2663_v57 }
 0x215   : > { %3335 = vst.msk [vmem:[%s5431_s9 + $0x40] sm:$0xff] %vm2952_vm9, %v3268_v11  ;;  %v3248_v34 = vadd.f32 %v5418_v30, %v3247_v50  ;;  %v2735_v55 = vpop.permute.xlu1 %2734  ;;  %v3116_v28 = vsel %vm3084_vm14, %v3083_v5, %v2743_v39 }
 0x216   : > { %v3108_v40 = vsel %vm3084_vm14, %v3075_v4, %v2735_v55 }
 0x217   : > { %3327 = vst.msk [vmem:[%s5431_s9] sm:$0xff] %vm2952_vm9, %v3248_v34 }
 0x21a   : > { %v3269_v62 = vpop.f32.mrf.mxu1 }
 0x21b   : > { %v3270_v37 = vadd.f32 %v5418_v30, %v3269_v62  ;;  %v2815_v8 = vpop.permute.xlu0 %2814 }
 0x21c   : > { %v3141_v3 = vsel %vm3117_vm15, %v3108_v40, %v2815_v8  ;;  %v3249_v31 = vpop.f32.mrf.mxu0 }
 0x21d   : > { %3336 = vst.msk [vmem:[%s5431_s9 + $0x48] sm:$0xff] %vm2952_vm9, %v3270_v37  ;;  %v3174_v21 = vsel %vm3150_vm0, %v3141_v3, %v2895_v44  ;;  %v3250_v2 = vadd.f32 %v5418_v30, %v3249_v31  ;;  %v2823_v38 = vpop.permute.xlu1 %2822 }
 0x21e   : > { %3490 = vmatmul.msk.bf16.gmra.mxu2 %vm3201_vm1, %v3174_v21  ;;  %v3149_v15 = vsel %vm3117_vm15, %v3116_v28, %v2823_v38 }
 0x21f   : > { %3328 = vst.msk [vmem:[%s5431_s9 + $0x8] sm:$0xff] %vm2952_vm9, %v3250_v2 }
 0x220   : > { %v2719_v26 = vpop.permute.xlu2 %2718 }
 0x223   : > { %v2903_v19 = vpop.permute.xlu0 %2902 }
 0x224   : > { %v3182_v63 = vsel %vm3150_vm0, %v3149_v15, %v2903_v19 }
 0x225   : > { %3494 = vmatmul.msk.bf16.gmra.mxu3 %vm3201_vm1, %v3182_v63 }
 0x228   : > { %v2559_v49 = vpop.permute.xlu1 %2558 }
 0x229   : > { %v3026_v9 = vsel %vm3018_vm11, %v4805_v1, %v2559_v49  ;;  %v3034_v1 = vsel %vm3018_vm11, %v4946_v61, %v2567_v36 }
 0x22b   : > { %v2639_v43 = vpop.permute.xlu0 %2638 }
 0x22c   : > { %v3059_v7 = vsel %vm3051_vm12, %v3026_v9, %v2639_v43 }
 0x22d   : > { %v3092_v47 = vsel %vm3084_vm14, %v3059_v7, %v2719_v26  ;;  %v2807_v45 = vpop.permute.xlu2 %2806 }
 0x230   : > { %v2647_v33 = vpop.permute.xlu1 %2646  ;;  %v3292_v46 = vpop.f32.mrf.mxu2 }
 0x231   : > { %v3293_v20 = vadd.f32 %v5418_v30, %v3292_v46  ;;  %v3067_v10 = vsel %vm3051_vm12, %v3034_v1, %v2647_v33 }
 0x233   : > { %v2727_v14 = vpop.permute.xlu0 %2726  ;;  %3345 = vst.msk [vmem:[%s5431_s9 + $0x90] sm:$0xff] %vm2952_vm9, %v3293_v20 }
 0x234   : > { %v3100_v24 = vsel %vm3084_vm14, %v3067_v10, %v2727_v14 }
 0x235   : > { %v3133_v61 = vsel %vm3117_vm15, %v3100_v24, %v2807_v45 }
 0x237   : > { %v3312_v6 = vpop.f32.mrf.mxu3 }
 0x238   : > { %v3313_v29 = vadd.f32 %v5418_v30, %v3312_v6  ;;  %v3294_v32 = vpop.f32.mrf.mxu2  ;;  %v2799_v18 = vpop.permute.xlu1 %2798 }
 0x239   : > { %v3295_v25 = vadd.f32 %v5418_v30, %v3294_v32  ;;  %v3125_v53 = vsel %vm3117_vm15, %v3092_v47, %v2799_v18 }
 0x23a   : > { %3353 = vst.msk [vmem:[%s5431_s9 + $0xd0] sm:$0xff] %vm2952_vm9, %v3313_v29 }
 0x23b   : > { %v2879_v23 = vpop.permute.xlu0 %2878  ;;  %3346 = vst.msk [vmem:[%s5431_s9 + $0x98] sm:$0xff] %vm2952_vm9, %v3295_v25 }
 0x23c   : > { %v3158_v51 = vsel %vm3150_vm0, %v3125_v53, %v2879_v23 }
 0x23d   : > { %3482 = vmatmul.msk.bf16.gmra.mxu0 %vm3201_vm1, %v3158_v51 }
 0x23f   : > { %v3314_v59 = vpop.f32.mrf.mxu3 }
 0x240   : > { %v3315_v60 = vadd.f32 %v5418_v30, %v3314_v59  ;;  %v2887_v58 = vpop.permute.xlu1 %2886 }
 0x241   : > { %v3166_v54 = vsel %vm3150_vm0, %v3133_v61, %v2887_v58 }
 0x242   : > { %v3252_v13 = vpop.f32.mrf.mxu0  ;;  %3354 = vst.msk [vmem:[%s5431_s9 + $0xd8] sm:$0xff] %vm2952_vm9, %v3315_v60  ;;  %3486 = vmatmul.msk.bf16.gmra.mxu1 %vm3201_vm1, %v3166_v54 }
 0x243   : > { %v3253_v41 = vadd.f32 %v5418_v30, %v3252_v13 }
 0x245   : > { %3329 = vst.msk [vmem:[%s5431_s9 + $0x10] sm:$0xff] %vm2952_vm9, %v3253_v41 }
 0x249   : > { %v3272_v27 = vpop.f32.mrf.mxu1 }
 0x24a   : > { %v3273_v48 = vadd.f32 %v5418_v30, %v3272_v27  ;;  %v3254_v17 = vpop.f32.mrf.mxu0 }
 0x24b   : > { %v3255_v35 = vadd.f32 %v5418_v30, %v3254_v17 }
 0x24c   : > { %3337 = vst.msk [vmem:[%s5431_s9 + $0x50] sm:$0xff] %vm2952_vm9, %v3273_v48 }
 0x24d   : > { %3330 = vst.msk [vmem:[%s5431_s9 + $0x18] sm:$0xff] %vm2952_vm9, %v3255_v35 }
 0x251   : > { %v3274_v22 = vpop.f32.mrf.mxu1 }
 0x252   : > { %v3275_v52 = vadd.f32 %v5418_v30, %v3274_v22 }
 0x254   : > { %3338 = vst.msk [vmem:[%s5431_s9 + $0x58] sm:$0xff] %vm2952_vm9, %v3275_v52 }
 0x267   : > { %v3297_v0 = vpop.f32.mrf.mxu2 }
 0x268   : > { %v3298_v42 = vadd.f32 %v5418_v30, %v3297_v0 }
 0x26a   : > { %3347 = vst.msk [vmem:[%s5431_s9 + $0xa0] sm:$0xff] %vm2952_vm9, %v3298_v42 }
 0x26b   : > { %v3317_v12 = vpop.f32.mrf.mxu3 }
 0x26c   : > { %v3318_v11 = vadd.f32 %v5418_v30, %v3317_v12 }
 0x26e   : > { %3355 = vst.msk [vmem:[%s5431_s9 + $0xe0] sm:$0xff] %vm2952_vm9, %v3318_v11 }
 0x26f   : > { %v3299_v57 = vpop.f32.mrf.mxu2 }
 0x270   : > { %v3300_v39 = vadd.f32 %v5418_v30, %v3299_v57 }
 0x272   : > { %3348 = vst.msk [vmem:[%s5431_s9 + $0xa8] sm:$0xff] %vm2952_vm9, %v3300_v39 }
 0x273   : > { %v3319_v50 = vpop.f32.mrf.mxu3 }
 0x274   : > { %v3320_v34 = vadd.f32 %v5418_v30, %v3319_v50 }
 0x276   : > { %3356 = vst.msk [vmem:[%s5431_s9 + $0xe8] sm:$0xff] %vm2952_vm9, %v3320_v34 }
 0x280   : > { %v3257_v55 = vpop.f32.mrf.mxu0 }
 0x281   : > { %v3258_v62 = vadd.f32 %v5418_v30, %v3257_v55 }
 0x283   : > { %v3277_v56 = vpop.f32.mrf.mxu1  ;;  %3331 = vst.msk [vmem:[%s5431_s9 + $0x20] sm:$0xff] %vm2952_vm9, %v3258_v62 }
 0x284   : > { %v3278_v37 = vadd.f32 %v5418_v30, %v3277_v56 }
 0x286   : > { %3339 = vst.msk [vmem:[%s5431_s9 + $0x60] sm:$0xff] %vm2952_vm9, %v3278_v37 }
 0x288   : > { %v3259_v4 = vpop.f32.mrf.mxu0 }
 0x289   : > { %v3260_v40 = vadd.f32 %v5418_v30, %v3259_v4 }
 0x28b   : > { %v3279_v8 = vpop.f32.mrf.mxu1  ;;  %3332 = vst.msk [vmem:[%s5431_s9 + $0x28] sm:$0xff] %vm2952_vm9, %v3260_v40 }
 0x28c   : > { %v3280_v44 = vadd.f32 %v5418_v30, %v3279_v8 }
 0x28e   : > { %3340 = vst.msk [vmem:[%s5431_s9 + $0x68] sm:$0xff] %vm2952_vm9, %v3280_v44 }
 0x2a1   : > { %v3302_v3 = vpop.f32.mrf.mxu2 }
 0x2a2   : > { %v3303_v31 = vadd.f32 %v5418_v30, %v3302_v3 }
 0x2a4   : > { %3349 = vst.msk [vmem:[%s5431_s9 + $0xb0] sm:$0xff] %vm2952_vm9, %v3303_v31 }
 0x2a8   : > { %v3322_v21 = vpop.f32.mrf.mxu3 }
 0x2a9   : > { %v3323_v2 = vadd.f32 %v5418_v30, %v3322_v21  ;;  %v3304_v16 = vpop.f32.mrf.mxu2 }
 0x2aa   : > { %v3305_v5 = vadd.f32 %v5418_v30, %v3304_v16 }
 0x2ab   : > { %3357 = vst.msk [vmem:[%s5431_s9 + $0xf0] sm:$0xff] %vm2952_vm9, %v3323_v2 }
 0x2ac   : > { %3350 = vst.msk [vmem:[%s5431_s9 + $0xb8] sm:$0xff] %vm2952_vm9, %v3305_v5 }
 0x2b0   : > { %v3324_v38 = vpop.f32.mrf.mxu3 }
 0x2b1   : > { %v3325_v28 = vadd.f32 %v5418_v30, %v3324_v38 }
 0x2b3   : > { %3358 = vst.msk [vmem:[%s5431_s9 + $0xf8] sm:$0xff] %vm2952_vm9, %v3325_v28 }
 0x2ba   : > { %v3262_v15 = vpop.f32.mrf.mxu0 }
 0x2bb   : > { %v3263_v19 = vadd.f32 %v5418_v30, %v3262_v15 }
 0x2bd   : > { %3333 = vst.msk [vmem:[%s5431_s9 + $0x30] sm:$0xff] %vm2952_vm9, %v3263_v19 }
 0x2bf   : > { %v3282_v63 = vpop.f32.mrf.mxu1 }
 0x2c0   : > { %v3283_v49 = vadd.f32 %v5418_v30, %v3282_v63 }
 0x2c2   : > { %v3264_v43 = vpop.f32.mrf.mxu0  ;;  %3341 = vst.msk [vmem:[%s5431_s9 + $0x70] sm:$0xff] %vm2952_vm9, %v3283_v49 }
 0x2c3   : > { %v3265_v36 = vadd.f32 %v5418_v30, %v3264_v43 }
 0x2c5   : > { %3334 = vst.msk [vmem:[%s5431_s9 + $0x38] sm:$0xff] %vm2952_vm9, %v3265_v36 }
 0x2c7   : > { %v3284_v33 = vpop.f32.mrf.mxu1 }
 0x2c8   : > { %v3285_v46 = vadd.f32 %v5418_v30, %v3284_v33 }
 0x2ca   : > { %3342 = vst.msk [vmem:[%s5431_s9 + $0x78] sm:$0xff] %vm2952_vm9, %v3285_v46 }
 0x2cb PF: > { %s13_s12 = sadd.s32 1, %s3534_s12  }
 0x2cc   : > { %p10_p4 = scmp.ge.s32.totalorder %s13_s12, 4  }
 0x2ce   :  { %12 = sbr.rel (!%p10_p4) target bundleno = 1 (0x1), region = 65 }

</bundles_post_ra>
